<compile_context>
chip_gen: v5e
topology: v5e:2x2
jax: 0.10.0
libtpu: 0.0.40
codegen_flags: <defaults>
</compile_context>

<pallas_src>
import warnings

import jax
import jax.numpy as jnp
from jax.experimental import pallas as pl
from jax.experimental.pallas import tpu as pltpu

# donation not being honored would only emit a UserWarning; keep stderr clean
warnings.filterwarnings("ignore", message=".*donat.*")


def se_gate_mul_kernel(s_ref, w_ref, b_ref, x_ref, o_ref):
    # 1x1 conv on a 1x1 spatial input == matvec: (Cout_blk, Cin) @ (Cin, 1).
    # K=40, N=1 underutilizes the MXU but is negligible work and stays hidden
    # under the feature-map DMA.  Gate math is f32 regardless of input dtype.
    gate = jnp.dot(w_ref[...].astype(jnp.float32),
                   s_ref[...].astype(jnp.float32),
                   preferred_element_type=jnp.float32)        # (Cout_blk, 1)
    gate = jax.nn.sigmoid(gate + b_ref[...].astype(jnp.float32))
    # Broadcast over the flattened spatial axis; multiply in f32, single cast
    # at the store (exact for f32, avoids double-rounding if x goes bf16).
    # NOTE: at cblk >= ~960 the (cblk,1) gate column would get vreg-heavy —
    # keep num_blocks >= 2 or switch to a lane-dense gate if that ever changes.
    o_ref[...] = (gate * x_ref[...].astype(jnp.float32)).astype(o_ref.dtype)


def _se_gate_mul(x203, x200, weight, bias, num_blocks):
    """x203: (N, Cin, 1, 1), x200: (N, Cout, H, W),
    weight: (Cout, Cin, 1, 1), bias: (Cout,). Returns (N, Cout, H, W)."""
    n, cin, _, _ = x203.shape
    _, cout, h, w = x200.shape
    assert n == 1, "kernel written for batch 1 (as in the reference module)"
    assert cout % num_blocks == 0
    cblk = cout // num_blocks
    hw = h * w
    out_dtype = x200.dtype

    s = x203.reshape(cin, 1)          # (Cin, 1)
    wmat = weight.reshape(cout, cin)  # (Cout, Cin)
    bcol = bias.reshape(cout, 1)      # (Cout, 1)
    xmat = x200.reshape(cout, hw)     # (Cout, H*W)

    itemsize = jnp.dtype(out_dtype).itemsize
    cost = pl.CostEstimate(
        flops=2 * cout * cin + cout * hw,
        transcendentals=cout,
        bytes_accessed=2 * cout * hw * itemsize
        + cout * cin * jnp.dtype(wmat.dtype).itemsize
        + cout * jnp.dtype(bcol.dtype).itemsize
        + cin * jnp.dtype(s.dtype).itemsize,
    )

    out = pl.pallas_call(
        se_gate_mul_kernel,
        out_shape=jax.ShapeDtypeStruct((cout, hw), out_dtype),
        grid=(num_blocks,),
        in_specs=[
            pl.BlockSpec((cin, 1), lambda i: (0, 0)),     # squeeze vector (shared)
            pl.BlockSpec((cblk, cin), lambda i: (i, 0)),  # weight rows for this block
            pl.BlockSpec((cblk, 1), lambda i: (i, 0)),    # bias rows
            pl.BlockSpec((cblk, hw), lambda i: (i, 0)),   # feature-map rows
        ],
        out_specs=pl.BlockSpec((cblk, hw), lambda i: (i, 0)),
        # gate the feature map in place: xmat (arg index 3) aliases output 0
        input_output_aliases={3: 0},
        compiler_params=pltpu.CompilerParams(
            dimension_semantics=("parallel",)),   # shards blocks across v7x's 2 TCs
        cost_estimate=cost,
    )(s, wmat, bcol, xmat)

    return out.reshape(n, cout, h, w)


# Donate x200 (positional arg 1) so the in-kernel aliasing really eliminates
# the second HBM buffer — without donation XLA inserts a defensive copy of the
# 753 KB feature map before the pallas_call.
se_gate_mul = jax.jit(_se_gate_mul, static_argnums=(4,), donate_argnums=(1,))


def reference(x203, x200, weight, bias):
    # pure-JAX reference of the PyTorch forward
    s = x203.reshape(x203.shape[1])
    gate = jax.nn.sigmoid(
        weight.reshape(weight.shape[0], weight.shape[1]) @ s + bias)
    return gate[None, :, None, None] * x200


if __name__ == "__main__":
    key = jax.random.PRNGKey(0)
    k1, k2, k3, k4 = jax.random.split(key, 4)

    CIN, COUT, H, W = 40, 960, 14, 14

    # deterministic synthetic parameters (Conv2d(40, 960, kernel_size=1))
    weight = jax.random.normal(k1, (COUT, CIN, 1, 1), jnp.float32) * 0.05
    bias = jax.random.normal(k2, (COUT,), jnp.float32) * 0.05

    # inputs matching the module's forward signature
    x203 = jax.random.normal(k3, (1, CIN, 1, 1), jnp.float32)
    x200 = jax.random.normal(k4, (1, COUT, H, W), jnp.float32)

    # compute & materialize the reference BEFORE the kernel call: x200 is
    # donated to the kernel and must not be read afterwards.
    ref = jax.block_until_ready(reference(x203, x200, weight, bias))

    out = se_gate_mul(x203, x200, weight, bias, 2)
    out = jax.block_until_ready(out)

    assert out.shape == (1, COUT, H, W)
    assert jnp.allclose(out, ref, atol=1e-5, rtol=1e-5), "mismatch vs reference"

    print("KERNEL_OK")
</pallas_src>

<mosaic_0001>
module attributes {stable_mosaic.version = 11 : i64} {
  func.func @se_gate_mul_kernel(%arg0: i32, %arg1: memref<40x1xf32, #tpu.memory_space<vmem>>, %arg2: memref<480x40xf32, #tpu.memory_space<vmem>>, %arg3: memref<480x1xf32, #tpu.memory_space<vmem>>, %arg4: memref<480x196xf32, #tpu.memory_space<vmem>>, %arg5: memref<480x196xf32, #tpu.memory_space<vmem>>) attributes {dimension_semantics = [#tpu.dimension_semantics<parallel>], iteration_bounds = array<i64: 2>, scalar_prefetch = 0 : i64, scratch_operands = 0 : i64, tpu.core_type = #tpu.core_type<tc>, window_params = [{pipeline_mode = #tpu.pipeline_mode<synchronous>, transform_indices = @transform_0, window_bounds = array<i64: 40, 1>}, {transform_indices = @transform_1, window_bounds = array<i64: 480, 40>}, {transform_indices = @transform_2, window_bounds = array<i64: 480, 1>}, {transform_indices = @transform_3, window_bounds = array<i64: 480, 196>}, {transform_indices = @transform_4, window_bounds = array<i64: 480, 196>}]} {
    %c0 = arith.constant 0 : index
    %c0_0 = arith.constant 0 : index
    %0 = vector.load %arg2[%c0, %c0_0] : memref<480x40xf32, #tpu.memory_space<vmem>>, vector<480x40xf32>
    %c0_1 = arith.constant 0 : index
    %c0_2 = arith.constant 0 : index
    %1 = vector.load %arg1[%c0_1, %c0_2] : memref<40x1xf32, #tpu.memory_space<vmem>>, vector<40x1xf32>
    %cst = arith.constant dense<0.000000e+00> : vector<480x1xf32>
    %2 = tpu.matmul %0, %1, %cst {dimension_numbers = #tpu.dot_dimension_numbers<[1], [0], [0], [1], [0, 0, 1, 1], [], []>} : vector<480x40xf32>, vector<40x1xf32>, vector<480x1xf32> -> vector<480x1xf32>
    %c0_3 = arith.constant 0 : index
    %c0_4 = arith.constant 0 : index
    %3 = vector.load %arg3[%c0_3, %c0_4] : memref<480x1xf32, #tpu.memory_space<vmem>>, vector<480x1xf32>
    %4 = arith.addf %2, %3 : vector<480x1xf32>
    %5 = arith.negf %4 : vector<480x1xf32>
    %6 = math.exp %5 : vector<480x1xf32>
    %cst_5 = arith.constant 1.000000e+00 : f32
    %7 = vector.broadcast %cst_5 : f32 to vector<480x1xf32>
    %8 = arith.addf %7, %6 : vector<480x1xf32>
    %9 = arith.divf %7, %8 : vector<480x1xf32>
    %c0_6 = arith.constant 0 : index
    %c0_7 = arith.constant 0 : index
    %10 = vector.load %arg4[%c0_6, %c0_7] : memref<480x196xf32, #tpu.memory_space<vmem>>, vector<480x196xf32>
    %11 = vector.broadcast %9 : vector<480x1xf32> to vector<480x196xf32>
    %12 = arith.mulf %11, %10 : vector<480x196xf32>
    %c0_8 = arith.constant 0 : index
    %c0_9 = arith.constant 0 : index
    %13 = vector.load %arg5[%c0_8, %c0_9] : memref<480x196xf32, #tpu.memory_space<vmem>>, vector<480x196xf32>
    tpu.vector_store %arg5[%c0_8, %c0_9], %12 {strides = array<i32>} : memref<480x196xf32, #tpu.memory_space<vmem>>, vector<480x196xf32>,
    return
  }
  func.func @transform_0(%arg0: i32) -> (i32, i32) {
    %c0_i32 = arith.constant 0 : i32
    %c0_i32_0 = arith.constant 0 : i32
    %c0_i32_1 = arith.constant 0 : i32
    return %c0_i32, %c0_i32_0 : i32, i32
  }
  func.func @transform_1(%arg0: i32) -> (i32, i32) {
    %c0_i32 = arith.constant 0 : i32
    %c0_i32_0 = arith.constant 0 : i32
    return %arg0, %c0_i32 : i32, i32
  }
  func.func @transform_2(%arg0: i32) -> (i32, i32) {
    %c0_i32 = arith.constant 0 : i32
    %c0_i32_0 = arith.constant 0 : i32
    return %arg0, %c0_i32 : i32, i32
  }
  func.func @transform_3(%arg0: i32) -> (i32, i32) {
    %c0_i32 = arith.constant 0 : i32
    %c0_i32_0 = arith.constant 0 : i32
    return %arg0, %c0_i32 : i32, i32
  }
  func.func @transform_4(%arg0: i32) -> (i32, i32) {
    %c0_i32 = arith.constant 0 : i32
    %c0_i32_0 = arith.constant 0 : i32
    return %arg0, %c0_i32 : i32, i32
  }
}

</mosaic_0001>

<bundles_post_ra>
// kernel: _se_gate_mul.1
= control target key start
LH: loop header
LB: loop body
LE: loop exit
PB: predicated region body
PF: predicated region fallthrough
CT: control target
= control target key end

     0   :  { %s3072_s15 = smov 0   ;;  %s5704_s0 = inlined_call_operand.vmem [shape: f32[40,1], index: 0, kind: input, shape index: {}]   ;;  %s5705_s1 = inlined_call_operand.vmem [shape: f32[960,40], index: 1, kind: input, shape index: {}]   ;;  %s5706_s2 = inlined_call_operand.vmem [shape: f32[960,1], index: 2, kind: input, shape index: {}]   ;;  %s5707_s3 = inlined_call_operand.vmem [shape: f32[960,196], index: 3, kind: input, shape index: {}, may-alias: {3,4}]   ;;  %s5708_s4 = inlined_call_operand.vmem [shape: f32[960,196], index: 4, kind: output, shape index: {}, may-alias: {3,4}]  }
   0x1 LB: > { %s2636_s16 = sadd.s32 4294967295, %s3044_s15   ;;  %p2640_p0 = scmp.ge.s32.totalorder %s3044_s15, 1  ;;  %s3044_s15 = sphi %s3072_s15, %s14_s15  }
   0x2   : > { %p186_p1 = scmp.lt.s32.totalorder %s3044_s15, 3 }
   0x4   : > { %p187_p2 = pnand %p2640_p0, %p186_p1 }
   0x6   : > { %190 = sbr.rel (%p187_p2) target bundleno = 603 (0x25b), region = 36 }
   0xb   : > { %v314_v0 = vld [vmem:[%s5704_s0 + $0x20] sm:$0xff]  ;;  %v313_v1 = vld [vmem:[%s5704_s0 + $0x18] sm:$0xff]  ;;  %s224_s21 = smul.u32 60, %s2636_s16  ;;  %v312_v2 = vld [vmem:[%s5704_s0 + $0x10] sm:$0xff]  ;;  %vm375_vm0 = vcmask 326656  }
   0xc   : > { %567 = vmatpush.msra.mxu0 %v314_v0  ;;  %2771 = vmatpush.msra.mxu1 %v314_v0  ;;  %v311_v3 = vld [vmem:[%s5704_s0 + $0x8] sm:$0xff]  ;;  %v310_v4 = vld [vmem:[%s5704_s0] sm:$0xff] }
   0xd   : > { %2772 = vmatpush.msra.mxu2 %v314_v0  ;;  %2773 = vmatpush.msra.mxu3 %v314_v0  ;;  %p225_p3 = scmp.lt.s32.totalorder %s224_s21, 119 }
   0xe   : > { %568 = vmatpush.msra.mxu0 %v313_v1  ;;  %2774 = vmatpush.msra.mxu1 %v313_v1 }
   0xf   : > { %2775 = vmatpush.msra.mxu2 %v313_v1  ;;  %2776 = vmatpush.msra.mxu3 %v313_v1  ;;  %s6100_s21 = smov (!%p225_p3, %s224_s21), 119 }
  0x10   : > { %569 = vmatpush.msra.mxu0 %v312_v2  ;;  %2777 = vmatpush.msra.mxu1 %v312_v2  ;;  %s2641_s28 = sshll.u32 %s6100_s21, 3  ;;  %s2769_s9 = sshll.u32 %s6100_s21, 4 }
  0x11   : > { %2778 = vmatpush.msra.mxu2 %v312_v2  ;;  %2779 = vmatpush.msra.mxu3 %v312_v2  ;;  %s3103_s5 = scalar_lea.vmem %s5705_s1, %s2641_s28  ;;  %s3224_s8 = scalar_lea.vmem %s5706_s2, %s2641_s28 }
  0x12   : > { %570 = vmatpush.msra.mxu0 %v311_v3  ;;  %2780 = vmatpush.msra.mxu1 %v311_v3  ;;  %v250_v5 = vld [vmem:[%s3103_s5] sm:$0xff]  ;;  %v265_v6 = vld [vmem:[%s3103_s5 + $0x78] sm:$0xff]  ;;  %v280_v7 = vld [vmem:[%s3103_s5 + $0xf0] sm:$0xff]  ;;  %s4468_s12 = scalar_lea.vmem %s5707_s3, %s2769_s9  ;;  %s5094_s16 = scalar_lea.vmem %s5708_s4, %s2769_s9 }
  0x13   : > { %2781 = vmatpush.msra.mxu2 %v311_v3  ;;  %2782 = vmatpush.msra.mxu3 %v311_v3  ;;  %v295_v8 = vld [vmem:[%s3103_s5 + $0x168] sm:$0xff]  ;;  %v266_v9 = vld [vmem:[%s3103_s5 + $0x80] sm:$0xff]  ;;  %v281_v11 = vld [vmem:[%s3103_s5 + $0xf8] sm:$0xff] }
  0x14   : > { %571 = vmatpush.msra.mxu0 %v310_v4  ;;  %2783 = vmatpush.msra.mxu1 %v310_v4  ;;  %v251_v10 = vld [vmem:[%s3103_s5 + $0x8] sm:$0xff]  ;;  %v296_v12 = vld [vmem:[%s3103_s5 + $0x170] sm:$0xff]  ;;  %v282_v15 = vld [vmem:[%s3103_s5 + $0x100] sm:$0xff] }
  0x15   : > { %2784 = vmatpush.msra.mxu2 %v310_v4  ;;  %2785 = vmatpush.msra.mxu3 %v310_v4  ;;  %v267_v13 = vld [vmem:[%s3103_s5 + $0x88] sm:$0xff]  ;;  %v252_v14 = vld [vmem:[%s3103_s5 + $0x10] sm:$0xff]  ;;  %v297_v16 = vld [vmem:[%s3103_s5 + $0x178] sm:$0xff] }
  0x16   : > { %2647 = vmatmul.msk.f32.vlgmr.msra.gmra.mxu0 %vm375_vm0, %v250_v5  ;;  %2662 = vmatmul.msk.f32.vlgmr.msra.gmra.mxu1 %vm375_vm0, %v265_v6  ;;  %v253_v17 = vld [vmem:[%s3103_s5 + $0x18] sm:$0xff]  ;;  %v268_v18 = vld [vmem:[%s3103_s5 + $0x90] sm:$0xff]  ;;  %v283_v19 = vld [vmem:[%s3103_s5 + $0x108] sm:$0xff]  ;;  %v3046_v6 = vmov 0  }
  0x17   : > { %2677 = vmatmul.msk.f32.vlgmr.msra.gmra.mxu2 %vm375_vm0, %v280_v7  ;;  %2692 = vmatmul.msk.f32.vlgmr.msra.gmra.mxu3 %vm375_vm0, %v295_v8  ;;  %v298_v20 = vld [vmem:[%s3103_s5 + $0x180] sm:$0xff]  ;;  %v269_v22 = vld [vmem:[%s3103_s5 + $0x98] sm:$0xff]  ;;  %v284_v23 = vld [vmem:[%s3103_s5 + $0x110] sm:$0xff] }
  0x18   : > { %v254_v21 = vld [vmem:[%s3103_s5 + $0x20] sm:$0xff]  ;;  %v299_v24 = vld [vmem:[%s3103_s5 + $0x188] sm:$0xff]  ;;  %v285_v27 = vld [vmem:[%s3103_s5 + $0x118] sm:$0xff]  ;;  %2795 = vset.pattern.permute.xlu0 %v3046_v6  ;;  %2796 = vset.pattern.permute.xlu1 %v3046_v6 }
  0x19   : > { %v255_v25 = vld [vmem:[%s3103_s5 + $0x28] sm:$0xff]  ;;  %v270_v26 = vld [vmem:[%s3103_s5 + $0xa0] sm:$0xff]  ;;  %v300_v28 = vld [vmem:[%s3103_s5 + $0x190] sm:$0xff]  ;;  %2797 = vset.pattern.permute.xlu2 %v3046_v6 }
  0x1a   : > { %v256_v29 = vld [vmem:[%s3103_s5 + $0x30] sm:$0xff]  ;;  %v271_v30 = vld [vmem:[%s3103_s5 + $0xa8] sm:$0xff]  ;;  %v286_v31 = vld [vmem:[%s3103_s5 + $0x120] sm:$0xff] }
  0x1b   : > { %v301_v32 = vld [vmem:[%s3103_s5 + $0x198] sm:$0xff]  ;;  %v272_v34 = vld [vmem:[%s3103_s5 + $0xb0] sm:$0xff]  ;;  %v287_v35 = vld [vmem:[%s3103_s5 + $0x128] sm:$0xff] }
  0x1c   : > { %v257_v33 = vld [vmem:[%s3103_s5 + $0x38] sm:$0xff]  ;;  %v302_v36 = vld [vmem:[%s3103_s5 + $0x1a0] sm:$0xff]  ;;  %v288_v39 = vld [vmem:[%s3103_s5 + $0x130] sm:$0xff] }
  0x1d   : > { %v258_v37 = vld [vmem:[%s3103_s5 + $0x40] sm:$0xff]  ;;  %v273_v38 = vld [vmem:[%s3103_s5 + $0xb8] sm:$0xff]  ;;  %v303_v40 = vld [vmem:[%s3103_s5 + $0x1a8] sm:$0xff] }
  0x1e   : > { %2663 = vmatmul.msk.f32.gmra.mxu1 %vm375_vm0, %v266_v9  ;;  %2648 = vmatmul.msk.f32.gmra.mxu0 %vm375_vm0, %v251_v10  ;;  %v259_v41 = vld [vmem:[%s3103_s5 + $0x48] sm:$0xff]  ;;  %v274_v42 = vld [vmem:[%s3103_s5 + $0xc0] sm:$0xff]  ;;  %v289_v43 = vld [vmem:[%s3103_s5 + $0x138] sm:$0xff] }
  0x1f   : > { %2678 = vmatmul.msk.f32.gmra.mxu2 %vm375_vm0, %v281_v11  ;;  %2693 = vmatmul.msk.f32.gmra.mxu3 %vm375_vm0, %v296_v12  ;;  %v304_v44 = vld [vmem:[%s3103_s5 + $0x1b0] sm:$0xff]  ;;  %v275_v46 = vld [vmem:[%s3103_s5 + $0xc8] sm:$0xff]  ;;  %v290_v47 = vld [vmem:[%s3103_s5 + $0x140] sm:$0xff] }
  0x20   : > { %v260_v45 = vld [vmem:[%s3103_s5 + $0x50] sm:$0xff]  ;;  %v305_v48 = vld [vmem:[%s3103_s5 + $0x1b8] sm:$0xff]  ;;  %v291_v51 = vld [vmem:[%s3103_s5 + $0x148] sm:$0xff] }
  0x21   : > { %v261_v49 = vld [vmem:[%s3103_s5 + $0x58] sm:$0xff]  ;;  %v276_v50 = vld [vmem:[%s3103_s5 + $0xd0] sm:$0xff]  ;;  %v262_v52 = vld [vmem:[%s3103_s5 + $0x60] sm:$0xff] }
  0x22   : > { %v277_v53 = vld [vmem:[%s3103_s5 + $0xd8] sm:$0xff]  ;;  %v306_v54 = vld [vmem:[%s3103_s5 + $0x1c0] sm:$0xff]  ;;  %v292_v55 = vld [vmem:[%s3103_s5 + $0x150] sm:$0xff] }
  0x23   : > { %v263_v56 = vld [vmem:[%s3103_s5 + $0x68] sm:$0xff]  ;;  %v278_v57 = vld [vmem:[%s3103_s5 + $0xe0] sm:$0xff]  ;;  %v293_v58 = vld [vmem:[%s3103_s5 + $0x158] sm:$0xff] }
  0x24   : > { %v307_v59 = vld [vmem:[%s3103_s5 + $0x1c8] sm:$0xff]  ;;  %v308_v60 = vld [vmem:[%s3103_s5 + $0x1d0] sm:$0xff]  ;;  %v315_v62 = vld [vmem:[%s3224_s8] sm:$0xff] }
  0x25   : > { %v264_v61 = vld [vmem:[%s3103_s5 + $0x70] sm:$0xff]  ;;  %v330_v63 = vld [vmem:[%s3224_s8 + $0x78] sm:$0xff]  ;;  %v279_v0 = vld [vmem:[%s3103_s5 + $0xe8] sm:$0xff] }
  0x26   : > { %2664 = vmatmul.msk.f32.gmra.mxu1 %vm375_vm0, %v267_v13  ;;  %2649 = vmatmul.msk.f32.gmra.mxu0 %vm375_vm0, %v252_v14  ;;  %v294_v3 = vld [vmem:[%s3103_s5 + $0x160] sm:$0xff]  ;;  %v345_v9 = vld [vmem:[%s3224_s8 + $0xf0] sm:$0xff]  ;;  %v360_v10 = vld [vmem:[%s3224_s8 + $0x168] sm:$0xff] }
  0x27   : > { %2679 = vmatmul.msk.f32.gmra.mxu2 %vm375_vm0, %v282_v15  ;;  %2694 = vmatmul.msk.f32.gmra.mxu3 %vm375_vm0, %v297_v16  ;;  %v331_v11 = vld [vmem:[%s3224_s8 + $0x80] sm:$0xff]  ;;  %v316_v12 = vld [vmem:[%s3224_s8 + $0x8] sm:$0xff] }
  0x2e   : > { %2650 = vmatmul.msk.f32.gmra.mxu0 %vm375_vm0, %v253_v17  ;;  %2665 = vmatmul.msk.f32.gmra.mxu1 %vm375_vm0, %v268_v18 }
  0x2f   : > { %2680 = vmatmul.msk.f32.gmra.mxu2 %vm375_vm0, %v283_v19  ;;  %2695 = vmatmul.msk.f32.gmra.mxu3 %vm375_vm0, %v298_v20  ;;  %v309_v19 = vld [vmem:[%s3103_s5 + $0x1d8] sm:$0xff] }
  0x36   : > { %2651 = vmatmul.msk.f32.gmra.mxu0 %vm375_vm0, %v254_v21  ;;  %2666 = vmatmul.msk.f32.gmra.mxu1 %vm375_vm0, %v269_v22 }
  0x37   : > { %2681 = vmatmul.msk.f32.gmra.mxu2 %vm375_vm0, %v284_v23  ;;  %2696 = vmatmul.msk.f32.gmra.mxu3 %vm375_vm0, %v299_v24 }
  0x3e   : > { %2652 = vmatmul.msk.f32.gmra.mxu0 %vm375_vm0, %v255_v25  ;;  %2667 = vmatmul.msk.f32.gmra.mxu1 %vm375_vm0, %v270_v26 }
  0x3f   : > { %2682 = vmatmul.msk.f32.gmra.mxu2 %vm375_vm0, %v285_v27  ;;  %2697 = vmatmul.msk.f32.gmra.mxu3 %vm375_vm0, %v300_v28 }
  0x46   : > { %2653 = vmatmul.msk.f32.gmra.mxu0 %vm375_vm0, %v256_v29  ;;  %2668 = vmatmul.msk.f32.gmra.mxu1 %vm375_vm0, %v271_v30  ;;  %v346_v30 = vld [vmem:[%s3224_s8 + $0xf8] sm:$0xff] }
  0x47   : > { %2683 = vmatmul.msk.f32.gmra.mxu2 %vm375_vm0, %v286_v31  ;;  %2698 = vmatmul.msk.f32.gmra.mxu3 %vm375_vm0, %v301_v32  ;;  %v361_v31 = vld [vmem:[%s3224_s8 + $0x170] sm:$0xff]  ;;  %v332_v32 = vld [vmem:[%s3224_s8 + $0x88] sm:$0xff] }
  0x4e   : > { %2654 = vmatmul.msk.f32.gmra.mxu0 %vm375_vm0, %v257_v33  ;;  %2669 = vmatmul.msk.f32.gmra.mxu1 %vm375_vm0, %v272_v34 }
  0x4f   : > { %2684 = vmatmul.msk.f32.gmra.mxu2 %vm375_vm0, %v287_v35  ;;  %2699 = vmatmul.msk.f32.gmra.mxu3 %vm375_vm0, %v302_v36  ;;  %v317_v35 = vld [vmem:[%s3224_s8 + $0x10] sm:$0xff] }
  0x56   : > { %2655 = vmatmul.msk.f32.gmra.mxu0 %vm375_vm0, %v258_v37  ;;  %2670 = vmatmul.msk.f32.gmra.mxu1 %vm375_vm0, %v273_v38 }
  0x57   : > { %2685 = vmatmul.msk.f32.gmra.mxu2 %vm375_vm0, %v288_v39  ;;  %2700 = vmatmul.msk.f32.gmra.mxu3 %vm375_vm0, %v303_v40 }
  0x5e   : > { %2656 = vmatmul.msk.f32.gmra.mxu0 %vm375_vm0, %v259_v41  ;;  %2671 = vmatmul.msk.f32.gmra.mxu1 %vm375_vm0, %v274_v42 }
  0x5f   : > { %2686 = vmatmul.msk.f32.gmra.mxu2 %vm375_vm0, %v289_v43  ;;  %2701 = vmatmul.msk.f32.gmra.mxu3 %vm375_vm0, %v304_v44 }
  0x66   : > { %2657 = vmatmul.msk.f32.gmra.mxu0 %vm375_vm0, %v260_v45  ;;  %2672 = vmatmul.msk.f32.gmra.mxu1 %vm375_vm0, %v275_v46 }
  0x67   : > { %2687 = vmatmul.msk.f32.gmra.mxu2 %vm375_vm0, %v290_v47  ;;  %2702 = vmatmul.msk.f32.gmra.mxu3 %vm375_vm0, %v305_v48 }
  0x6e   : > { %2658 = vmatmul.msk.f32.gmra.mxu0 %vm375_vm0, %v261_v49  ;;  %2673 = vmatmul.msk.f32.gmra.mxu1 %vm375_vm0, %v276_v50 }
  0x6f   : > { %2688 = vmatmul.msk.f32.gmra.mxu2 %vm375_vm0, %v291_v51  ;;  %2703 = vmatmul.msk.f32.gmra.mxu3 %vm375_vm0, %v306_v54  ;;  %v347_v54 = vld [vmem:[%s3224_s8 + $0x100] sm:$0xff] }
  0x76   : > { %2659 = vmatmul.msk.f32.gmra.mxu0 %vm375_vm0, %v262_v52  ;;  %2674 = vmatmul.msk.f32.gmra.mxu1 %vm375_vm0, %v277_v53 }
  0x77   : > { %2689 = vmatmul.msk.f32.gmra.mxu2 %vm375_vm0, %v292_v55  ;;  %2704 = vmatmul.msk.f32.gmra.mxu3 %vm375_vm0, %v307_v59 }
  0x7e   : > { %2660 = vmatmul.msk.f32.gmra.mxu0 %vm375_vm0, %v263_v56  ;;  %2675 = vmatmul.msk.f32.gmra.mxu1 %vm375_vm0, %v278_v57  ;;  %v362_v57 = vld [vmem:[%s3224_s8 + $0x178] sm:$0xff] }
  0x7f   : > { %2690 = vmatmul.msk.f32.gmra.mxu2 %vm375_vm0, %v293_v58  ;;  %2705 = vmatmul.msk.f32.gmra.mxu3 %vm375_vm0, %v308_v60 }
  0x86   : > { %2661 = vmatmul.msk.f32.gmra.mxu0 %vm375_vm0, %v264_v61  ;;  %2676 = vmatmul.msk.f32.gmra.mxu1 %vm375_vm0, %v279_v0  ;;  %v318_v61 = vld [vmem:[%s3224_s8 + $0x18] sm:$0xff] }
  0x87   : > { %2691 = vmatmul.msk.f32.gmra.mxu2 %vm375_vm0, %v294_v3  ;;  %2706 = vmatmul.msk.f32.gmra.mxu3 %vm375_vm0, %v309_v19 }
  0x93   : > { %v573_v1 = vpop.f32.mrf.mxu0  ;;  %v618_v2 = vpop.f32.mrf.mxu1 }
  0x94   : > { %v574_v4 = vadd.f32 %v573_v1, %v315_v62  ;;  %v619_v5 = vadd.f32 %v618_v2, %v330_v63  ;;  %v333_v62 = vld [vmem:[%s3224_s8 + $0x90] sm:$0xff] }
  0x96   : > { %v2707_v7 = vmul.f32 -1.442695, %v574_v4  ;;  %v2722_v8 = vmul.f32 -1.442695, %v619_v5 }
  0x98   : > { %2798 = vpow2.f32 %v2707_v7 }
  0x99   : > { %2800 = vpow2.f32 %v2722_v8 }
  0x9a   : > { %v663_v13 = vpop.f32.mrf.mxu2  ;;  %v708_v14 = vpop.f32.mrf.mxu3 }
  0x9b   : > { %v664_v15 = vadd.f32 %v663_v13, %v345_v9  ;;  %v709_v16 = vadd.f32 %v708_v14, %v360_v10  ;;  %v621_v17 = vpop.f32.mrf.mxu1  ;;  %v576_v18 = vpop.f32.mrf.mxu0 }
  0x9c   : > { %v622_v20 = vadd.f32 %v621_v17, %v331_v11  ;;  %v577_v21 = vadd.f32 %v576_v18, %v316_v12 }
  0x9d   : > { %v2737_v22 = vmul.f32 -1.442695, %v664_v15  ;;  %v2752_v23 = vmul.f32 -1.442695, %v709_v16 }
  0x9e   : > { %v2799_v24 = vpop.eup %2798  ;;  %v2723_v27 = vmul.f32 -1.442695, %v622_v20  ;;  %v2708_v29 = vmul.f32 -1.442695, %v577_v21 }
  0x9f   : > { %v2801_v25 = vpop.eup %2800  ;;  %v3238_v26 = vadd.f32 1.0, %v2799_v24  ;;  %2802 = vpow2.f32 %v2737_v22 }
  0xa0   : > { %v3240_v28 = vadd.f32 1.0, %v2801_v25  ;;  %2804 = vpow2.f32 %v2752_v23 }
  0xa1   : > { %2806 = vrcp.f32 %v3238_v26  ;;  %v1004_v41 = vand.u32 2147483648, %v3238_v26  ;;  %v1002_v45 = vand.u32 2147483647, %v3238_v26  ;;  %vm998_vm1 = vweird.f32 %v3238_v26 }
  0xa2   : > { %2808 = vrcp.f32 %v3240_v28  ;;  %v666_v33 = vpop.f32.mrf.mxu2  ;;  %v711_v34 = vpop.f32.mrf.mxu3  ;;  %v1229_v46 = vand.u32 2147483648, %v3240_v28  ;;  %v1227_v58 = vand.u32 2147483647, %v3240_v28  ;;  %vm1223_vm5 = vweird.f32 %v3240_v28 }
  0xa3   : > { %2810 = vpow2.f32 %v2723_v27  ;;  %v667_v36 = vadd.f32 %v666_v33, %v346_v30  ;;  %v712_v37 = vadd.f32 %v711_v34, %v361_v31  ;;  %v624_v38 = vpop.f32.mrf.mxu1  ;;  %v579_v39 = vpop.f32.mrf.mxu0  ;;  %v3264_v56 = vor.u32 1.1754944e-38, %v1004_v41  ;;  %v348_v31 = vld [vmem:[%s3224_s8 + $0x108] sm:$0xff] }
  0xa4   : > { %2812 = vpow2.f32 %v2708_v29  ;;  %v625_v40 = vadd.f32 %v624_v38, %v332_v32  ;;  %v580_v44 = vadd.f32 %v579_v39, %v317_v35  ;;  %vm3272_vm3 = vcmp.eq.f32.partialorder %v1002_v45, 8.507059e+37  ;;  %v334_v38 = vld [vmem:[%s3224_s8 + $0x98] sm:$0xff] }
  0xa5   : > { %v2803_v42 = vpop.eup %2802  ;;  %v2738_v43 = vmul.f32 -1.442695, %v667_v36  ;;  %v2753_v49 = vmul.f32 -1.442695, %v712_v37  ;;  %v3276_v0 = vor.u32 1.1754944e-38, %v1229_v46  ;;  %vm3312_vm7 = vcmp.eq.f32.partialorder %v1227_v58, 8.507059e+37 }
  0xa6   : > { %v2805_v47 = vpop.eup %2804  ;;  %v3251_v48 = vadd.f32 1.0, %v2803_v42  ;;  %v2724_v52 = vmul.f32 -1.442695, %v625_v40  ;;  %v2709_v60 = vmul.f32 -1.442695, %v580_v44  ;;  %v319_v37 = vld [vmem:[%s3224_s8 + $0x20] sm:$0xff] }
  0xa7   : > { %v3253_v50 = vpop.eup %2806  ;;  %v3255_v51 = vadd.f32 1.0, %v2805_v47  ;;  %2814 = vpow2.f32 %v2738_v43  ;;  %v363_v58 = vld [vmem:[%s3224_s8 + $0x180] sm:$0xff] }
  0xa8   : > { %v3258_v53 = vpop.eup %2808  ;;  %2816 = vrcp.f32 %v3251_v48  ;;  %v994_v55 = vmul.f32 %v3253_v50, %v3238_v26  ;;  %vm999_vm2 = vweird.f32 %v3253_v50  ;;  %v1452_v17 = vand.u32 2147483647, %v3251_v48 }
  0xa9   : > { %v2811_v59 = vpop.eup %2810  ;;  %2818 = vrcp.f32 %v3255_v51  ;;  %v3282_v6 = vmul.f32 %v3258_v53, %v3240_v28  ;;  %vm1224_vm4 = vweird.f32 %v3258_v53  ;;  %vm3306_vm6 = vmor %vm998_vm1, %vm999_vm2  ;;  %v1454_v34 = vand.u32 2147483648, %v3251_v48 }
  0xaa   : > { %v2813_v1 = vpop.eup %2812  ;;  %v3278_v2 = vadd.f32 1.0, %v2811_v59  ;;  %2820 = vpow2.f32 %v2753_v49  ;;  %v669_v3 = vpop.f32.mrf.mxu2  ;;  %v995_v4 = vsub.f32 1.0, %v994_v55  ;;  %vm1225_vm11 = vmor %vm1223_vm5, %vm1224_vm4 }
  0xab   : > { %v714_v5 = vpop.f32.mrf.mxu3  ;;  %v3284_v7 = vadd.f32 1.0, %v2813_v1  ;;  %2822 = vpow2.f32 %v2724_v52  ;;  %v670_v8 = vadd.f32 %v669_v3, %v347_v54  ;;  %v582_v9 = vpop.f32.mrf.mxu0  ;;  %v1220_v32 = vsub.f32 1.0, %v3282_v6 }
  0xac   : > { %v627_v10 = vpop.f32.mrf.mxu1  ;;  %v715_v11 = vadd.f32 %v714_v5, %v362_v57  ;;  %2824 = vrcp.f32 %v3278_v2  ;;  %v583_v12 = vadd.f32 %v582_v9, %v318_v61  ;;  %v996_v14 = vmul.f32 %v3253_v50, %v995_v4 }
  0xad   : > { %v628_v13 = vadd.f32 %v627_v10, %v333_v62  ;;  %v2815_v15 = vpop.eup %2814  ;;  %2826 = vrcp.f32 %v3284_v7  ;;  %v2739_v16 = vmul.f32 -1.442695, %v670_v8  ;;  %v1242_v24 = vand.u32 2147483647, %v3278_v2 }
  0xae   : > { %v3291_v18 = vpop.eup %2816  ;;  %v3293_v19 = vadd.f32 1.0, %v2815_v15  ;;  %2828 = vpow2.f32 %v2709_v60  ;;  %v2710_v20 = vmul.f32 -1.442695, %v583_v12  ;;  %v997_v23 = vadd.f32 %v3253_v50, %v996_v14  ;;  %v349_v14 = vld [vmem:[%s3224_s8 + $0x110] sm:$0xff] }
  0xaf   : > { %v2725_v21 = vmul.f32 -1.442695, %v628_v13  ;;  %v3296_v22 = vpop.eup %2818  ;;  %2830 = vpow2.f32 %v2739_v16  ;;  %v1244_v25 = vand.u32 2147483648, %v3278_v2  ;;  %v2754_v30 = vmul.f32 -1.442695, %v715_v11 }
  0xb0   : > { %v2821_v27 = vpop.eup %2820  ;;  %2832 = vrcp.f32 %v3293_v19  ;;  %v1001_v26 = vsel %vm3306_vm6, %v3253_v50, %v997_v23  ;;  %vm1238_vm8 = vweird.f32 %v3278_v2  ;;  %v1467_v39 = vand.u32 2147483647, %v3293_v19  ;;  %v320_v23 = vld [vmem:[%s3224_s8 + $0x28] sm:$0xff] }
  0xb1   : > { %v2823_v35 = vpop.eup %2822  ;;  %v3317_v36 = vadd.f32 1.0, %v2821_v27  ;;  %2834 = vpow2.f32 %v2710_v20  ;;  %v1006_v42 = vsel %vm3272_vm3, %v3264_v56, %v1001_v26  ;;  %v1245_v44 = vor.u32 1.1754944e-38, %v1244_v25 }
  0xb2   : > { %v3326_v40 = vpop.eup %2824  ;;  %v3328_v41 = vadd.f32 1.0, %v2823_v35  ;;  %2836 = vpow2.f32 %v2725_v21  ;;  %v672_v43 = vpop.f32.mrf.mxu2  ;;  %2015 = vperm.xlu0 %2795, %v1006_v42   ;;  %vm3339_vm10 = vcmp.eq.f32.partialorder %v1242_v24, 8.507059e+37  ;;  %v1221_v57 = vmul.f32 %v3258_v53, %v1220_v32 }
  0xb3   : > { %v3333_v45 = vpop.eup %2826  ;;  %2838 = vrcp.f32 %v3317_v36  ;;  %v585_v46 = vpop.f32.mrf.mxu0  ;;  %v673_v49 = vadd.f32 %v672_v43, %v348_v31  ;;  %v1234_v50 = vmul.f32 %v3326_v40, %v3278_v2  ;;  %vm1239_vm9 = vweird.f32 %v3326_v40 }
  0xb4   : > { %v630_v47 = vpop.f32.mrf.mxu1  ;;  %v2829_v54 = vpop.eup %2828  ;;  %2840 = vrcp.f32 %v3328_v41  ;;  %v586_v55 = vadd.f32 %v585_v46, %v319_v37  ;;  %v1222_v6 = vadd.f32 %v3258_v53, %v1221_v57  ;;  %vm1253_vm12 = vweird.f32 %v3328_v41  ;;  %vm1240_vm13 = vmor %vm1238_vm8, %vm1239_vm9 }
  0xb5   : > { %v631_v56 = vadd.f32 %v630_v47, %v334_v38  ;;  %v717_v59 = vpop.f32.mrf.mxu3  ;;  %v2831_v60 = vpop.eup %2830  ;;  %v3346_v61 = vadd.f32 1.0, %v2829_v54  ;;  %2842 = vpow2.f32 %v2754_v30  ;;  %v2740_v62 = vmul.f32 -1.442695, %v673_v49 }
  0xb6   : > { %v1235_v63 = vsub.f32 1.0, %v1234_v50  ;;  %v3348_v1 = vpop.eup %2832  ;;  %v3350_v3 = vadd.f32 1.0, %v2831_v60  ;;  %v2711_v4 = vmul.f32 -1.442695, %v586_v55  ;;  %v718_v10 = vadd.f32 %v717_v59, %v363_v58  ;;  %v321_v60 = vld [vmem:[%s3224_s8 + $0x30] sm:$0xff] }
  0xb7   : > { %v2726_v5 = vmul.f32 -1.442695, %v631_v56  ;;  %v2835_v8 = vpop.eup %2834  ;;  %2844 = vrcp.f32 %v3346_v61  ;;  %v1226_v13 = vsel %vm1225_vm11, %v3258_v53, %v1222_v6  ;;  %v1257_v15 = vand.u32 2147483647, %v3328_v41 }
  0xb8   : > { %v1236_v9 = vmul.f32 %v3326_v40, %v1235_v63  ;;  %v2837_v11 = vpop.eup %2836  ;;  %2846 = vrcp.f32 %v3350_v3  ;;  %v3361_v12 = vadd.f32 1.0, %v2835_v8  ;;  %v1231_v21 = vsel %vm3312_vm7, %v3276_v0, %v1226_v13  ;;  %v364_v8 = vld [vmem:[%s3224_s8 + $0x188] sm:$0xff] }
  0xb9   : > { %v3366_v16 = vpop.eup %2838  ;;  %v3368_v20 = vadd.f32 1.0, %v2837_v11  ;;  %2848 = vpow2.f32 %v2711_v4  ;;  %v2755_v25 = vmul.f32 -1.442695, %v718_v10  ;;  %vm3382_vm14 = vcmp.eq.f32.partialorder %v1257_v15, 8.507059e+37 }
  0xba   : > { %v1237_v28 = vadd.f32 %v3326_v40, %v1236_v9  ;;  %v3375_v24 = vpop.eup %2840  ;;  %2850 = vrcp.f32 %v3361_v12  ;;  %v675_v53 = vpop.f32.mrf.mxu2  ;;  %v1259_v29 = vand.u32 2147483648, %v3328_v41  ;;  %2090 = vperm.xlu0 %2795, %v1231_v21   ;;  %vm1463_vm15 = vweird.f32 %v3293_v19 }
  0xbb   : > { %v2843_v30 = vpop.eup %2842  ;;  %2852 = vrcp.f32 %v3368_v20  ;;  %v588_v31 = vpop.f32.mrf.mxu0  ;;  %v676_v32 = vadd.f32 %v675_v53, %v349_v14  ;;  %v1249_v2 = vmul.f32 %v3375_v24, %v3328_v41  ;;  %vm1254_vm0 = vweird.f32 %v3375_v24 }
  0xbc   : > { %v1241_v0 = vsel %vm1240_vm13, %v3326_v40, %v1237_v28  ;;  %v3391_v33 = vadd.f32 1.0, %v2843_v30  ;;  %2854 = vpow2.f32 %v2726_v5  ;;  %v589_v26 = vadd.f32 %v588_v31, %v320_v23  ;;  %vm3421_vm4 = vmor %vm1253_vm12, %vm1254_vm0  ;;  %v335_v5 = vld [vmem:[%s3224_s8 + $0xa0] sm:$0xff]  ;;  %v633_v6 = vpop.f32.mrf.mxu1 }
  0xbd   : > { %v1246_v35 = vsel %vm3339_vm10, %v1245_v44, %v1241_v0  ;;  %v3396_v37 = vpop.eup %2844  ;;  %2856 = vpow2.f32 %v2740_v62  ;;  %v2741_v38 = vmul.f32 -1.442695, %v676_v32  ;;  %v1250_v40 = vsub.f32 1.0, %v1249_v2  ;;  %v720_v9 = vpop.f32.mrf.mxu3 }
  0xbe   : > { %2095 = vperm.xlu1 %2796, %v1246_v35   ;;  %v3399_v42 = vpop.eup %2846  ;;  %2858 = vrcp.f32 %v3391_v33  ;;  %v2712_v43 = vmul.f32 -1.442695, %v589_v26  ;;  %v1260_v46 = vor.u32 1.1754944e-38, %v1259_v29  ;;  %v1459_v44 = vmul.f32 %v3348_v1, %v3293_v19 }
  0xbf   : > { %v2849_v47 = vpop.eup %2848  ;;  %2860 = vpow2.f32 %v2741_v38  ;;  %v1251_v49 = vmul.f32 %v3375_v24, %v1250_v40  ;;  %vm1464_vm1 = vweird.f32 %v3348_v1  ;;  %vm3408_vm2 = vcmp.eq.f32.partialorder %v1467_v39, 8.507059e+37 }
  0xc0   : > { %vm1448_vm3 = vweird.f32 %v3251_v48  ;;  %v3413_v52 = vpop.eup %2850  ;;  %v3415_v54 = vadd.f32 1.0, %v2849_v47  ;;  %2862 = vpow2.f32 %v2712_v43  ;;  %v1460_v39 = vsub.f32 1.0, %v1459_v44  ;;  %vm1465_vm7 = vmor %vm1463_vm15, %vm1464_vm1 }
  0xc1   : > { %v1469_v56 = vand.u32 2147483648, %v3293_v19  ;;  %v3426_v57 = vpop.eup %2852  ;;  %2864 = vpow2.f32 %v2755_v25  ;;  %v1252_v58 = vadd.f32 %v3375_v24, %v1251_v49  ;;  %v1444_v59 = vmul.f32 %v3291_v18, %v3251_v48 }
  0xc2   : > { %vm1449_vm5 = vweird.f32 %v3291_v18  ;;  %v2855_v41 = vpop.eup %2854  ;;  %2866 = vrcp.f32 %v3415_v54  ;;  %v1461_v62 = vmul.f32 %v3348_v1, %v1460_v39  ;;  %vm3437_vm6 = vcmp.eq.f32.partialorder %v1452_v17, 8.507059e+37 }
  0xc3   : > { %v1470_v63 = vor.u32 1.1754944e-38, %v1469_v56  ;;  %v2857_v10 = vpop.eup %2856  ;;  %v3443_v11 = vadd.f32 1.0, %v2855_v41  ;;  %v1256_v13 = vsel %vm3421_vm4, %v3375_v24, %v1252_v58  ;;  %v1445_v14 = vsub.f32 1.0, %v1444_v59  ;;  %v591_v28 = vpop.f32.mrf.mxu0  ;;  %vm1450_vm8 = vmor %vm1448_vm3, %vm1449_vm5 }
  0xc4   : > { %v1455_v15 = vor.u32 1.1754944e-38, %v1454_v34  ;;  %v3450_v17 = vpop.eup %2858  ;;  %v3452_v21 = vadd.f32 1.0, %v2857_v10  ;;  %v1261_v23 = vsel %vm3382_vm14, %v1260_v46, %v1256_v13  ;;  %v1462_v53 = vadd.f32 %v3348_v1, %v1461_v62 }
  0xc5   : > { %v592_v25 = vadd.f32 %v591_v28, %v321_v60  ;;  %v2861_v29 = vpop.eup %2860  ;;  %2868 = vrcp.f32 %v3443_v11  ;;  %2100 = vperm.xlu2 %2797, %v1261_v23   ;;  %v1446_v34 = vmul.f32 %v3291_v18, %v1445_v14  ;;  %v634_v24 = vadd.f32 %v633_v6, %v335_v5  ;;  %v636_v28 = vpop.f32.mrf.mxu1 }
  0xc6   : > { %v721_v30 = vadd.f32 %v720_v9, %v364_v8  ;;  %v2863_v0 = vpop.eup %2862  ;;  %2870 = vrcp.f32 %v3452_v21  ;;  %v3464_v27 = vadd.f32 1.0, %v2861_v29  ;;  %v1466_v31 = vsel %vm1465_vm7, %v3348_v1, %v1462_v53 }
  0xc7   : > { %v2713_v32 = vmul.f32 -1.442695, %v592_v25  ;;  %v2865_v2 = vpop.eup %2864  ;;  %v3467_v35 = vadd.f32 1.0, %v2863_v0  ;;  %v1471_v26 = vsel %vm3408_vm2, %v1470_v63, %v1466_v31  ;;  %v1447_v19 = vadd.f32 %v3291_v18, %v1446_v34 }
  0xc8   : > { %v2727_v38 = vmul.f32 -1.442695, %v634_v24  ;;  %v3472_v40 = vpop.eup %2866  ;;  %2872 = vrcp.f32 %v3464_v27  ;;  %v3475_v43 = vadd.f32 1.0, %v2865_v2  ;;  %2170 = vperm.xlu1 %2796, %v1471_v26   ;;  %v2756_v1 = vmul.f32 -1.442695, %v721_v30  ;;  %v350_v24 = vld [vmem:[%s3224_s8 + $0x118] sm:$0xff]  ;;  %v678_v30 = vpop.f32.mrf.mxu2 }
  0xc9   : > { %v1474_v46 = vmul.f32 %v3399_v42, %v3350_v3  ;;  %2874 = vrcp.f32 %v3467_v35  ;;  %v1451_v44 = vsel %vm1450_vm8, %v3291_v18, %v1447_v19  ;;  %vm1478_vm9 = vweird.f32 %v3350_v3 }
  0xca   : > { %vm1479_vm10 = vweird.f32 %v3399_v42  ;;  %2876 = vrcp.f32 %v3475_v43  ;;  %v1456_v47 = vsel %vm3437_vm6, %v1455_v15, %v1451_v44  ;;  %v1482_v48 = vand.u32 2147483647, %v3350_v3  ;;  %v336_v15 = vld [vmem:[%s3224_s8 + $0xa8] sm:$0xff] }
  0xcb   : > { %v1475_v49 = vsub.f32 1.0, %v1474_v46  ;;  %v3491_v50 = vpop.eup %2868  ;;  %2165 = vperm.xlu0 %2795, %v1456_v47   ;;  %2878 = vpow2.f32 %v2713_v32  ;;  %v1484_v55 = vand.u32 2147483648, %v3350_v3  ;;  %v1684_v18 = vmul.f32 %v3366_v16, %v3317_v36  ;;  %vm3509_vm14 = vmor %vm1478_vm9, %vm1479_vm10  ;;  %v322_v3 = vld [vmem:[%s3224_s8 + $0x38] sm:$0xff]  ;;  %v594_v8 = vpop.f32.mrf.mxu0 }
  0xcc   : > { %vm1688_vm11 = vweird.f32 %v3317_v36  ;;  %v3497_v39 = vpop.eup %2870  ;;  %2880 = vpow2.f32 %v2727_v38  ;;  %vm3500_vm12 = vcmp.eq.f32.partialorder %v1482_v48, 8.507059e+37  ;;  %vm1689_vm13 = vweird.f32 %v3366_v16 }
  0xcd   : > { %v1476_v56 = vmul.f32 %v3399_v42, %v1475_v49  ;;  %2882 = vpow2.f32 %v2756_v1  ;;  %v1485_v60 = vor.u32 1.1754944e-38, %v1484_v55  ;;  %v1685_v41 = vsub.f32 1.0, %v1684_v18  ;;  %vm1690_vm3 = vmor %vm1688_vm11, %vm1689_vm13 }
  0xce   : > { %v1692_v62 = vand.u32 2147483647, %v3317_v36  ;;  %v3514_v63 = vpop.eup %2872  ;;  %v1694_v5 = vand.u32 2147483648, %v3317_v36  ;;  %v1669_v6 = vmul.f32 %v3296_v22, %v3255_v51  ;;  %vm1673_vm15 = vweird.f32 %v3255_v51 }
  0xcf   : > { %v1477_v4 = vadd.f32 %v3399_v42, %v1476_v56  ;;  %v3522_v9 = vpop.eup %2874  ;;  %v1686_v10 = vmul.f32 %v3366_v16, %v1685_v41  ;;  %vm1674_vm1 = vweird.f32 %v3296_v22  ;;  %v1677_v14 = vand.u32 2147483647, %v3255_v51 }
  0xd0   : > { %vm3525_vm0 = vcmp.eq.f32.partialorder %v1692_v62, 8.507059e+37  ;;  %v3532_v23 = vpop.eup %2876  ;;  %v1695_v25 = vor.u32 1.1754944e-38, %v1694_v5  ;;  %v1670_v29 = vsub.f32 1.0, %v1669_v6  ;;  %v1679_v34 = vand.u32 2147483648, %v3255_v51  ;;  %vm1675_vm4 = vmor %vm1673_vm15, %vm1674_vm1 }
  0xd1   : > { %v1481_v53 = vsel %vm3509_vm14, %v3399_v42, %v1477_v4  ;;  %v2879_v0 = vpop.eup %2878  ;;  %v1687_v32 = vadd.f32 %v3366_v16, %v1686_v10  ;;  %vm3542_vm2 = vcmp.eq.f32.partialorder %v1677_v14, 8.507059e+37  ;;  %v595_v26 = vadd.f32 %v594_v8, %v322_v3 }
  0xd2   : > { %v1486_v31 = vsel %vm3500_vm12, %v1485_v60, %v1481_v53  ;;  %v2881_v19 = vpop.eup %2880  ;;  %v3546_v38 = vadd.f32 1.0, %v2879_v0  ;;  %v1671_v42 = vmul.f32 %v3296_v22, %v1670_v29  ;;  %v1680_v1 = vor.u32 1.1754944e-38, %v1679_v34  ;;  %v639_v53 = vpop.f32.mrf.mxu1 }
  0xd3   : > { %2175 = vperm.xlu2 %2797, %v1486_v31   ;;  %v637_v46 = vadd.f32 %v636_v28, %v336_v15  ;;  %v2883_v44 = vpop.eup %2882  ;;  %v3553_v47 = vadd.f32 1.0, %v2881_v19  ;;  %v1691_v49 = vsel %vm1690_vm3, %v3366_v16, %v1687_v32  ;;  %v2714_v48 = vmul.f32 -1.442695, %v595_v26  ;;  %v337_v28 = vld [vmem:[%s3224_s8 + $0xb0] sm:$0xff] }
  0xd4   : > { %v679_v55 = vadd.f32 %v678_v30, %v350_v24  ;;  %2884 = vrcp.f32 %v3546_v38  ;;  %v3557_v18 = vadd.f32 1.0, %v2883_v44  ;;  %v1696_v56 = vsel %vm3525_vm0, %v1695_v25, %v1691_v49  ;;  %v681_v44 = vpop.f32.mrf.mxu2 }
  0xd5   : > { %v1672_v36 = vadd.f32 %v3296_v22, %v1671_v42  ;;  %2886 = vrcp.f32 %v3553_v47  ;;  %2245 = vperm.xlu1 %2796, %v1696_v56   ;;  %v2728_v16 = vmul.f32 -1.442695, %v637_v46  ;;  %v1699_v59 = vmul.f32 %v3450_v17, %v3391_v33  ;;  %v351_v46 = vld [vmem:[%s3224_s8 + $0x120] sm:$0xff]  ;;  %v365_v56 = vld [vmem:[%s3224_s8 + $0x190] sm:$0xff] }
  0xd6   : > { %v2742_v58 = vmul.f32 -1.442695, %v679_v55  ;;  %2888 = vrcp.f32 %v3557_v18  ;;  %vm1703_vm5 = vweird.f32 %v3391_v33  ;;  %vm1704_vm6 = vweird.f32 %v3450_v17 }
  0xd7   : > { %v1676_v60 = vsel %vm1675_vm4, %v3296_v22, %v1672_v36  ;;  %2890 = vpow2.f32 %v2714_v48  ;;  %v1700_v62 = vsub.f32 1.0, %v1699_v59  ;;  %v1707_v51 = vand.u32 2147483647, %v3391_v33  ;;  %vm3592_vm10 = vmor %vm1703_vm5, %vm1704_vm6  ;;  %v723_v36 = vpop.f32.mrf.mxu3 }
  0xd8   : > { %v1681_v41 = vsel %vm3542_vm2, %v1680_v1, %v1676_v60  ;;  %2892 = vpow2.f32 %v2728_v16  ;;  %v1709_v4 = vand.u32 2147483648, %v3391_v33  ;;  %v1024_v5 = vmul.f32 %v3396_v37, %v3346_v61 }
  0xd9   : > { %2240 = vperm.xlu0 %2795, %v1681_v41   ;;  %vm1028_vm7 = vweird.f32 %v3346_v61  ;;  %2894 = vpow2.f32 %v2742_v58  ;;  %v1701_v22 = vmul.f32 %v3450_v17, %v1700_v62  ;;  %vm3581_vm8 = vcmp.eq.f32.partialorder %v1707_v51, 8.507059e+37 }
  0xda   : > { %vm1029_vm9 = vweird.f32 %v3396_v37  ;;  %v3586_v3 = vpop.eup %2884  ;;  %v1710_v10 = vor.u32 1.1754944e-38, %v1709_v4  ;;  %v1025_v13 = vsub.f32 1.0, %v1024_v5  ;;  %v1032_v14 = vand.u32 2147483647, %v3346_v61 }
  0xdb   : > { %v1034_v15 = vand.u32 2147483648, %v3346_v61  ;;  %v3599_v25 = vpop.eup %2886  ;;  %v1702_v29 = vadd.f32 %v3450_v17, %v1701_v22  ;;  %v1009_v33 = vmul.f32 %v3333_v45, %v3284_v7  ;;  %vm1013_vm11 = vweird.f32 %v3284_v7  ;;  %vm3621_vm14 = vmor %vm1028_vm7, %vm1029_vm9 }
  0xdc   : > { %vm1014_vm12 = vweird.f32 %v3333_v45  ;;  %v3606_v34 = vpop.eup %2888  ;;  %v1026_v24 = vmul.f32 %v3396_v37, %v1025_v13  ;;  %vm3609_vm13 = vcmp.eq.f32.partialorder %v1032_v14, 8.507059e+37  ;;  %v1017_v31 = vand.u32 2147483647, %v3284_v7 }
  0xdd   : > { %v1035_v0 = vor.u32 1.1754944e-38, %v1034_v15  ;;  %v2891_v32 = vpop.eup %2890  ;;  %v1706_v2 = vsel %vm3592_vm10, %v3450_v17, %v1702_v29  ;;  %v1010_v19 = vsub.f32 1.0, %v1009_v33  ;;  %v1019_v42 = vand.u32 2147483648, %v3284_v7  ;;  %vm3650_vm0 = vmor %vm1013_vm11, %vm1014_vm12 }
  0xde   : > { %v640_v1 = vadd.f32 %v639_v53, %v337_v28  ;;  %v2893_v49 = vpop.eup %2892  ;;  %v3627_v48 = vadd.f32 1.0, %v2891_v32  ;;  %v1711_v17 = vsel %vm3581_vm8, %v1710_v10, %v1706_v2  ;;  %v1027_v55 = vadd.f32 %v3396_v37, %v1026_v24 }
  0xdf   : > { %vm3632_vm15 = vcmp.eq.f32.partialorder %v1017_v31, 8.507059e+37  ;;  %v2895_v16 = vpop.eup %2894  ;;  %v3637_v58 = vadd.f32 1.0, %v2893_v49  ;;  %2250 = vperm.xlu2 %2797, %v1711_v17   ;;  %v1011_v59 = vmul.f32 %v3333_v45, %v1010_v19  ;;  %v1020_v60 = vor.u32 1.1754944e-38, %v1019_v42  ;;  %v323_v42 = vld [vmem:[%s3224_s8 + $0x40] sm:$0xff] }
  0xe0   : > { %v2729_v41 = vmul.f32 -1.442695, %v640_v1  ;;  %2896 = vrcp.f32 %v3627_v48  ;;  %v3641_v62 = vadd.f32 1.0, %v2895_v16  ;;  %v1031_v51 = vsel %vm3621_vm14, %v3396_v37, %v1027_v55  ;;  %v597_v1 = vpop.f32.mrf.mxu0 }
  0xe1   : > { %v682_v5 = vadd.f32 %v681_v44, %v351_v46  ;;  %2898 = vrcp.f32 %v3637_v58  ;;  %v1036_v22 = vsel %vm3609_vm13, %v1035_v0, %v1031_v51  ;;  %v1012_v6 = vadd.f32 %v3333_v45, %v1011_v59 }
  0xe2   : > { %v724_v8 = vadd.f32 %v723_v36, %v365_v56  ;;  %2900 = vrcp.f32 %v3641_v62  ;;  %2025 = vperm.xlu1 %2796, %v1036_v22   ;;  %v1054_v7 = vmul.f32 %v3472_v40, %v3415_v54  ;;  %vm1058_vm1 = vweird.f32 %v3415_v54 }
  0xe3   : > { %v2743_v37 = vmul.f32 -1.442695, %v682_v5  ;;  %v1016_v10 = vsel %vm3650_vm0, %v3333_v45, %v1012_v6  ;;  %2902 = vpow2.f32 %v2729_v41  ;;  %vm1059_vm2 = vweird.f32 %v3472_v40 }
  0xe4   : > { %v2757_v13 = vmul.f32 -1.442695, %v724_v8  ;;  %v1021_v14 = vsel %vm3632_vm15, %v1020_v60, %v1016_v10  ;;  %v1055_v15 = vsub.f32 1.0, %v1054_v7  ;;  %v1062_v28 = vand.u32 2147483647, %v3415_v54  ;;  %vm3688_vm6 = vmor %vm1058_vm1, %vm1059_vm2  ;;  %v352_v8 = vld [vmem:[%s3224_s8 + $0x128] sm:$0xff]  ;;  %v726_v7 = vpop.f32.mrf.mxu3 }
  0xe5   : > { %2904 = vpow2.f32 %v2743_v37  ;;  %2020 = vperm.xlu0 %2795, %v1021_v14   ;;  %v1064_v53 = vand.u32 2147483648, %v3415_v54  ;;  %v1039_v29 = vmul.f32 %v3413_v52, %v3361_v12  ;;  %vm1043_vm3 = vweird.f32 %v3361_v12  ;;  %v684_v37 = vpop.f32.mrf.mxu2 }
  0xe6   : > { %2906 = vpow2.f32 %v2757_v13  ;;  %v3673_v45 = vpop.eup %2896  ;;  %v1056_v33 = vmul.f32 %v3472_v40, %v1055_v15  ;;  %vm3676_vm4 = vcmp.eq.f32.partialorder %v1062_v28, 8.507059e+37  ;;  %vm1044_vm5 = vweird.f32 %v3413_v52 }
  0xe7   : > { %v1047_v30 = vand.u32 2147483647, %v3361_v12  ;;  %v3682_v0 = vpop.eup %2898  ;;  %v1065_v32 = vor.u32 1.1754944e-38, %v1064_v53  ;;  %v1040_v2 = vsub.f32 1.0, %v1039_v29  ;;  %v1049_v26 = vand.u32 2147483648, %v3361_v12  ;;  %vm3716_vm10 = vmor %vm1043_vm3, %vm1044_vm5  ;;  %v366_v12 = vld [vmem:[%s3224_s8 + $0x198] sm:$0xff] }
  0xe8   : > { %v1264_v19 = vmul.f32 %v3426_v57, %v3368_v20  ;;  %v3696_v46 = vpop.eup %2900  ;;  %v1057_v44 = vadd.f32 %v3472_v40, %v1056_v33  ;;  %vm1268_vm8 = vweird.f32 %v3368_v20  ;;  %vm1269_vm9 = vweird.f32 %v3426_v57  ;;  %v600_v60 = vpop.f32.mrf.mxu0 }
  0xe9   : > { %vm3699_vm7 = vcmp.eq.f32.partialorder %v1047_v30, 8.507059e+37  ;;  %v2903_v54 = vpop.eup %2902  ;;  %v1041_v17 = vmul.f32 %v3413_v52, %v1040_v2  ;;  %v1050_v55 = vor.u32 1.1754944e-38, %v1049_v26  ;;  %v1272_v56 = vand.u32 2147483647, %v3368_v20  ;;  %vm3736_vm11 = vmor %vm1268_vm8, %vm1269_vm9 }
  0xea   : > { %v1265_v61 = vsub.f32 1.0, %v1264_v19  ;;  %v3707_v16 = vadd.f32 1.0, %v2903_v54  ;;  %v1061_v59 = vsel %vm3688_vm6, %v3472_v40, %v1057_v44  ;;  %v1274_v41 = vand.u32 2147483648, %v3368_v20 }
  0xeb   : > { %v2905_v36 = vpop.eup %2904  ;;  %v598_v51 = vadd.f32 %v597_v1, %v323_v42  ;;  %v1066_v22 = vsel %vm3676_vm4, %v1065_v32, %v1061_v59  ;;  %v1042_v6 = vadd.f32 %v3413_v52, %v1041_v17  ;;  %vm1273_vm12 = vcmp.eq.f32.partialorder %v1272_v56, 8.507059e+37  ;;  %v324_v59 = vld [vmem:[%s3224_s8 + $0x48] sm:$0xff] }
  0xec   : > { %v2907_v4 = vpop.eup %2906  ;;  %v3721_v5 = vadd.f32 1.0, %v2905_v36  ;;  %v1266_v40 = vmul.f32 %v3426_v57, %v1265_v61  ;;  %2908 = vrcp.f32 %v3707_v16  ;;  %2035 = vperm.xlu2 %2797, %v1066_v22   ;;  %v1275_v14 = vor.u32 1.1754944e-38, %v1274_v41 }
  0xed   : > { %v3730_v10 = vadd.f32 1.0, %v2907_v4  ;;  %v1046_v15 = vsel %vm3716_vm10, %v3413_v52, %v1042_v6  ;;  %v2715_v53 = vmul.f32 -1.442695, %v598_v51  ;;  %v685_v29 = vadd.f32 %v684_v37, %v352_v8  ;;  %v338_v8 = vld [vmem:[%s3224_s8 + $0xb8] sm:$0xff]  ;;  %v642_v37 = vpop.f32.mrf.mxu1 }
  0xee   : > { %2910 = vrcp.f32 %v3721_v5  ;;  %v1267_v28 = vadd.f32 %v3426_v57, %v1266_v40  ;;  %v1051_v20 = vsel %vm3699_vm7, %v1050_v55, %v1046_v15  ;;  %v727_v33 = vadd.f32 %v726_v7, %v366_v12 }
  0xef   : > { %2912 = vrcp.f32 %v3730_v10  ;;  %2030 = vperm.xlu1 %2796, %v1051_v20   ;;  %v1069_v30 = vmul.f32 %v3522_v9, %v3467_v35  ;;  %vm1073_vm13 = vweird.f32 %v3467_v35  ;;  %v2744_v31 = vmul.f32 -1.442695, %v685_v29 }
  0xf0   : > { %v1271_v24 = vsel %vm3736_vm11, %v3426_v57, %v1267_v28  ;;  %2914 = vpow2.f32 %v2715_v53  ;;  %v2758_v32 = vmul.f32 -1.442695, %v727_v33  ;;  %vm1074_vm14 = vweird.f32 %v3522_v9  ;;  %v367_v28 = vld [vmem:[%s3224_s8 + $0x1a0] sm:$0xff]  ;;  %v729_v53 = vpop.f32.mrf.mxu3 }
  0xf1   : > { %v1276_v52 = vsel %vm1273_vm12, %v1275_v14, %v1271_v24  ;;  %v1070_v2 = vsub.f32 1.0, %v1069_v30  ;;  %v1077_v26 = vand.u32 2147483647, %v3467_v35  ;;  %v1079_v19 = vand.u32 2147483648, %v3467_v35  ;;  %vm3773_vm1 = vmor %vm1073_vm13, %vm1074_vm14 }
  0xf2   : > { %2105 = vperm.xlu0 %2795, %v1276_v52   ;;  %v1279_v57 = vmul.f32 %v3491_v50, %v3443_v11  ;;  %v3759_v42 = vpop.eup %2908  ;;  %2916 = vpow2.f32 %v2744_v31  ;;  %vm1283_vm15 = vweird.f32 %v3443_v11  ;;  %vm1284_vm0 = vweird.f32 %v3491_v50 }
  0xf3   : > { %2918 = vpow2.f32 %v2758_v32  ;;  %v1071_v44 = vmul.f32 %v3522_v9, %v1070_v2  ;;  %v1287_v49 = vand.u32 2147483647, %v3443_v11  ;;  %v1080_v55 = vor.u32 1.1754944e-38, %v1079_v19  ;;  %vm3800_vm5 = vmor %vm1283_vm15, %vm1284_vm0 }
  0xf4   : > { %v3762_v1 = vpop.eup %2910  ;;  %v1280_v61 = vsub.f32 1.0, %v1279_v57  ;;  %v1289_v56 = vand.u32 2147483648, %v3443_v11  ;;  %v1489_v36 = vmul.f32 %v3497_v39, %v3452_v21  ;;  %vm3782_vm2 = vcmp.eq.f32.partialorder %v1077_v26, 8.507059e+37 }
  0xf5   : > { %v3767_v54 = vpop.eup %2912  ;;  %v1072_v51 = vadd.f32 %v3522_v9, %v1071_v44  ;;  %vm1493_vm3 = vweird.f32 %v3452_v21  ;;  %vm1494_vm4 = vweird.f32 %v3497_v39  ;;  %v1497_v40 = vand.u32 2147483647, %v3452_v21 }
  0xf6   : > { %v2915_v41 = vpop.eup %2914  ;;  %v1281_v22 = vmul.f32 %v3491_v50, %v1280_v61  ;;  %v1490_v6 = vsub.f32 1.0, %v1489_v36  ;;  %v1290_v13 = vor.u32 1.1754944e-38, %v1289_v56  ;;  %v1499_v14 = vand.u32 2147483648, %v3452_v21  ;;  %vm3816_vm7 = vmor %vm1493_vm3, %vm1494_vm4 }
  0xf7   : > { %v3788_v4 = vadd.f32 1.0, %v2915_v41  ;;  %v1076_v12 = vsel %vm3773_vm1, %v3522_v9, %v1072_v51  ;;  %v601_v15 = vadd.f32 %v600_v60, %v324_v59  ;;  %vm1288_vm6 = vcmp.eq.f32.partialorder %v1287_v49, 8.507059e+37 }
  0xf8   : > { %v2917_v20 = vpop.eup %2916  ;;  %v1081_v29 = vsel %vm3782_vm2, %v1080_v55, %v1076_v12  ;;  %v1282_v9 = vadd.f32 %v3491_v50, %v1281_v22  ;;  %v1491_v33 = vmul.f32 %v3497_v39, %v1490_v6  ;;  %v1500_v52 = vor.u32 1.1754944e-38, %v1499_v14  ;;  %v603_v14 = vpop.f32.mrf.mxu0 }
  0xf9   : > { %v2919_v11 = vpop.eup %2918  ;;  %v3810_v24 = vadd.f32 1.0, %v2917_v20  ;;  %2040 = vperm.xlu2 %2797, %v1081_v29   ;;  %v2716_v31 = vmul.f32 -1.442695, %v601_v15  ;;  %v643_v32 = vadd.f32 %v642_v37, %v338_v8  ;;  %vm1498_vm8 = vcmp.eq.f32.partialorder %v1497_v40, 8.507059e+37 }
  0xfa   : > { %v1286_v2 = vsel %vm3800_vm5, %v3491_v50, %v1282_v9  ;;  %v1492_v26 = vadd.f32 %v3497_v39, %v1491_v33  ;;  %v730_v19 = vadd.f32 %v729_v53, %v367_v28  ;;  %2920 = vrcp.f32 %v3788_v4  ;;  %v339_v33 = vld [vmem:[%s3224_s8 + $0xc0] sm:$0xff] }
  0xfb   : > { %v1291_v57 = vsel %vm1288_vm6, %v1290_v13, %v1286_v2  ;;  %v2730_v44 = vmul.f32 -1.442695, %v643_v32  ;;  %v1294_v21 = vmul.f32 %v3599_v25, %v3553_v47  ;;  %2922 = vrcp.f32 %v3810_v24  ;;  %v325_v13 = vld [vmem:[%s3224_s8 + $0x50] sm:$0xff] }
  0xfc   : > { %2110 = vperm.xlu1 %2796, %v1291_v57   ;;  %v1496_v49 = vsel %vm3816_vm7, %v3497_v39, %v1492_v26  ;;  %v2759_v17 = vmul.f32 -1.442695, %v730_v19  ;;  %vm1298_vm9 = vweird.f32 %v3553_v47  ;;  %2924 = vpow2.f32 %v2716_v31  ;;  %v353_v19 = vld [vmem:[%s3224_s8 + $0x130] sm:$0xff]  ;;  %v687_v57 = vpop.f32.mrf.mxu2 }
  0xfd   : > { %v1501_v50 = vsel %vm1498_vm8, %v1500_v52, %v1496_v49  ;;  %v1295_v55 = vsub.f32 1.0, %v1294_v21  ;;  %vm1299_vm10 = vweird.f32 %v3599_v25  ;;  %2926 = vpow2.f32 %v2730_v44 }
  0xfe   : > { %2180 = vperm.xlu0 %2795, %v1501_v50   ;;  %v1302_v61 = vand.u32 2147483647, %v3553_v47  ;;  %v1304_v56 = vand.u32 2147483648, %v3553_v47  ;;  %v1504_v36 = vmul.f32 %v3514_v63, %v3464_v27  ;;  %v3837_v59 = vadd.f32 1.0, %v2919_v11  ;;  %vm3841_vm12 = vmor %vm1298_vm9, %vm1299_vm10  ;;  %v645_v11 = vpop.f32.mrf.mxu1 }
  0xff   : > { %2928 = vpow2.f32 %v2759_v17  ;;  %v1296_v39 = vmul.f32 %v3599_v25, %v1295_v55  ;;  %vm1508_vm11 = vweird.f32 %v3464_v27  ;;  %vm1509_vm13 = vweird.f32 %v3514_v63 }
 0x100   : > { %v1305_v41 = vor.u32 1.1754944e-38, %v1304_v56  ;;  %v1505_v51 = vsub.f32 1.0, %v1504_v36  ;;  %v1512_v47 = vand.u32 2147483647, %v3464_v27  ;;  %v3847_v35 = vpop.eup %2920  ;;  %vm3850_vm14 = vcmp.eq.f32.partialorder %v1302_v61, 8.507059e+37  ;;  %vm3871_vm1 = vmor %vm1508_vm11, %vm1509_vm13 }
 0x101   : > { %v1297_v22 = vadd.f32 %v3599_v25, %v1296_v39  ;;  %v1514_v40 = vand.u32 2147483648, %v3464_v27  ;;  %v1714_v8 = vmul.f32 %v3532_v23, %v3475_v43  ;;  %v3857_v37 = vpop.eup %2922  ;;  %vm1718_vm15 = vweird.f32 %v3475_v43 }
 0x102   : > { %v1506_v12 = vmul.f32 %v3514_v63, %v1505_v51  ;;  %vm1719_vm0 = vweird.f32 %v3532_v23  ;;  %v1722_v7 = vand.u32 2147483647, %v3475_v43  ;;  %v2925_v15 = vpop.eup %2924  ;;  %v1724_v9 = vand.u32 2147483648, %v3475_v43 }
 0x103   : > { %v1301_v28 = vsel %vm3841_vm12, %v3599_v25, %v1297_v22  ;;  %v1515_v20 = vor.u32 1.1754944e-38, %v1514_v40  ;;  %v1715_v29 = vsub.f32 1.0, %v1714_v8  ;;  %v2927_v30 = vpop.eup %2926  ;;  %v3877_v52 = vadd.f32 1.0, %v2925_v15  ;;  %vm3898_vm4 = vmor %vm1718_vm15, %vm1719_vm0 }
 0x104   : > { %v1306_v25 = vsel %vm3850_vm14, %v1305_v41, %v1301_v28  ;;  %v1507_v31 = vadd.f32 %v3514_v63, %v1506_v12  ;;  %vm1513_vm2 = vcmp.eq.f32.partialorder %v1512_v47, 8.507059e+37  ;;  %2930 = vrcp.f32 %v3837_v59 }
 0x105   : > { %v2929_v27 = vpop.eup %2928  ;;  %2115 = vperm.xlu2 %2797, %v1306_v25   ;;  %v1716_v32 = vmul.f32 %v3532_v23, %v1715_v29  ;;  %vm3884_vm3 = vcmp.eq.f32.partialorder %v1722_v7, 8.507059e+37  ;;  %v604_v26 = vadd.f32 %v603_v14, %v325_v13  ;;  %v3889_v44 = vadd.f32 1.0, %v2927_v30  ;;  %v340_v30 = vld [vmem:[%s3224_s8 + $0xc8] sm:$0xff] }
 0x106   : > { %v1511_v21 = vsel %vm3871_vm1, %v3514_v63, %v1507_v31  ;;  %v1725_v17 = vor.u32 1.1754944e-38, %v1724_v9  ;;  %v646_v50 = vadd.f32 %v645_v11, %v339_v33  ;;  %2932 = vrcp.f32 %v3877_v52  ;;  %v648_v25 = vpop.f32.mrf.mxu1 }
 0x107   : > { %v1516_v55 = vsel %vm1513_vm2, %v1515_v20, %v1511_v21  ;;  %v1717_v61 = vadd.f32 %v3532_v23, %v1716_v32  ;;  %v2717_v56 = vmul.f32 -1.442695, %v604_v26  ;;  %v3904_v36 = vadd.f32 1.0, %v2929_v27  ;;  %v690_v21 = vpop.f32.mrf.mxu2 }
 0x108   : > { %2185 = vperm.xlu1 %2796, %v1516_v55   ;;  %v2731_v63 = vmul.f32 -1.442695, %v646_v50  ;;  %v688_v39 = vadd.f32 %v687_v57, %v353_v19  ;;  %v1519_v43 = vmul.f32 %v3696_v46, %v3641_v62  ;;  %vm1523_vm5 = vweird.f32 %v3641_v62  ;;  %v354_v57 = vld [vmem:[%s3224_s8 + $0x138] sm:$0xff]  ;;  %v732_v55 = vpop.f32.mrf.mxu3 }
 0x109   : > { %v1721_v60 = vsel %vm3898_vm4, %v3532_v23, %v1717_v61  ;;  %2934 = vpow2.f32 %v2717_v56  ;;  %vm1524_vm6 = vweird.f32 %v3696_v46  ;;  %v1527_v6 = vand.u32 2147483647, %v3641_v62 }
 0x10a   : > { %v1726_v41 = vsel %vm3884_vm3, %v1725_v17, %v1721_v60  ;;  %2936 = vpow2.f32 %v2731_v63  ;;  %v2745_v51 = vmul.f32 -1.442695, %v688_v39  ;;  %v1520_v47 = vsub.f32 1.0, %v1519_v43  ;;  %v3915_v22 = vpop.eup %2930  ;;  %vm3931_vm9 = vmor %vm1523_vm5, %vm1524_vm6 }
 0x10b   : > { %2938 = vrcp.f32 %v3889_v44  ;;  %2255 = vperm.xlu0 %2795, %v1726_v41   ;;  %v1529_v23 = vand.u32 2147483648, %v3641_v62  ;;  %v1729_v40 = vmul.f32 %v3606_v34, %v3557_v18  ;;  %vm1733_vm7 = vweird.f32 %v3557_v18 }
 0x10c   : > { %2940 = vpow2.f32 %v2745_v51  ;;  %v1521_v8 = vmul.f32 %v3696_v46, %v1520_v47  ;;  %vm1734_vm8 = vweird.f32 %v3606_v34  ;;  %v3925_v12 = vpop.eup %2932  ;;  %v1737_v15 = vand.u32 2147483647, %v3557_v18 }
 0x10d   : > { %v1530_v13 = vor.u32 1.1754944e-38, %v1529_v23  ;;  %v1730_v14 = vsub.f32 1.0, %v1729_v40  ;;  %v1739_v28 = vand.u32 2147483648, %v3557_v18  ;;  %vm3938_vm10 = vcmp.eq.f32.partialorder %v1527_v6, 8.507059e+37  ;;  %vm3958_vm13 = vmor %vm1733_vm7, %vm1734_vm8  ;;  %v368_v18 = vld [vmem:[%s3224_s8 + $0x1a8] sm:$0xff] }
 0x10e   : > { %v1522_v53 = vadd.f32 %v3696_v46, %v1521_v8  ;;  %v1084_v62 = vmul.f32 %v3586_v3, %v3546_v38  ;;  %vm1088_vm11 = vweird.f32 %v3546_v38  ;;  %vm1089_vm12 = vweird.f32 %v3586_v3 }
 0x10f   : > { %v2935_v29 = vpop.eup %2934  ;;  %v1731_v9 = vmul.f32 %v3606_v34, %v1730_v14  ;;  %v1740_v33 = vor.u32 1.1754944e-38, %v1739_v28  ;;  %v1092_v11 = vand.u32 2147483647, %v3546_v38  ;;  %v1094_v19 = vand.u32 2147483648, %v3546_v38  ;;  %vm1090_vm0 = vmor %vm1088_vm11, %vm1089_vm12 }
 0x110   : > { %v2937_v31 = vpop.eup %2936  ;;  %v3949_v27 = vadd.f32 1.0, %v2935_v29  ;;  %v1526_v32 = vsel %vm3931_vm9, %v3696_v46, %v1522_v53  ;;  %v1085_v26 = vsub.f32 1.0, %v1084_v62  ;;  %vm1738_vm14 = vcmp.eq.f32.partialorder %v1737_v15, 8.507059e+37 }
 0x111   : > { %v3964_v49 = vpop.eup %2938  ;;  %v3966_v17 = vadd.f32 1.0, %v2937_v31  ;;  %v1531_v46 = vsel %vm3938_vm10, %v1530_v13, %v1526_v32  ;;  %v1732_v50 = vadd.f32 %v3606_v34, %v1731_v9  ;;  %2942 = vrcp.f32 %v3904_v36  ;;  %v326_v31 = vld [vmem:[%s3224_s8 + $0x58] sm:$0xff]  ;;  %v606_v32 = vpop.f32.mrf.mxu0 }
 0x112   : > { %v2941_v61 = vpop.eup %2940  ;;  %2190 = vperm.xlu2 %2797, %v1531_v46   ;;  %v1086_v56 = vmul.f32 %v3586_v3, %v1085_v26  ;;  %vm3974_vm15 = vcmp.eq.f32.partialorder %v1092_v11, 8.507059e+37  ;;  %v649_v39 = vadd.f32 %v648_v25, %v340_v30  ;;  %2944 = vrcp.f32 %v3949_v27 }
 0x113   : > { %v1736_v43 = vsel %vm3958_vm13, %v3606_v34, %v1732_v50  ;;  %v1095_v60 = vor.u32 1.1754944e-38, %v1094_v19  ;;  %v691_v41 = vadd.f32 %v690_v21, %v354_v57  ;;  %v733_v23 = vadd.f32 %v732_v55, %v368_v18 }
 0x114   : > { %v1741_v51 = vsel %vm1738_vm14, %v1740_v33, %v1736_v43  ;;  %v1087_v47 = vadd.f32 %v3586_v3, %v1086_v56  ;;  %v2732_v6 = vmul.f32 -1.442695, %v649_v39  ;;  %2946 = vrcp.f32 %v3966_v17  ;;  %v693_v43 = vpop.f32.mrf.mxu2 }
 0x115   : > { %2260 = vperm.xlu1 %2796, %v1741_v51   ;;  %v1744_v40 = vmul.f32 %v3767_v54, %v3730_v10  ;;  %v3990_v8 = vadd.f32 1.0, %v2941_v61  ;;  %v2746_v7 = vmul.f32 -1.442695, %v691_v41  ;;  %vm1748_vm1 = vweird.f32 %v3730_v10  ;;  %v369_v51 = vld [vmem:[%s3224_s8 + $0x1b0] sm:$0xff] }
 0x116   : > { %v1091_v34 = vsel %vm1090_vm0, %v3586_v3, %v1087_v47  ;;  %vm1749_vm2 = vweird.f32 %v3767_v54  ;;  %v1752_v14 = vand.u32 2147483647, %v3730_v10  ;;  %2948 = vpow2.f32 %v2732_v6  ;;  %v735_v47 = vpop.f32.mrf.mxu3 }
 0x117   : > { %v1096_v38 = vsel %vm3974_vm15, %v1095_v60, %v1091_v34  ;;  %v1745_v13 = vsub.f32 1.0, %v1744_v40  ;;  %v3998_v15 = vpop.eup %2942  ;;  %v2760_v28 = vmul.f32 -1.442695, %v733_v23  ;;  %v1754_v53 = vand.u32 2147483648, %v3730_v10  ;;  %vm4011_vm5 = vmor %vm1748_vm1, %vm1749_vm2 }
 0x118   : > { %2045 = vperm.xlu0 %2795, %v1096_v38   ;;  %v1099_v3 = vmul.f32 %v3673_v45, %v3627_v48  ;;  %v4003_v20 = vpop.eup %2944  ;;  %vm1103_vm3 = vweird.f32 %v3627_v48  ;;  %vm1104_vm4 = vweird.f32 %v3673_v45  ;;  %v1107_v29 = vand.u32 2147483647, %v3627_v48 }
 0x119   : > { %v1746_v62 = vmul.f32 %v3767_v54, %v1745_v13  ;;  %v1755_v33 = vor.u32 1.1754944e-38, %v1754_v53  ;;  %v1109_v30 = vand.u32 2147483648, %v3627_v48  ;;  %v1309_v25 = vmul.f32 %v3682_v0, %v3637_v58  ;;  %vm4033_vm9 = vmor %vm1103_vm3, %vm1104_vm4  ;;  %v355_v48 = vld [vmem:[%s3224_s8 + $0x140] sm:$0xff] }
 0x11a   : > { %v1100_v11 = vsub.f32 1.0, %v1099_v3  ;;  %v4019_v2 = vpop.eup %2946  ;;  %2950 = vpow2.f32 %v2746_v7  ;;  %vm1753_vm6 = vcmp.eq.f32.partialorder %v1752_v14, 8.507059e+37  ;;  %vm1313_vm7 = vweird.f32 %v3637_v58 }
 0x11b   : > { %v1747_v26 = vadd.f32 %v3767_v54, %v1746_v62  ;;  %v1310_v19 = vsub.f32 1.0, %v1309_v25  ;;  %vm1314_vm8 = vweird.f32 %v3682_v0  ;;  %v1317_v57 = vand.u32 2147483647, %v3637_v58 }
 0x11c   : > { %v1101_v10 = vmul.f32 %v3673_v45, %v1100_v11  ;;  %v1110_v50 = vor.u32 1.1754944e-38, %v1109_v30  ;;  %v1319_v18 = vand.u32 2147483648, %v3637_v58  ;;  %v607_v55 = vadd.f32 %v606_v32, %v326_v31  ;;  %v2949_v61 = vpop.eup %2948  ;;  %vm4050_vm11 = vmor %vm1313_vm7, %vm1314_vm8 }
 0x11d   : > { %v1751_v21 = vsel %vm4011_vm5, %v3767_v54, %v1747_v26  ;;  %vm4039_vm10 = vcmp.eq.f32.partialorder %v1107_v29, 8.507059e+37  ;;  %v1311_v54 = vmul.f32 %v3682_v0, %v1310_v19  ;;  %2952 = vrcp.f32 %v3990_v8 }
 0x11e   : > { %v1756_v56 = vsel %vm1753_vm6, %v1755_v33, %v1751_v21  ;;  %v1102_v63 = vadd.f32 %v3673_v45, %v1101_v10  ;;  %v1320_v41 = vor.u32 1.1754944e-38, %v1319_v18  ;;  %vm1318_vm12 = vcmp.eq.f32.partialorder %v1317_v57, 8.507059e+37  ;;  %v327_v57 = vld [vmem:[%s3224_s8 + $0x60] sm:$0xff]  ;;  %v609_v21 = vpop.f32.mrf.mxu0 }
 0x11f   : > { %2265 = vperm.xlu2 %2797, %v1756_v56   ;;  %v1312_v23 = vadd.f32 %v3682_v0, %v1311_v54  ;;  %v2718_v40 = vmul.f32 -1.442695, %v607_v55  ;;  %2954 = vpow2.f32 %v2760_v28  ;;  %v694_v7 = vadd.f32 %v693_v43, %v355_v48  ;;  %v341_v56 = vld [vmem:[%s3224_s8 + $0xd0] sm:$0xff] }
 0x120   : > { %v1106_v6 = vsel %vm4033_vm9, %v3673_v45, %v1102_v63  ;;  %v2951_v34 = vpop.eup %2950  ;;  %v736_v13 = vadd.f32 %v735_v47, %v369_v51  ;;  %v1114_v45 = vmul.f32 %v3847_v35, %v3788_v4  ;;  %vm1118_vm13 = vweird.f32 %v3788_v4  ;;  %v651_v63 = vpop.f32.mrf.mxu1 }
 0x121   : > { %v1111_v58 = vsel %vm4039_vm10, %v1110_v50, %v1106_v6  ;;  %v1316_v38 = vsel %vm4050_vm11, %v3682_v0, %v1312_v23  ;;  %2956 = vpow2.f32 %v2718_v40  ;;  %v2747_v53 = vmul.f32 -1.442695, %v694_v7 }
 0x122   : > { %2050 = vperm.xlu1 %2796, %v1111_v58   ;;  %v1321_v14 = vsel %vm1318_vm12, %v1320_v41, %v1316_v38  ;;  %vm1119_vm14 = vweird.f32 %v3847_v35  ;;  %v1115_v28 = vsub.f32 1.0, %v1114_v45  ;;  %v1122_v3 = vand.u32 2147483647, %v3788_v4 }
 0x123   : > { %2120 = vperm.xlu0 %2795, %v1321_v14   ;;  %v1124_v62 = vand.u32 2147483648, %v3788_v4  ;;  %v1324_v0 = vmul.f32 %v3759_v42, %v3707_v16  ;;  %v4072_v29 = vpop.eup %2952  ;;  %v4074_v9 = vadd.f32 1.0, %v2949_v61  ;;  %v4076_v33 = vadd.f32 1.0, %v2951_v34  ;;  %vm4086_vm1 = vmor %vm1118_vm13, %vm1119_vm14 }
 0x124   : > { %2958 = vpow2.f32 %v2747_v53  ;;  %v1116_v11 = vmul.f32 %v3847_v35, %v1115_v28  ;;  %vm1328_vm15 = vweird.f32 %v3707_v16  ;;  %vm1329_vm0 = vweird.f32 %v3759_v42  ;;  %v370_v53 = vld [vmem:[%s3224_s8 + $0x1b8] sm:$0xff]  ;;  %v738_v28 = vpop.f32.mrf.mxu3 }
 0x125   : > { %v1332_v30 = vand.u32 2147483647, %v3707_v16  ;;  %v2955_v25 = vpop.eup %2954  ;;  %v1125_v32 = vor.u32 1.1754944e-38, %v1124_v62  ;;  %v1325_v26 = vsub.f32 1.0, %v1324_v0  ;;  %v1334_v10 = vand.u32 2147483648, %v3707_v16  ;;  %vm4107_vm5 = vmor %vm1328_vm15, %vm1329_vm0 }
 0x126   : > { %v1534_v19 = vmul.f32 %v3762_v1, %v3721_v5  ;;  %v2761_v50 = vmul.f32 -1.442695, %v736_v13  ;;  %v1117_v18 = vadd.f32 %v3847_v35, %v1116_v11  ;;  %vm1123_vm2 = vcmp.eq.f32.partialorder %v1122_v3, 8.507059e+37 }
 0x127   : > { %v2957_v46 = vpop.eup %2956  ;;  %vm1538_vm3 = vweird.f32 %v3721_v5  ;;  %v1326_v4 = vmul.f32 %v3759_v42, %v1325_v26  ;;  %vm1539_vm4 = vweird.f32 %v3762_v1  ;;  %v1542_v61 = vand.u32 2147483647, %v3721_v5 }
 0x128   : > { %v1535_v55 = vsub.f32 1.0, %v1534_v19  ;;  %v1121_v39 = vsel %vm4086_vm1, %v3847_v35, %v1117_v18  ;;  %v1335_v48 = vor.u32 1.1754944e-38, %v1334_v10  ;;  %v1544_v43 = vand.u32 2147483648, %v3721_v5  ;;  %vm4121_vm7 = vmor %vm1538_vm3, %vm1539_vm4 }
 0x129   : > { %v610_v60 = vadd.f32 %v609_v21, %v327_v57  ;;  %v1126_v51 = vsel %vm1123_vm2, %v1125_v32, %v1121_v39  ;;  %v1327_v47 = vadd.f32 %v3759_v42, %v1326_v4  ;;  %vm1333_vm6 = vcmp.eq.f32.partialorder %v1332_v30, 8.507059e+37 }
 0x12a   : > { %v2959_v41 = vpop.eup %2958  ;;  %v1536_v6 = vmul.f32 %v3762_v1, %v1535_v55  ;;  %2960 = vrcp.f32 %v4074_v9  ;;  %v4115_v35 = vadd.f32 1.0, %v2955_v25  ;;  %2055 = vperm.xlu2 %2797, %v1126_v51   ;;  %v1545_v23 = vor.u32 1.1754944e-38, %v1544_v43 }
 0x12b   : > { %v652_v40 = vadd.f32 %v651_v63, %v341_v56  ;;  %v1331_v34 = vsel %vm4107_vm5, %v3759_v42, %v1327_v47  ;;  %vm1543_vm8 = vcmp.eq.f32.partialorder %v1542_v61, 8.507059e+37  ;;  %v2719_v7 = vmul.f32 -1.442695, %v610_v60  ;;  %v328_v61 = vld [vmem:[%s3224_s8 + $0x68] sm:$0xff]  ;;  %v612_v56 = vpop.f32.mrf.mxu0 }
 0x12c   : > { %v1537_v58 = vadd.f32 %v3762_v1, %v1536_v6  ;;  %2962 = vpow2.f32 %v2761_v50  ;;  %v1336_v38 = vsel %vm1333_vm6, %v1335_v48, %v1331_v34  ;;  %v1339_v5 = vmul.f32 %v3964_v49, %v3889_v44 }
 0x12d   : > { %v2733_v13 = vmul.f32 -1.442695, %v652_v40  ;;  %2964 = vrcp.f32 %v4076_v33  ;;  %v4132_v45 = vadd.f32 1.0, %v2957_v46  ;;  %v4134_v14 = vadd.f32 1.0, %v2959_v41  ;;  %2125 = vperm.xlu1 %2796, %v1336_v38   ;;  %v654_v38 = vpop.f32.mrf.mxu1 }
 0x12e   : > { %v1541_v42 = vsel %vm4121_vm7, %v3762_v1, %v1537_v58  ;;  %v1340_v62 = vsub.f32 1.0, %v1339_v5  ;;  %vm1343_vm9 = vweird.f32 %v3889_v44  ;;  %vm1344_vm10 = vweird.f32 %v3964_v49 }
 0x12f   : > { %v1546_v3 = vsel %vm1543_vm8, %v1545_v23, %v1541_v42  ;;  %2966 = vpow2.f32 %v2719_v7  ;;  %v1347_v0 = vand.u32 2147483647, %v3889_v44  ;;  %v1349_v11 = vand.u32 2147483648, %v3889_v44  ;;  %vm4150_vm12 = vmor %vm1343_vm9, %vm1344_vm10 }
 0x130   : > { %2195 = vperm.xlu0 %2795, %v1546_v3   ;;  %v1549_v30 = vmul.f32 %v3857_v37, %v3810_v24  ;;  %v4146_v25 = vpop.eup %2960  ;;  %2968 = vpow2.f32 %v2733_v13  ;;  %v739_v1 = vadd.f32 %v738_v28, %v370_v53  ;;  %v1341_v31 = vmul.f32 %v3964_v49, %v1340_v62  ;;  %v342_v13 = vld [vmem:[%s3224_s8 + $0xd8] sm:$0xff] }
 0x131   : > { %vm1553_vm11 = vweird.f32 %v3810_v24  ;;  %v1350_v26 = vor.u32 1.1754944e-38, %v1349_v11  ;;  %vm1554_vm13 = vweird.f32 %v3857_v37  ;;  %v1557_v44 = vand.u32 2147483647, %v3810_v24  ;;  %v356_v11 = vld [vmem:[%s3224_s8 + $0x148] sm:$0xff] }
 0x132   : > { %v1550_v10 = vsub.f32 1.0, %v1549_v30  ;;  %v2963_v19 = vpop.eup %2962  ;;  %v1342_v57 = vadd.f32 %v3964_v49, %v1341_v31  ;;  %vm4157_vm14 = vcmp.eq.f32.partialorder %v1347_v0, 8.507059e+37  ;;  %v1559_v46 = vand.u32 2147483648, %v3810_v24  ;;  %vm4178_vm1 = vmor %vm1553_vm11, %vm1554_vm13  ;;  %v696_v30 = vpop.f32.mrf.mxu2 }
 0x133   : > { %v1759_v50 = vmul.f32 %v3915_v22, %v3837_v59  ;;  %v4164_v18 = vpop.eup %2964  ;;  %vm1763_vm15 = vweird.f32 %v3837_v59  ;;  %vm1764_vm0 = vweird.f32 %v3915_v22  ;;  %v1767_v55 = vand.u32 2147483647, %v3837_v59 }
 0x134   : > { %v1551_v4 = vmul.f32 %v3857_v37, %v1550_v10  ;;  %v1346_v63 = vsel %vm4150_vm12, %v3964_v49, %v1342_v57  ;;  %v1560_v54 = vor.u32 1.1754944e-38, %v1559_v46  ;;  %v1769_v43 = vand.u32 2147483648, %v3837_v59  ;;  %vm4198_vm3 = vmor %vm1763_vm15, %vm1764_vm0 }
 0x135   : > { %v1760_v48 = vsub.f32 1.0, %v1759_v50  ;;  %v2967_v60 = vpop.eup %2966  ;;  %v4183_v41 = vadd.f32 1.0, %v2963_v19  ;;  %v1351_v51 = vsel %vm4157_vm14, %v1350_v26, %v1346_v63  ;;  %vm1558_vm2 = vcmp.eq.f32.partialorder %v1557_v44, 8.507059e+37 }
 0x136   : > { %v1552_v49 = vadd.f32 %v3857_v37, %v1551_v4  ;;  %v2969_v47 = vpop.eup %2968  ;;  %2970 = vrcp.f32 %v4115_v35  ;;  %v2762_v24 = vmul.f32 -1.442695, %v739_v1  ;;  %2130 = vperm.xlu2 %2797, %v1351_v51   ;;  %v613_v16 = vadd.f32 %v612_v56, %v328_v61 }
 0x137   : > { %v1761_v6 = vmul.f32 %v3915_v22, %v1760_v48  ;;  %2972 = vrcp.f32 %v4132_v45  ;;  %v1770_v34 = vor.u32 1.1754944e-38, %v1769_v43  ;;  %vm1768_vm4 = vcmp.eq.f32.partialorder %v1767_v55, 8.507059e+37 }
 0x138   : > { %v1556_v23 = vsel %vm4178_vm1, %v3857_v37, %v1552_v49  ;;  %2974 = vrcp.f32 %v4134_v14  ;;  %v2720_v37 = vmul.f32 -1.442695, %v613_v16  ;;  %v1564_v59 = vmul.f32 %v4072_v29, %v3990_v8 }
 0x139   : > { %v1561_v58 = vsel %vm1558_vm2, %v1560_v54, %v1556_v23  ;;  %v1762_v7 = vadd.f32 %v3915_v22, %v1761_v6  ;;  %2976 = vrcp.f32 %v4183_v41  ;;  %v4208_v5 = vadd.f32 1.0, %v2967_v60 }
 0x13a   : > { %2200 = vperm.xlu1 %2796, %v1561_v58   ;;  %v4210_v42 = vadd.f32 1.0, %v2969_v47  ;;  %2978 = vpow2.f32 %v2762_v24  ;;  %v1565_v3 = vsub.f32 1.0, %v1564_v59  ;;  %vm1568_vm5 = vweird.f32 %v3990_v8  ;;  %v343_v24 = vld [vmem:[%s3224_s8 + $0xe0] sm:$0xff]  ;;  %v4278_v58 = vpop.permute.xlu2 %2100  ;;  %v699_v59 = vpop.f32.mrf.mxu2 }
 0x13b   : > { %v1766_v53 = vsel %vm4198_vm3, %v3915_v22, %v1762_v7  ;;  %vm1569_vm6 = vweird.f32 %v4072_v29  ;;  %v655_v0 = vadd.f32 %v654_v38, %v342_v13  ;;  %v1572_v1 = vand.u32 2147483647, %v3990_v8  ;;  %5817 = vst [vmem:[#allocation2_spill] sm:$0xff] %v4278_v58 }
 0x13c   : > { %v1771_v28 = vsel %vm1768_vm4, %v1770_v34, %v1766_v53  ;;  %v4217_v62 = vpop.eup %2970  ;;  %v1574_v31 = vand.u32 2147483648, %v3990_v8  ;;  %v1774_v32 = vmul.f32 %v3998_v15, %v3904_v36  ;;  %2980 = vpow2.f32 %v2720_v37  ;;  %vm4235_vm9 = vmor %vm1568_vm5, %vm1569_vm6 }
 0x13d   : > { %2270 = vperm.xlu0 %2795, %v1771_v28   ;;  %v4224_v22 = vpop.eup %2972  ;;  %v1566_v26 = vmul.f32 %v4072_v29, %v1565_v3  ;;  %vm1778_vm7 = vweird.f32 %v3904_v36  ;;  %vm1779_vm8 = vweird.f32 %v3998_v15  ;;  %v1782_v21 = vand.u32 2147483647, %v3904_v36 }
 0x13e   : > { %v4229_v10 = vpop.eup %2974  ;;  %v1575_v19 = vor.u32 1.1754944e-38, %v1574_v31  ;;  %v1775_v57 = vsub.f32 1.0, %v1774_v32  ;;  %v1784_v46 = vand.u32 2147483648, %v3904_v36  ;;  %v697_v4 = vadd.f32 %v696_v30, %v356_v11  ;;  %vm4256_vm13 = vmor %vm1778_vm7, %vm1779_vm8  ;;  %v371_v32 = vld [vmem:[%s3224_s8 + $0x1c0] sm:$0xff] }
 0x13f   : > { %v4241_v50 = vpop.eup %2976  ;;  %v1567_v55 = vadd.f32 %v4072_v29, %v1566_v26  ;;  %vm1573_vm10 = vcmp.eq.f32.partialorder %v1572_v1, 8.507059e+37  ;;  %v1129_v8 = vmul.f32 %v3925_v12, %v3877_v52  ;;  %vm1133_vm11 = vweird.f32 %v3877_v52  ;;  %v741_v26 = vpop.f32.mrf.mxu3 }
 0x140   : > { %v2979_v61 = vpop.eup %2978  ;;  %v1776_v56 = vmul.f32 %v3998_v15, %v1775_v57  ;;  %v1785_v63 = vor.u32 1.1754944e-38, %v1784_v46  ;;  %vm1134_vm12 = vweird.f32 %v3925_v12  ;;  %v1137_v43 = vand.u32 2147483647, %v3877_v52 }
 0x141   : > { %v1571_v39 = vsel %vm4235_vm9, %v4072_v29, %v1567_v55  ;;  %v1130_v48 = vsub.f32 1.0, %v1129_v8  ;;  %v1139_v60 = vand.u32 2147483648, %v3877_v52  ;;  %v2734_v51 = vmul.f32 -1.442695, %v655_v0  ;;  %v657_v29 = vpop.f32.mrf.mxu1  ;;  %vm4274_vm15 = vmor %vm1133_vm11, %vm1134_vm12 }
 0x142   : > { %v1576_v49 = vsel %vm1573_vm10, %v1575_v19, %v1571_v39  ;;  %v1777_v47 = vadd.f32 %v3998_v15, %v1776_v56  ;;  %vm1783_vm14 = vcmp.eq.f32.partialorder %v1782_v21, 8.507059e+37  ;;  %v2981_v6 = vpop.eup %2980  ;;  %2982 = vrcp.f32 %v4208_v5 }
 0x143   : > { %v2748_v36 = vmul.f32 -1.442695, %v697_v4  ;;  %2205 = vperm.xlu2 %2797, %v1576_v49   ;;  %v1131_v16 = vmul.f32 %v3925_v12, %v1130_v48  ;;  %2984 = vrcp.f32 %v4210_v42  ;;  %v1140_v34 = vor.u32 1.1754944e-38, %v1139_v60 }
 0x144   : > { %v1781_v23 = vsel %vm4256_vm13, %v3998_v15, %v1777_v47  ;;  %vm1138_vm0 = vcmp.eq.f32.partialorder %v1137_v43, 8.507059e+37  ;;  %v658_v37 = vadd.f32 %v657_v29, %v343_v24  ;;  %v4281_v13 = vadd.f32 1.0, %v2979_v61  ;;  %v357_v15 = vld [vmem:[%s3224_s8 + $0x150] sm:$0xff]  ;;  %v4334_v29 = vpop.permute.xlu2 %2175 }
 0x145   : > { %v1786_v7 = vsel %vm1783_vm14, %v1785_v63, %v1781_v23  ;;  %v1132_v38 = vadd.f32 %v3925_v12, %v1131_v16  ;;  %2986 = vpow2.f32 %v2734_v51  ;;  %v1789_v52 = vmul.f32 %v4217_v62, %v4115_v35  ;;  %5822 = vst [vmem:[#allocation3_spill] sm:$0xff] %v4334_v29 }
 0x146   : > { %2275 = vperm.xlu1 %2796, %v1786_v7   ;;  %v4286_v53 = vadd.f32 1.0, %v2981_v6  ;;  %2988 = vpow2.f32 %v2748_v36  ;;  %vm1793_vm1 = vweird.f32 %v4115_v35  ;;  %vm1794_vm2 = vweird.f32 %v4217_v62 }
 0x147   : > { %v1136_v28 = vsel %vm4274_vm15, %v3925_v12, %v1132_v38  ;;  %v1790_v0 = vsub.f32 1.0, %v1789_v52  ;;  %v1797_v11 = vand.u32 2147483647, %v4115_v35  ;;  %v2735_v1 = vmul.f32 -1.442695, %v658_v37  ;;  %vm4310_vm5 = vmor %vm1793_vm1, %vm1794_vm2  ;;  %v702_v52 = vpop.f32.mrf.mxu2 }
 0x148   : > { %v1141_v3 = vsel %vm1138_vm0, %v1140_v34, %v1136_v28  ;;  %v4294_v30 = vpop.eup %2982  ;;  %v700_v31 = vadd.f32 %v699_v59, %v357_v15  ;;  %v1799_v44 = vand.u32 2147483648, %v4115_v35  ;;  %v1144_v12 = vmul.f32 %v4003_v20, %v3949_v27  ;;  %v358_v59 = vld [vmem:[%s3224_s8 + $0x158] sm:$0xff]  ;;  %v372_v28 = vld [vmem:[%s3224_s8 + $0x1c8] sm:$0xff] }
 0x149   : > { %2060 = vperm.xlu0 %2795, %v1141_v3   ;;  %v4300_v19 = vpop.eup %2984  ;;  %v1791_v57 = vmul.f32 %v4217_v62, %v1790_v0  ;;  %vm1148_vm3 = vweird.f32 %v3949_v27  ;;  %vm1149_vm4 = vweird.f32 %v4003_v20  ;;  %v1152_v21 = vand.u32 2147483647, %v3949_v27  ;;  %v744_v3 = vpop.f32.mrf.mxu3 }
 0x14a   : > { %v1800_v4 = vor.u32 1.1754944e-38, %v1799_v44  ;;  %v1145_v55 = vsub.f32 1.0, %v1144_v12  ;;  %v1154_v8 = vand.u32 2147483648, %v3949_v27  ;;  %v1354_v61 = vmul.f32 %v4019_v2, %v3966_v17  ;;  %vm4329_vm9 = vmor %vm1148_vm3, %vm1149_vm4  ;;  %v373_v12 = vld [vmem:[%s3224_s8 + $0x1d0] sm:$0xff] }
 0x14b   : > { %v2987_v56 = vpop.eup %2986  ;;  %v742_v63 = vadd.f32 %v741_v26, %v371_v32  ;;  %v1792_v39 = vadd.f32 %v4217_v62, %v1791_v57  ;;  %vm1798_vm6 = vcmp.eq.f32.partialorder %v1797_v11, 8.507059e+37  ;;  %vm1358_vm7 = vweird.f32 %v3966_v17 }
 0x14c   : > { %v2989_v54 = vpop.eup %2988  ;;  %v1146_v35 = vmul.f32 %v4003_v20, %v1145_v55  ;;  %v1355_v48 = vsub.f32 1.0, %v1354_v61  ;;  %vm1359_vm8 = vweird.f32 %v4019_v2  ;;  %v1362_v43 = vand.u32 2147483647, %v3966_v17  ;;  %v329_v55 = vld [vmem:[%s3224_s8 + $0x70] sm:$0xff] }
 0x14d   : > { %v2749_v60 = vmul.f32 -1.442695, %v700_v31  ;;  %v1796_v51 = vsel %vm4310_vm5, %v4217_v62, %v1792_v39  ;;  %v1155_v47 = vor.u32 1.1754944e-38, %v1154_v8  ;;  %v1364_v24 = vand.u32 2147483648, %v3966_v17  ;;  %v4338_v62 = vpop.permute.xlu0 %2015  ;;  %vm4345_vm11 = vmor %vm1358_vm7, %vm1359_vm8  ;;  %v615_v8 = vpop.f32.mrf.mxu0 }
 0x14e   : > { %v1801_v6 = vsel %vm1798_vm6, %v1800_v4, %v1796_v51  ;;  %v1147_v36 = vadd.f32 %v4003_v20, %v1146_v35  ;;  %vm1153_vm10 = vcmp.eq.f32.partialorder %v1152_v21, 8.507059e+37  ;;  %v1356_v16 = vmul.f32 %v4019_v2, %v1355_v48  ;;  %5823 = vst [vmem:[#allocation4_spill] sm:$0xff] %v4338_v62  ;;  %v4396_v35 = vpop.permute.xlu2 %2250  ;;  %v4398_v48 = vpop.permute.xlu1 %2095 }
 0x14f   : > { %2990 = vrcp.f32 %v4281_v13  ;;  %v2763_v27 = vmul.f32 -1.442695, %v742_v63  ;;  %2280 = vperm.xlu2 %2797, %v1801_v6   ;;  %v1365_v40 = vor.u32 1.1754944e-38, %v1364_v24  ;;  %vm1363_vm12 = vcmp.eq.f32.partialorder %v1362_v43, 8.507059e+37  ;;  %5830 = vst [vmem:[#allocation5_spill] sm:$0xff] %v4396_v35 }
 0x150   : > { %2992 = vrcp.f32 %v4286_v53  ;;  %v1151_v34 = vsel %vm4329_vm9, %v4003_v20, %v1147_v36  ;;  %v1357_v7 = vadd.f32 %v4019_v2, %v1356_v16  ;;  %v4354_v38 = vadd.f32 1.0, %v2987_v56  ;;  %5831 = vst [vmem:[#allocation6_spill] sm:$0xff] %v4398_v48 }
 0x151   : > { %2994 = vpow2.f32 %v2735_v1  ;;  %v1156_v37 = vsel %vm1153_vm10, %v1155_v47, %v1151_v34  ;;  %v4356_v17 = vadd.f32 1.0, %v2989_v54  ;;  %v1159_v20 = vmul.f32 %v4224_v22, %v4132_v45 }
 0x152   : > { %2996 = vpow2.f32 %v2749_v60  ;;  %2065 = vperm.xlu1 %2796, %v1156_v37   ;;  %v1361_v15 = vsel %vm4345_vm11, %v4019_v2, %v1357_v7  ;;  %vm1163_vm13 = vweird.f32 %v4132_v45  ;;  %v1167_v11 = vand.u32 2147483647, %v4132_v45 }
 0x153   : > { %2998 = vpow2.f32 %v2763_v27  ;;  %v1366_v0 = vsel %vm1363_vm12, %v1365_v40, %v1361_v15  ;;  %v1160_v1 = vsub.f32 1.0, %v1159_v20  ;;  %vm1164_vm14 = vweird.f32 %v4224_v22 }
 0x154   : > { %2135 = vperm.xlu0 %2795, %v1366_v0   ;;  %v1169_v2 = vand.u32 2147483648, %v4132_v45  ;;  %v1369_v31 = vmul.f32 %v4146_v25, %v4074_v9  ;;  %v703_v26 = vadd.f32 %v702_v52, %v358_v59  ;;  %v745_v44 = vadd.f32 %v744_v3, %v372_v28  ;;  %vm4388_vm2 = vmor %vm1163_vm13, %vm1164_vm14 }
 0x155   : > { %v4371_v32 = vpop.eup %2990  ;;  %vm4373_vm15 = vcmp.eq.f32.partialorder %v1167_v11, 8.507059e+37  ;;  %vm1373_vm0 = vweird.f32 %v4074_v9  ;;  %v1161_v21 = vmul.f32 %v4224_v22, %v1160_v1  ;;  %vm1374_vm1 = vweird.f32 %v4146_v25  ;;  %v4404_v49 = vpop.permute.xlu0 %2090 }
 0x156   : > { %v4378_v57 = vpop.eup %2992  ;;  %v1370_v46 = vsub.f32 1.0, %v1369_v31  ;;  %v1377_v4 = vand.u32 2147483647, %v4074_v9  ;;  %v1170_v63 = vor.u32 1.1754944e-38, %v1169_v2  ;;  %v1379_v39 = vand.u32 2147483648, %v4074_v9  ;;  %5832 = vst [vmem:[#allocation7_spill] sm:$0xff] %v4404_v49  ;;  %vm4410_vm5 = vmor %vm1373_vm0, %vm1374_vm1  ;;  %v747_v1 = vpop.f32.mrf.mxu3 }
 0x157   : > { %v2995_v61 = vpop.eup %2994  ;;  %v1579_v54 = vmul.f32 %v4164_v18, %v4076_v33  ;;  %vm1583_vm3 = vweird.f32 %v4076_v33  ;;  %v1162_v60 = vadd.f32 %v4224_v22, %v1161_v21  ;;  %vm1584_vm4 = vweird.f32 %v4164_v18 }
 0x158   : > { %v2997_v43 = vpop.eup %2996  ;;  %v1371_v45 = vmul.f32 %v4146_v25, %v1370_v46  ;;  %v1587_v51 = vand.u32 2147483647, %v4076_v33  ;;  %v1380_v6 = vor.u32 1.1754944e-38, %v1379_v39  ;;  %v1589_v16 = vand.u32 2147483648, %v4076_v33  ;;  %vm4431_vm7 = vmor %vm1583_vm3, %vm1584_vm4  ;;  %v4457_v46 = vpop.permute.xlu1 %2170 }
 0x159   : > { %v2999_v47 = vpop.eup %2998  ;;  %v1580_v36 = vsub.f32 1.0, %v1579_v54  ;;  %v616_v27 = vadd.f32 %v615_v8, %v329_v55  ;;  %v2750_v23 = vmul.f32 -1.442695, %v703_v26  ;;  %v1166_v40 = vsel %vm4388_vm2, %v4224_v22, %v1162_v60 }
 0x15a   : > { %v1372_v34 = vadd.f32 %v4146_v25, %v1371_v45  ;;  %vm1378_vm6 = vcmp.eq.f32.partialorder %v1377_v4, 8.507059e+37  ;;  %3000 = vrcp.f32 %v4354_v38  ;;  %v2764_v9 = vmul.f32 -1.442695, %v745_v44  ;;  %v4459_v4 = vpop.permute.xlu2 %2035 }
 0x15b   : > { %v1171_v7 = vsel %vm4373_vm15, %v1170_v63, %v1166_v40  ;;  %v1581_v37 = vmul.f32 %v4164_v18, %v1580_v36  ;;  %3002 = vrcp.f32 %v4356_v17  ;;  %v1590_v59 = vor.u32 1.1754944e-38, %v1589_v16  ;;  %5837 = vst [vmem:[#allocation8_spill] sm:$0xff] %v4459_v4  ;;  %v660_v36 = vpop.f32.mrf.mxu1 }
 0x15c   : > { %2070 = vperm.xlu2 %2797, %v1171_v7   ;;  %v1376_v15 = vsel %vm4410_vm5, %v4146_v25, %v1372_v34  ;;  %vm1588_vm8 = vcmp.eq.f32.partialorder %v1587_v51, 8.507059e+37  ;;  %v2721_v3 = vmul.f32 -1.442695, %v616_v27  ;;  %v4436_v20 = vadd.f32 1.0, %v2995_v61  ;;  %v1927_v27 = vld [vmem:[%s4468_s12 + $0x110] sm:$0xff] }
 0x15d   : > { %v1381_v52 = vsel %vm1378_vm6, %v1380_v6, %v1376_v15  ;;  %v1582_v28 = vadd.f32 %v4164_v18, %v1581_v37  ;;  %3004 = vpow2.f32 %v2750_v23  ;;  %v1384_v25 = vmul.f32 %v4300_v19, %v4210_v42  ;;  %v4474_v56 = vpop.permute.xlu0 %2165  ;;  %v344_v6 = vld [vmem:[%s3224_s8 + $0xe8] sm:$0xff] }
 0x15e   : > { %2140 = vperm.xlu1 %2796, %v1381_v52   ;;  %v4441_v33 = vadd.f32 1.0, %v2997_v43  ;;  %3006 = vpow2.f32 %v2764_v9  ;;  %vm1388_vm9 = vweird.f32 %v4210_v42  ;;  %vm1389_vm10 = vweird.f32 %v4300_v19 }
 0x15f   : > { %v1586_v0 = vsel %vm4431_vm7, %v4164_v18, %v1582_v28  ;;  %v1385_v2 = vsub.f32 1.0, %v1384_v25  ;;  %v1392_v31 = vand.u32 2147483647, %v4210_v42  ;;  %v4451_v44 = vadd.f32 1.0, %v2999_v47  ;;  %vm4480_vm13 = vmor %vm1388_vm9, %vm1389_vm10 }
 0x160   : > { %v1591_v11 = vsel %vm1588_vm8, %v1590_v59, %v1586_v0  ;;  %v4449_v26 = vpop.eup %3000  ;;  %3008 = vpow2.f32 %v2721_v3  ;;  %v1394_v21 = vand.u32 2147483648, %v4210_v42  ;;  %v1594_v18 = vmul.f32 %v4229_v10, %v4134_v14 }
 0x161   : > { %2210 = vperm.xlu0 %2795, %v1591_v11   ;;  %v4461_v55 = vpop.eup %3002  ;;  %v1386_v8 = vmul.f32 %v4300_v19, %v1385_v2  ;;  %vm1598_vm11 = vweird.f32 %v4134_v14  ;;  %vm1599_vm12 = vweird.f32 %v4229_v10  ;;  %v1602_v61 = vand.u32 2147483647, %v4134_v14  ;;  %v1957_v11 = vld [vmem:[%s4468_s12 + $0x200] sm:$0xff] }
 0x162   : > { %v1395_v39 = vor.u32 1.1754944e-38, %v1394_v21  ;;  %v1595_v54 = vsub.f32 1.0, %v1594_v18  ;;  %v1604_v43 = vand.u32 2147483648, %v4134_v14  ;;  %v1804_v60 = vmul.f32 %v4241_v50, %v4183_v41  ;;  %vm4508_vm2 = vmor %vm1598_vm11, %vm1599_vm12  ;;  %v4553_v63 = vpop.permute.xlu2 %2040 }
 0x163   : > { %v3005_v45 = vpop.eup %3004  ;;  %v748_v51 = vadd.f32 %v747_v1, %v373_v12  ;;  %v1387_v47 = vadd.f32 %v4300_v19, %v1386_v8  ;;  %vm4488_vm14 = vcmp.eq.f32.partialorder %v1392_v31, 8.507059e+37  ;;  %vm4492_vm15 = vcmp.eq.f32.partialorder %v1602_v61, 8.507059e+37  ;;  %v4551_v61 = vpop.permute.xlu1 %2245 }
 0x164   : > { %v3007_v16 = vpop.eup %3006  ;;  %v1596_v23 = vmul.f32 %v4229_v10, %v1595_v54  ;;  %v1805_v40 = vsub.f32 1.0, %v1804_v60  ;;  %vm1808_vm0 = vweird.f32 %v4183_v41  ;;  %vm1809_vm1 = vweird.f32 %v4241_v50 }
 0x165   : > { %v1391_v34 = vsel %vm4480_vm13, %v4300_v19, %v1387_v47  ;;  %v1605_v7 = vor.u32 1.1754944e-38, %v1604_v43  ;;  %v1812_v37 = vand.u32 2147483647, %v4183_v41  ;;  %v1814_v15 = vand.u32 2147483648, %v4183_v41  ;;  %vm4526_vm3 = vmor %vm1808_vm0, %vm1809_vm1  ;;  %v4557_v54 = vpop.permute.xlu0 %2240 }
 0x166   : > { %v3009_v22 = vpop.eup %3008  ;;  %v1396_v59 = vsel %vm4488_vm14, %v1395_v39, %v1391_v34  ;;  %v1597_v19 = vadd.f32 %v4229_v10, %v1596_v23  ;;  %v1806_v52 = vmul.f32 %v4241_v50, %v1805_v40  ;;  %v661_v28 = vadd.f32 %v660_v36, %v344_v6  ;;  %v705_v23 = vpop.f32.mrf.mxu2 }
 0x167   : > { %3010 = vrcp.f32 %v4436_v20  ;;  %v4520_v14 = vmul.f32 %v4278_v58, %v1927_v27  ;;  %v2765_v3 = vmul.f32 -1.442695, %v748_v51  ;;  %2145 = vperm.xlu2 %2797, %v1396_v59   ;;  %v1815_v0 = vor.u32 1.1754944e-38, %v1814_v15  ;;  %v359_v27 = vld [vmem:[%s3224_s8 + $0x160] sm:$0xff]  ;;  %v4819_v58 = vld [vmem:[%s4468_s12 + $0x238] sm:$0xff] }
 0x168   : > { %3012 = vrcp.f32 %v4441_v33  ;;  %v1601_v1 = vsel %vm4508_vm2, %v4229_v10, %v1597_v19  ;;  %v1807_v2 = vadd.f32 %v4241_v50, %v1806_v52  ;;  %vm1813_vm4 = vcmp.eq.f32.partialorder %v1812_v37, 8.507059e+37  ;;  %5884 = vst [vmem:[#allocation25_spill] sm:$0xff] %v4819_v58  ;;  %v4840_v58 = vld [vmem:[%s4468_s12 + $0x130] sm:$0xff] }
 0x169   : > { %3014 = vrcp.f32 %v4451_v44  ;;  %v4538_v31 = vmul.f32 %v4334_v29, %v1957_v11  ;;  %v1606_v41 = vsel %vm4492_vm15, %v1605_v7, %v1601_v1  ;;  %v2736_v12 = vmul.f32 -1.442695, %v661_v28  ;;  %v750_v1 = vpop.f32.mrf.mxu3  ;;  %v4804_v29 = vld [vmem:[%s4468_s12 + $0x20] sm:$0xff]  ;;  %5889 = vst [vmem:[#allocation30_spill] sm:$0xff] %v4840_v58  ;;  %v4861_v58 = vld [vmem:[%s4468_s12 + $0x228] sm:$0xff] }
 0x16a   : > { %v4542_v21 = vadd.f32 1.0, %v3005_v45  ;;  %v4544_v18 = vadd.f32 1.0, %v3007_v16  ;;  %2215 = vperm.xlu1 %2796, %v1606_v41   ;;  %v1811_v10 = vsel %vm4526_vm3, %v4241_v50, %v1807_v2  ;;  %v1609_v8 = vmul.f32 %v4461_v55, %v4356_v17  ;;  %v4615_v2 = vpop.permute.xlu2 %2115  ;;  %5896 = vst [vmem:[#allocation37_spill] sm:$0xff] %v4861_v58  ;;  %v4882_v58 = vld [vmem:[%s4468_s12 + $0x60] sm:$0xff] }
 0x16b   : > { %3016 = vpow2.f32 %v2765_v3  ;;  %v1816_v39 = vsel %vm1813_vm4, %v1815_v0, %v1811_v10  ;;  %vm1613_vm5 = vweird.f32 %v4356_v17  ;;  %vm1614_vm6 = vweird.f32 %v4461_v55  ;;  %v1893_v0 = vld [vmem:[%s4468_s12] sm:$0xff]  ;;  %v4617_v41 = vpop.permute.xlu1 %2025  ;;  %5903 = vst [vmem:[#allocation44_spill] sm:$0xff] %v4882_v58  ;;  %v4903_v58 = vld [vmem:[%s4468_s12 + $0x158] sm:$0xff] }
 0x16c   : > { %2285 = vperm.xlu0 %2795, %v1816_v39   ;;  %v1610_v43 = vsub.f32 1.0, %v1609_v8  ;;  %v1617_v50 = vand.u32 2147483647, %v4356_v17  ;;  %v1619_v60 = vand.u32 2147483648, %v4356_v17  ;;  %v1819_v45 = vmul.f32 %v4371_v32, %v4281_v13  ;;  %vm4581_vm9 = vmor %vm1613_vm5, %vm1614_vm6  ;;  %v1987_v8 = vld [vmem:[%s4468_s12 + $0x2f0] sm:$0xff]  ;;  %5910 = vst [vmem:[#allocation51_spill] sm:$0xff] %v4903_v58 }
 0x16d   : > { %v4563_v51 = vpop.eup %3010  ;;  %v4565_v47 = vadd.f32 1.0, %v3009_v22  ;;  %3018 = vpow2.f32 %v2736_v12  ;;  %vm1823_vm7 = vweird.f32 %v4281_v13  ;;  %v1829_v24 = vand.u32 2147483648, %v4281_v13  ;;  %v4924_v58 = vld [vmem:[%s4468_s12 + $0xb0] sm:$0xff] }
 0x16e   : > { %v4569_v42 = vpop.eup %3012  ;;  %v1611_v6 = vmul.f32 %v4461_v55, %v1610_v43  ;;  %v1820_v36 = vsub.f32 1.0, %v1819_v45  ;;  %vm1824_vm8 = vweird.f32 %v4371_v32  ;;  %v1827_v16 = vand.u32 2147483647, %v4281_v13  ;;  %v4627_v43 = vpop.permute.xlu0 %2020  ;;  %v1923_v45 = vld [vmem:[%s4468_s12 + $0xf0] sm:$0xff]  ;;  %5917 = vst [vmem:[#allocation58_spill] sm:$0xff] %v4924_v58  ;;  %v4945_v58 = vld [vmem:[%s4468_s12 + $0x1a8] sm:$0xff] }
 0x16f   : > { %v4575_v40 = vpop.eup %3014  ;;  %vm4585_vm10 = vcmp.eq.f32.partialorder %v1617_v50, 8.507059e+37  ;;  %v1620_v7 = vor.u32 1.1754944e-38, %v1619_v60  ;;  %v1830_v37 = vor.u32 1.1754944e-38, %v1829_v24  ;;  %v1174_v15 = vmul.f32 %v4294_v30, %v4208_v5  ;;  %vm4599_vm13 = vmor %vm1823_vm7, %vm1824_vm8  ;;  %5924 = vst [vmem:[#allocation65_spill] sm:$0xff] %v4945_v58  ;;  %v4966_v58 = vld [vmem:[%s4468_s12 + $0xa0] sm:$0xff] }
 0x170   : > { %v1612_v22 = vadd.f32 %v4461_v55, %v1611_v6  ;;  %v1821_v59 = vmul.f32 %v4371_v32, %v1820_v36  ;;  %vm1178_vm11 = vweird.f32 %v4208_v5  ;;  %vm1179_vm12 = vweird.f32 %v4294_v30  ;;  %v1925_v6 = vld [vmem:[%s4468_s12 + $0x100] sm:$0xff]  ;;  %5931 = vst [vmem:[#allocation72_spill] sm:$0xff] %v4966_v58  ;;  %v4987_v58 = vld [vmem:[%s4468_s12 + $0x198] sm:$0xff] }
 0x171   : > { %v3017_v17 = vpop.eup %3016  ;;  %v1175_v52 = vsub.f32 1.0, %v1174_v15  ;;  %v1182_v28 = vand.u32 2147483647, %v4208_v5  ;;  %v1184_v3 = vand.u32 2147483648, %v4208_v5  ;;  %v706_v25 = vadd.f32 %v705_v23, %v359_v27  ;;  %vm4640_vm15 = vmor %vm1178_vm11, %vm1179_vm12  ;;  %5938 = vst [vmem:[#allocation79_spill] sm:$0xff] %v4987_v58  ;;  %v5008_v58 = vld [vmem:[%s4468_s12 + $0x360] sm:$0xff] }
 0x172   : > { %3020 = vrcp.f32 %v4542_v21  ;;  %v1616_v11 = vsel %vm4581_vm9, %v4461_v55, %v1612_v22  ;;  %v1822_v13 = vadd.f32 %v4371_v32, %v1821_v59  ;;  %vm4611_vm14 = vcmp.eq.f32.partialorder %v1827_v16, 8.507059e+37  ;;  %5945 = vst [vmem:[#allocation86_spill] sm:$0xff] %v5008_v58  ;;  %v5035_v58 = vld [vmem:[%s4468_s12 + $0x2c8] sm:$0xff] }
 0x173   : > { %v3019_v12 = vpop.eup %3018  ;;  %3022 = vrcp.f32 %v4544_v18  ;;  %v4621_v10 = vmul.f32 %v4338_v62, %v1893_v0  ;;  %v1621_v55 = vsel %vm4585_vm10, %v1620_v7, %v1616_v11  ;;  %v1176_v39 = vmul.f32 %v4294_v30, %v1175_v52  ;;  %v4769_v62 = vld [vmem:[%s4468_s12 + $0x1e8] sm:$0xff]  ;;  %5954 = vst [vmem:[#allocation95_spill] sm:$0xff] %v5035_v58  ;;  %v5062_v58 = vld [vmem:[%s4468_s12 + $0x2a0] sm:$0xff] }
 0x174   : > { %3024 = vrcp.f32 %v4565_v47  ;;  %v4631_v50 = vmul.f32 %v4396_v35, %v1987_v8  ;;  %2220 = vperm.xlu2 %2797, %v1621_v55   ;;  %v1826_v60 = vsel %vm4599_vm13, %v4371_v32, %v1822_v13  ;;  %v1185_v24 = vor.u32 1.1754944e-38, %v1184_v3  ;;  %v374_v13 = vld [vmem:[%s3224_s8 + $0x1d8] sm:$0xff]  ;;  %5875 = vst [vmem:[#allocation18_spill] sm:$0xff] %v4769_v62  ;;  %v4786_v62 = vld [vmem:[%s4468_s12 + $0x2e8] sm:$0xff] }
 0x175   : > { %v1831_v36 = vsel %vm4611_vm14, %v1830_v37, %v1826_v60  ;;  %v1177_v16 = vadd.f32 %v4294_v30, %v1176_v39  ;;  %vm1183_vm0 = vcmp.eq.f32.partialorder %v1182_v28, 8.507059e+37  ;;  %v2751_v27 = vmul.f32 -1.442695, %v706_v25  ;;  %v1901_v28 = vld [vmem:[%s4468_s12 + $0x40] sm:$0xff]  ;;  %v4698_v39 = vpop.permute.xlu2 %2190  ;;  %v4700_v60 = vpop.permute.xlu1 %2030  ;;  %5878 = vst [vmem:[#allocation19_spill] sm:$0xff] %v4786_v62  ;;  %v4789_v35 = vld [vmem:[%s4468_s12 + $0x58] sm:$0xff] }
 0x176   : > { %v4648_v23 = vadd.f32 1.0, %v3017_v17  ;;  %v4650_v32 = vadd.f32 1.0, %v3019_v12  ;;  %v4653_v34 = vmul.f32 %v4398_v48, %v1925_v6  ;;  %2290 = vperm.xlu1 %2796, %v1831_v36   ;;  %v1834_v5 = vmul.f32 %v4575_v40, %v4451_v44  ;;  %5879 = vst [vmem:[#allocation20_spill] sm:$0xff] %v4789_v35  ;;  %v4807_v62 = vld [vmem:[%s4468_s12 + $0x28] sm:$0xff]  ;;  %v4828_v48 = vld [vmem:[%s4468_s12 + $0x120] sm:$0xff] }
 0x177   : > { %v1181_v9 = vsel %vm4640_vm15, %v4294_v30, %v1177_v16  ;;  %vm1838_vm1 = vweird.f32 %v4451_v44  ;;  %vm1839_vm2 = vweird.f32 %v4575_v40  ;;  %v1844_v7 = vand.u32 2147483648, %v4451_v44  ;;  %v4760_v16 = vld [vmem:[%s4468_s12 + $0x1f8] sm:$0xff]  ;;  %5882 = vst [vmem:[#allocation23_spill] sm:$0xff] %v4807_v62  ;;  %v4837_v35 = vld [vmem:[%s4468_s12 + $0x328] sm:$0xff] }
 0x178   : > { %v4663_v37 = vpop.eup %3020  ;;  %v1186_v15 = vsel %vm1183_vm0, %v1185_v24, %v1181_v9  ;;  %v1835_v22 = vsub.f32 1.0, %v1834_v5  ;;  %v1842_v59 = vand.u32 2147483647, %v4451_v44  ;;  %v1189_v17 = vmul.f32 %v4378_v57, %v4286_v53  ;;  %vm4690_vm5 = vmor %vm1838_vm1, %vm1839_vm2  ;;  %5873 = vst [vmem:[#allocation16_spill] sm:$0xff] %v4760_v16  ;;  %v4766_v9 = vld [vmem:[%s4468_s12 + $0x1e0] sm:$0xff]  ;;  %v4813_v16 = vld [vmem:[%s4468_s12 + $0x18] sm:$0xff] }
 0x179   : > { %v4668_v19 = vpop.eup %3022  ;;  %2075 = vperm.xlu0 %2795, %v1186_v15   ;;  %3026 = vpow2.f32 %v2751_v27  ;;  %vm1193_vm3 = vweird.f32 %v4286_v53  ;;  %vm1194_vm4 = vweird.f32 %v4378_v57  ;;  %v1197_v30 = vand.u32 2147483647, %v4286_v53  ;;  %v4721_v27 = vld [vmem:[%s4468_s12 + $0x1f0] sm:$0xff]  ;;  %5883 = vst [vmem:[#allocation24_spill] sm:$0xff] %v4813_v16  ;;  %v4834_v16 = vld [vmem:[%s4468_s12 + $0x320] sm:$0xff]  ;;  %v4855_v62 = vld [vmem:[%s4468_s12 + $0x88] sm:$0xff] }
 0x17a   : > { %v4673_v52 = vpop.eup %3024  ;;  %v1836_v3 = vmul.f32 %v4575_v40, %v1835_v22  ;;  %v1190_v25 = vsub.f32 1.0, %v1189_v17  ;;  %v1199_v0 = vand.u32 2147483648, %v4286_v53  ;;  %v4680_v11 = vmul.f32 %v4449_v26, %v4354_v38  ;;  %vm4715_vm9 = vmor %vm1193_vm3, %vm1194_vm4  ;;  %v4734_v22 = vld [vmem:[%s4468_s12 + $0x50] sm:$0xff]  ;;  %v4739_v17 = vld [vmem:[%s4468_s12 + $0x118] sm:$0xff]  ;;  %5887 = vst [vmem:[#allocation28_spill] sm:$0xff] %v4834_v16 }
 0x17b   : > { %v4684_v12 = vmul.f32 %v4459_v4, %v1901_v28  ;;  %v4694_v55 = vor.u32 1.1754944e-38, %v1844_v7  ;;  %vm1403_vm6 = vweird.f32 %v4354_v38  ;;  %vm1404_vm7 = vweird.f32 %v4449_v26  ;;  %5867 = vst [vmem:[#allocation10_spill] sm:$0xff] %v4739_v17  ;;  %v4742_v28 = vld [vmem:[%s4468_s12 + $0x208] sm:$0xff]  ;;  %v4825_v17 = vld [vmem:[%s4468_s12 + $0x38] sm:$0xff] }
 0x17c   : > { %v4704_v44 = vadd.f32 %v4575_v40, %v1836_v3  ;;  %vm4706_vm8 = vcmp.eq.f32.partialorder %v1842_v59, 8.507059e+37  ;;  %v1191_v6 = vmul.f32 %v4378_v57, %v1190_v25  ;;  %v4723_v5 = vor.u32 1.1754944e-38, %v1199_v0  ;;  %vm4726_vm10 = vmor %vm1403_vm6, %vm1404_vm7  ;;  %v4736_v59 = vpop.permute.xlu0 %2105  ;;  %5868 = vst [vmem:[#allocation11_spill] sm:$0xff] %v4742_v28  ;;  %v4745_v3 = vld [vmem:[%s4468_s12 + $0x8] sm:$0xff]  ;;  %v4748_v25 = vld [vmem:[%s4468_s12 + $0x2f8] sm:$0xff] }
 0x17d   : > { %v4731_v15 = vadd.f32 %v750_v1, %v374_v13  ;;  %5866 = vst [vmem:[#allocation9_spill] sm:$0xff] %v4736_v59  ;;  %v4751_v0 = vld [vmem:[%s4468_s12 + $0x108] sm:$0xff]  ;;  %v4754_v13 = vld [vmem:[%s4468_s12 + $0xf8] sm:$0xff]  ;;  %v4757_v1 = vmul.f32 %v4404_v49, %v1923_v45  ;;  %vm4778_vm11 = vcmp.eq.f32.partialorder %v1197_v30, 8.507059e+37  ;;  %v4798_v30 = vld [vmem:[%s4468_s12 + $0x140] sm:$0xff]  ;;  %3028 = vrcp.f32 %v4648_v23 }
 0x17e   : > { %5869 = vst [vmem:[#allocation12_spill] sm:$0xff] %v4745_v3  ;;  %v4763_v53 = vld [vmem:[%s4468_s12 + $0x48] sm:$0xff]  ;;  %v4776_v45 = vadd.f32 %v4378_v57, %v1191_v6  ;;  %v4783_v3 = vld [vmem:[%s4468_s12 + $0x2e0] sm:$0xff]  ;;  %v4795_v6 = vld [vmem:[%s4468_s12 + $0x2d8] sm:$0xff]  ;;  %v5967_v8 = vand.u32 2147483648, %v4354_v38  ;;  %3030 = vrcp.f32 %v4650_v32  ;;  %v1204_v49 = vmul.f32 %v4673_v52, %v4565_v47 }
 0x17f   : > { %5870 = vst [vmem:[#allocation13_spill] sm:$0xff] %v4748_v25  ;;  %v4801_v25 = vld [vmem:[%s4468_s12 + $0x148] sm:$0xff]  ;;  %v4810_v28 = vld [vmem:[%s4468_s12 + $0x10] sm:$0xff]  ;;  %v4843_v4 = vld [vmem:[%s4468_s12 + $0x138] sm:$0xff]  ;;  %v5968_v36 = vand.u32 2147483647, %v4354_v38  ;;  %vm1208_vm13 = vweird.f32 %v4565_v47  ;;  %vm1209_vm14 = vweird.f32 %v4673_v52  ;;  %vm1418_vm15 = vweird.f32 %v4436_v20 }
 0x180   : > { %5871 = vst [vmem:[#allocation14_spill] sm:$0xff] %v4751_v0  ;;  %v4831_v0 = vld [vmem:[%s4468_s12 + $0x128] sm:$0xff]  ;;  %v5023_v16 = vld [vmem:[%s4468_s12 + $0x378] sm:$0xff]  ;;  %v5032_v59 = vld [vmem:[%s4468_s12 + $0x2c0] sm:$0xff]  ;;  %v1212_v38 = vand.u32 2147483647, %v4565_v47  ;;  %vm1419_vm0 = vweird.f32 %v4563_v51  ;;  %vm1628_vm3 = vweird.f32 %v4441_v33  ;;  %vm1629_vm4 = vweird.f32 %v4569_v42 }
 0x181   : > { %5872 = vst [vmem:[#allocation15_spill] sm:$0xff] %v4754_v13  ;;  %v4792_v13 = vld [vmem:[%s4468_s12 + $0x2d0] sm:$0xff]  ;;  %v5107_v24 = vld [vmem:[%s4468_s12 + $0x398] sm:$0xff]  ;;  %vm1408_vm12 = vcmp.eq.f32.partialorder %v5968_v36, 8.507059e+37  ;;  %vm5170_vm2 = vmor %vm1208_vm13, %vm1209_vm14  ;;  %vm1644_vm13 = vweird.f32 %v4663_v37 }
 0x182   : > { %5874 = vst [vmem:[#allocation17_spill] sm:$0xff] %v4763_v53  ;;  %v4846_v53 = vld [vmem:[%s4468_s12 + $0x210] sm:$0xff]  ;;  %vm5155_vm1 = vcmp.eq.f32.partialorder %v1212_v38, 8.507059e+37  ;;  %v1632_v38 = vand.u32 2147483647, %v4441_v33  ;;  %vm5221_vm7 = vmor %vm1628_vm3, %vm1629_vm4 }
 0x183   : > { %5880 = vst [vmem:[#allocation21_spill] sm:$0xff] %v4795_v6  ;;  %v4816_v6 = vld [vmem:[%s4468_s12 + $0x230] sm:$0xff] }
 0x184   : > { %5881 = vst [vmem:[#allocation22_spill] sm:$0xff] %v4801_v25  ;;  %v4822_v25 = vld [vmem:[%s4468_s12 + $0x30] sm:$0xff] }
 0x185   : > { %5885 = vst [vmem:[#allocation26_spill] sm:$0xff] %v4825_v17  ;;  %v4849_v17 = vld [vmem:[%s4468_s12 + $0x218] sm:$0xff] }
 0x186   : > { %5886 = vst [vmem:[#allocation27_spill] sm:$0xff] %v4831_v0  ;;  %v4852_v0 = vld [vmem:[%s4468_s12 + $0x80] sm:$0xff] }
 0x187   : > { %5888 = vst [vmem:[#allocation29_spill] sm:$0xff] %v4837_v35  ;;  %v4858_v35 = vld [vmem:[%s4468_s12 + $0x220] sm:$0xff] }
 0x188   : > { %5890 = vst [vmem:[#allocation31_spill] sm:$0xff] %v4843_v4  ;;  %v4864_v4 = vld [vmem:[%s4468_s12 + $0x300] sm:$0xff] }
 0x189   : > { %5891 = vst [vmem:[#allocation32_spill] sm:$0xff] %v4846_v53  ;;  %v4867_v53 = vld [vmem:[%s4468_s12 + $0x308] sm:$0xff] }
 0x18a   : > { %5892 = vst [vmem:[#allocation33_spill] sm:$0xff] %v4849_v17  ;;  %v4870_v17 = vld [vmem:[%s4468_s12 + $0x170] sm:$0xff] }
 0x18b   : > { %5893 = vst [vmem:[#allocation34_spill] sm:$0xff] %v4852_v0  ;;  %v4873_v0 = vld [vmem:[%s4468_s12 + $0x178] sm:$0xff] }
 0x18c   : > { %5894 = vst [vmem:[#allocation35_spill] sm:$0xff] %v4855_v62  ;;  %v4876_v62 = vld [vmem:[%s4468_s12 + $0x310] sm:$0xff] }
 0x18d   : > { %5895 = vst [vmem:[#allocation36_spill] sm:$0xff] %v4858_v35  ;;  %v4879_v35 = vld [vmem:[%s4468_s12 + $0x318] sm:$0xff] }
 0x18e   : > { %5897 = vst [vmem:[#allocation38_spill] sm:$0xff] %v4864_v4  ;;  %v4885_v4 = vld [vmem:[%s4468_s12 + $0x68] sm:$0xff] }
 0x18f   : > { %5898 = vst [vmem:[#allocation39_spill] sm:$0xff] %v4867_v53  ;;  %v4888_v53 = vld [vmem:[%s4468_s12 + $0x260] sm:$0xff] }
 0x190   : > { %5899 = vst [vmem:[#allocation40_spill] sm:$0xff] %v4870_v17  ;;  %v4891_v17 = vld [vmem:[%s4468_s12 + $0x268] sm:$0xff] }
 0x191   : > { %5900 = vst [vmem:[#allocation41_spill] sm:$0xff] %v4873_v0  ;;  %v4894_v0 = vld [vmem:[%s4468_s12 + $0x70] sm:$0xff] }
 0x192   : > { %5901 = vst [vmem:[#allocation42_spill] sm:$0xff] %v4876_v62  ;;  %v4897_v62 = vld [vmem:[%s4468_s12 + $0x78] sm:$0xff] }
 0x193   : > { %5902 = vst [vmem:[#allocation43_spill] sm:$0xff] %v4879_v35  ;;  %v4900_v35 = vld [vmem:[%s4468_s12 + $0x150] sm:$0xff] }
 0x194   : > { %5904 = vst [vmem:[#allocation45_spill] sm:$0xff] %v4885_v4  ;;  %v4906_v4 = vld [vmem:[%s4468_s12 + $0x350] sm:$0xff] }
 0x195   : > { %5905 = vst [vmem:[#allocation46_spill] sm:$0xff] %v4888_v53  ;;  %v4909_v53 = vld [vmem:[%s4468_s12 + $0x358] sm:$0xff] }
 0x196   : > { %5906 = vst [vmem:[#allocation47_spill] sm:$0xff] %v4891_v17  ;;  %v4912_v17 = vld [vmem:[%s4468_s12 + $0x160] sm:$0xff] }
 0x197   : > { %5907 = vst [vmem:[#allocation48_spill] sm:$0xff] %v4894_v0  ;;  %v4915_v0 = vld [vmem:[%s4468_s12 + $0x168] sm:$0xff] }
 0x198   : > { %5908 = vst [vmem:[#allocation49_spill] sm:$0xff] %v4897_v62  ;;  %v4918_v62 = vld [vmem:[%s4468_s12 + $0x240] sm:$0xff] }
 0x199   : > { %5909 = vst [vmem:[#allocation50_spill] sm:$0xff] %v4900_v35  ;;  %v4921_v35 = vld [vmem:[%s4468_s12 + $0x248] sm:$0xff] }
 0x19a   : > { %5911 = vst [vmem:[#allocation52_spill] sm:$0xff] %v4906_v4  ;;  %v4927_v4 = vld [vmem:[%s4468_s12 + $0xb8] sm:$0xff] }
 0x19b   : > { %5912 = vst [vmem:[#allocation53_spill] sm:$0xff] %v4909_v53  ;;  %v4930_v53 = vld [vmem:[%s4468_s12 + $0x250] sm:$0xff] }
 0x19c   : > { %5913 = vst [vmem:[#allocation54_spill] sm:$0xff] %v4912_v17  ;;  %v4933_v17 = vld [vmem:[%s4468_s12 + $0x258] sm:$0xff] }
 0x19d   : > { %5914 = vst [vmem:[#allocation55_spill] sm:$0xff] %v4915_v0  ;;  %v4936_v0 = vld [vmem:[%s4468_s12 + $0x330] sm:$0xff] }
 0x19e   : > { %5915 = vst [vmem:[#allocation56_spill] sm:$0xff] %v4918_v62  ;;  %v4939_v62 = vld [vmem:[%s4468_s12 + $0x338] sm:$0xff] }
 0x19f   : > { %5916 = vst [vmem:[#allocation57_spill] sm:$0xff] %v4921_v35  ;;  %v4942_v35 = vld [vmem:[%s4468_s12 + $0x1a0] sm:$0xff] }
 0x1a0   : > { %5918 = vst [vmem:[#allocation59_spill] sm:$0xff] %v4927_v4  ;;  %v4948_v4 = vld [vmem:[%s4468_s12 + $0x340] sm:$0xff] }
 0x1a1   : > { %5919 = vst [vmem:[#allocation60_spill] sm:$0xff] %v4930_v53  ;;  %v4951_v53 = vld [vmem:[%s4468_s12 + $0x348] sm:$0xff] }
 0x1a2   : > { %5920 = vst [vmem:[#allocation61_spill] sm:$0xff] %v4933_v17  ;;  %v4954_v17 = vld [vmem:[%s4468_s12 + $0x90] sm:$0xff] }
 0x1a3   : > { %5921 = vst [vmem:[#allocation62_spill] sm:$0xff] %v4936_v0  ;;  %v4957_v0 = vld [vmem:[%s4468_s12 + $0x98] sm:$0xff] }
 0x1a4   : > { %5922 = vst [vmem:[#allocation63_spill] sm:$0xff] %v4939_v62  ;;  %v4960_v62 = vld [vmem:[%s4468_s12 + $0x290] sm:$0xff] }
 0x1a5   : > { %5923 = vst [vmem:[#allocation64_spill] sm:$0xff] %v4942_v35  ;;  %v4963_v35 = vld [vmem:[%s4468_s12 + $0x298] sm:$0xff] }
 0x1a6   : > { %5925 = vst [vmem:[#allocation66_spill] sm:$0xff] %v4948_v4  ;;  %v4969_v4 = vld [vmem:[%s4468_s12 + $0xa8] sm:$0xff] }
 0x1a7   : > { %5926 = vst [vmem:[#allocation67_spill] sm:$0xff] %v4951_v53  ;;  %v4972_v53 = vld [vmem:[%s4468_s12 + $0x180] sm:$0xff] }
 0x1a8   : > { %5927 = vst [vmem:[#allocation68_spill] sm:$0xff] %v4954_v17  ;;  %v4975_v17 = vld [vmem:[%s4468_s12 + $0x188] sm:$0xff] }
 0x1a9   : > { %5928 = vst [vmem:[#allocation69_spill] sm:$0xff] %v4957_v0  ;;  %v4978_v0 = vld [vmem:[%s4468_s12 + $0x380] sm:$0xff] }
 0x1aa   : > { %5929 = vst [vmem:[#allocation70_spill] sm:$0xff] %v4960_v62  ;;  %v4981_v62 = vld [vmem:[%s4468_s12 + $0x388] sm:$0xff] }
 0x1ab   : > { %5930 = vst [vmem:[#allocation71_spill] sm:$0xff] %v4963_v35  ;;  %v4984_v35 = vld [vmem:[%s4468_s12 + $0x190] sm:$0xff] }
 0x1ac   : > { %5932 = vst [vmem:[#allocation73_spill] sm:$0xff] %v4969_v4  ;;  %v4990_v4 = vld [vmem:[%s4468_s12 + $0x270] sm:$0xff] }
 0x1ad   : > { %5933 = vst [vmem:[#allocation74_spill] sm:$0xff] %v4972_v53  ;;  %v4993_v53 = vld [vmem:[%s4468_s12 + $0x278] sm:$0xff] }
 0x1ae   : > { %5934 = vst [vmem:[#allocation75_spill] sm:$0xff] %v4975_v17  ;;  %v4996_v17 = vld [vmem:[%s4468_s12 + $0xe0] sm:$0xff] }
 0x1af   : > { %5935 = vst [vmem:[#allocation76_spill] sm:$0xff] %v4978_v0  ;;  %v4999_v0 = vld [vmem:[%s4468_s12 + $0xe8] sm:$0xff] }
 0x1b0   : > { %5936 = vst [vmem:[#allocation77_spill] sm:$0xff] %v4981_v62  ;;  %v5002_v62 = vld [vmem:[%s4468_s12 + $0x280] sm:$0xff] }
 0x1b1   : > { %5937 = vst [vmem:[#allocation78_spill] sm:$0xff] %v4984_v35  ;;  %v5005_v35 = vld [vmem:[%s4468_s12 + $0x288] sm:$0xff] }
 0x1b2   : > { %5939 = vst [vmem:[#allocation80_spill] sm:$0xff] %v4990_v4  ;;  %v5011_v4 = vld [vmem:[%s4468_s12 + $0x368] sm:$0xff] }
 0x1b3   : > { %5940 = vst [vmem:[#allocation81_spill] sm:$0xff] %v4993_v53  ;;  %v5014_v53 = vld [vmem:[%s4468_s12 + $0x1d0] sm:$0xff] }
 0x1b4   : > { %5941 = vst [vmem:[#allocation82_spill] sm:$0xff] %v4996_v17  ;;  %v5017_v17 = vld [vmem:[%s4468_s12 + $0x1d8] sm:$0xff] }
 0x1b5   : > { %5942 = vst [vmem:[#allocation83_spill] sm:$0xff] %v4999_v0  ;;  %v5020_v0 = vld [vmem:[%s4468_s12 + $0x370] sm:$0xff] }
 0x1b6   : > { %5943 = vst [vmem:[#allocation84_spill] sm:$0xff] %v5002_v62  ;;  %v5026_v62 = vld [vmem:[%s4468_s12 + $0xc0] sm:$0xff] }
 0x1b7   : > { %5944 = vst [vmem:[#allocation85_spill] sm:$0xff] %v5005_v35  ;;  %v5029_v35 = vld [vmem:[%s4468_s12 + $0xc8] sm:$0xff] }
 0x1b8   : > { %5946 = vst [vmem:[#allocation87_spill] sm:$0xff] %v5011_v4  ;;  %v5038_v4 = vld [vmem:[%s4468_s12 + $0xd0] sm:$0xff] }
 0x1b9   : > { %5947 = vst [vmem:[#allocation88_spill] sm:$0xff] %v5014_v53  ;;  %v5041_v53 = vld [vmem:[%s4468_s12 + $0xd8] sm:$0xff] }
 0x1ba   : > { %5948 = vst [vmem:[#allocation89_spill] sm:$0xff] %v5017_v17  ;;  %v5044_v17 = vld [vmem:[%s4468_s12 + $0x1b0] sm:$0xff] }
 0x1bb   : > { %5949 = vst [vmem:[#allocation90_spill] sm:$0xff] %v5020_v0  ;;  %v5047_v0 = vld [vmem:[%s4468_s12 + $0x1b8] sm:$0xff] }
 0x1bc   : > { %5950 = vst [vmem:[#allocation91_spill] sm:$0xff] %v5023_v16  ;;  %v5050_v16 = vld [vmem:[%s4468_s12 + $0x3b0] sm:$0xff] }
 0x1bd   : > { %5951 = vst [vmem:[#allocation92_spill] sm:$0xff] %v5026_v62  ;;  %v5053_v62 = vld [vmem:[%s4468_s12 + $0x3b8] sm:$0xff] }
 0x1be   : > { %5952 = vst [vmem:[#allocation93_spill] sm:$0xff] %v5029_v35  ;;  %v5056_v35 = vld [vmem:[%s4468_s12 + $0x1c0] sm:$0xff] }
 0x1bf   : > { %5953 = vst [vmem:[#allocation94_spill] sm:$0xff] %v5032_v59  ;;  %v5059_v59 = vld [vmem:[%s4468_s12 + $0x1c8] sm:$0xff] }
 0x1c0   : > { %5955 = vst [vmem:[#allocation96_spill] sm:$0xff] %v5038_v4  ;;  %v5065_v4 = vld [vmem:[%s4468_s12 + $0x2a8] sm:$0xff] }
 0x1c1   : > { %5956 = vst [vmem:[#allocation97_spill] sm:$0xff] %v5041_v53  ;;  %v3027_v53 = vpop.eup %3026 }
 0x1c2   : > { %5957 = vst [vmem:[#allocation98_spill] sm:$0xff] %v5044_v17  ;;  %v5087_v17 = vld [vmem:[%s4468_s12 + $0x390] sm:$0xff] }
 0x1c3   : > { %5958 = vst [vmem:[#allocation99_spill] sm:$0xff] %v5047_v0  ;;  %v5084_v0 = vld [vmem:[%s4468_s12 + $0x2b8] sm:$0xff] }
 0x1c4   : > { %5959 = vst [vmem:[#allocation100_spill] sm:$0xff] %v5050_v16  ;;  %v5965_v16 = vsel %vm4690_vm5, %v4575_v40, %v4704_v44  ;;  %v2375_v40 = vmul.f32 %v4457_v46, %v4721_v27  ;;  %v2323_v44 = vmul.f32 %v4553_v63, %v4734_v22  ;;  %v5124_v27 = vadd.f32 1.0, %v3027_v53  ;;  %v5140_v53 = vpop.permute.xlu1 %2110  ;;  %vm5185_vm5 = vmor %vm1418_vm15, %vm1419_vm0 }
 0x1c5   : > { %5960 = vst [vmem:[#allocation101_spill] sm:$0xff] %v5053_v62  ;;  %v1846_v62 = vsel %vm4706_vm8, %v4694_v55, %v5965_v16  ;;  %v1410_v55 = vor.u32 1.1754944e-38, %v5967_v8  ;;  %v5110_v16 = vld [vmem:[%s4468_s12 + $0x3a0] sm:$0xff]  ;;  %v2405_v22 = vmul.f32 %v4551_v61, %v4783_v3  ;;  %v1205_v3 = vsub.f32 1.0, %v1204_v49 }
 0x1c6   : > { %5961 = vst [vmem:[#allocation102_spill] sm:$0xff] %v5056_v35  ;;  %v5081_v35 = vld [vmem:[%s4468_s12 + $0x2b0] sm:$0xff]  ;;  %2295 = vperm.xlu2 %2797, %v1846_v62   ;;  %v1624_v8 = vmul.f32 %v4569_v42, %v4441_v33  ;;  %vm1633_vm8 = vcmp.eq.f32.partialorder %v1632_v38, 8.507059e+37  ;;  %v1849_v38 = vmul.f32 %v4668_v19, %v4544_v18  ;;  %vm1853_vm15 = vweird.f32 %v4544_v18 }
 0x1c7   : > { %5962 = vst [vmem:[#allocation103_spill] sm:$0xff] %v5059_v59  ;;  %v5966_v59 = vsub.f32 1.0, %v4680_v11  ;;  %v1196_v11 = vsel %vm4715_vm9, %v4378_v57, %v4776_v45  ;;  %v1206_v45 = vmul.f32 %v4673_v52, %v1205_v3  ;;  %vm1433_vm9 = vweird.f32 %v4650_v32 }
 0x1c8   : > { %5963 = vst [vmem:[#allocation104_spill] sm:$0xff] %v5062_v58  ;;  %v1201_v62 = vsel %vm4778_vm11, %v4723_v5, %v1196_v11  ;;  %v1414_v5 = vmul.f32 %v4563_v51, %v4436_v20  ;;  %vm1643_vm11 = vweird.f32 %v4542_v21  ;;  %vm1854_vm0 = vweird.f32 %v4668_v19 }
 0x1c9   : > { %5964 = vst [vmem:[#allocation105_spill] sm:$0xff] %v5065_v4  ;;  %v1401_v58 = vmul.f32 %v4449_v26, %v5966_v59  ;;  %v2766_v4 = vmul.f32 -1.442695, %v4731_v15  ;;  %v5113_v15 = vld [vmem:[%s4468_s12 + $0x3a8] sm:$0xff]  ;;  %2080 = vperm.xlu1 %2796, %v1201_v62   ;;  %v1207_v36 = vadd.f32 %v4673_v52, %v1206_v45  ;;  %vm5311_vm3 = vmor %vm1853_vm15, %vm1854_vm0 }
 0x1ca   : > { %2442 = vst [vmem:[%s5094_s16 + $0x40] sm:$0xff] %v4684_v12  ;;  %v1214_v12 = vand.u32 2147483648, %v4565_v47  ;;  %v1415_v7 = vsub.f32 1.0, %v1414_v5  ;;  %v1634_v5 = vand.u32 2147483648, %v4441_v33  ;;  %v2315_v33 = vmul.f32 %v4627_v43, %v4810_v28 }
 0x1cb   : > { %v1402_v57 = vadd.f32 %v4449_v26, %v1401_v58  ;;  %3032 = vpow2.f32 %v2766_v4  ;;  %2444 = vst [vmem:[%s5094_s16 + $0x50] sm:$0xff] %v2323_v44  ;;  %v5138_v4 = vpop.permute.xlu2 %2265  ;;  %v1211_v3 = vsel %vm5170_vm2, %v4673_v52, %v1207_v36  ;;  %v1437_v28 = vand.u32 2147483647, %v4650_v32 }
 0x1cc   : > { %2466 = vst [vmem:[%s5094_s16 + $0x100] sm:$0xff] %v4653_v34  ;;  %v1422_v34 = vand.u32 2147483647, %v4436_v20  ;;  %v1215_v44 = vor.u32 1.1754944e-38, %v1214_v12  ;;  %v1416_v62 = vmul.f32 %v4563_v51, %v1415_v7  ;;  %v1635_v52 = vor.u32 1.1754944e-38, %v1634_v5  ;;  %v6003_v12 = vld [vmem:[#allocation23_spill] sm:$0xff] }
 0x1cd   : > { %v1406_v58 = vsel %vm4726_vm10, %v4449_v26, %v1402_v57  ;;  %2468 = vst [vmem:[%s5094_s16 + $0x110] sm:$0xff] %v4520_v14  ;;  %v5148_v26 = vpop.eup %3028  ;;  %v1424_v14 = vand.u32 2147483648, %v4436_v20  ;;  %v5177_v57 = vpop.permute.xlu0 %2180  ;;  %v2353_v20 = vmul.f32 %v4615_v2, %v4798_v30  ;;  %3034 = vrcp.f32 %v5124_v27 }
 0x1ce   : > { %v1411_v59 = vsel %vm1408_vm12, %v1410_v55, %v1406_v58  ;;  %2496 = vst [vmem:[%s5094_s16 + $0x1f0] sm:$0xff] %v2375_v40  ;;  %v5164_v55 = vpop.eup %3030  ;;  %v1625_v58 = vsub.f32 1.0, %v1624_v8  ;;  %vm5193_vm6 = vcmp.eq.f32.partialorder %v1422_v34, 8.507059e+37  ;;  %v1216_v34 = vsel %vm5155_vm1, %v1215_v44, %v1211_v3  ;;  %vm5285_vm1 = vmor %vm1643_vm11, %vm1644_vm13 }
 0x1cf   : > { %2150 = vperm.xlu0 %2795, %v1411_v59   ;;  %2498 = vst [vmem:[%s5094_s16 + $0x200] sm:$0xff] %v4538_v31  ;;  %v1425_v49 = vor.u32 1.1754944e-38, %v1424_v14  ;;  %v2373_v59 = vmul.f32 %v4474_v56, %v4766_v9  ;;  %2085 = vperm.xlu2 %2797, %v1216_v34   ;;  %v1439_v8 = vand.u32 2147483648, %v4650_v32  ;;  %v1639_v40 = vmul.f32 %v4663_v37, %v4542_v21 }
 0x1d0   : > { %2526 = vst [vmem:[%s5094_s16 + $0x2e0] sm:$0xff] %v2405_v22  ;;  %v1417_v22 = vadd.f32 %v4563_v51, %v1416_v62  ;;  %v1626_v7 = vmul.f32 %v4569_v42, %v1625_v58  ;;  %vm1434_vm10 = vweird.f32 %v5164_v55  ;;  %vm5255_vm12 = vcmp.eq.f32.partialorder %v1437_v28, 8.507059e+37 }
 0x1d1   : > { %v3033_v31 = vpop.eup %3032  ;;  %2528 = vst [vmem:[%s5094_s16 + $0x2f0] sm:$0xff] %v4631_v50  ;;  %v2403_v50 = vmul.f32 %v4557_v54, %v4792_v13  ;;  %v2317_v13 = vmul.f32 %v4617_v41, %v4804_v29  ;;  %v1429_v29 = vmul.f32 %v5164_v55, %v4650_v32  ;;  %v1647_v36 = vand.u32 2147483647, %v4542_v21  ;;  %vm5270_vm14 = vmor %vm1433_vm9, %vm1434_vm10  ;;  %v5991_v32 = vld [vmem:[#allocation30_spill] sm:$0xff] }
 0x1d2   : > { %2433 = vst [vmem:[%s5094_s16] sm:$0xff] %v4621_v10  ;;  %v1421_v10 = vsel %vm5185_vm5, %v4563_v51, %v1417_v22  ;;  %v1627_v30 = vadd.f32 %v4569_v42, %v1626_v7  ;;  %v5236_v45 = vadd.f32 1.0, %v3033_v31  ;;  %v1649_v58 = vand.u32 2147483648, %v4542_v21 }
 0x1d3   : > { %2464 = vst [vmem:[%s5094_s16 + $0xf0] sm:$0xff] %v4757_v1  ;;  %v5227_v1 = vpop.permute.xlu1 %2185  ;;  %v1426_v51 = vsel %vm5193_vm6, %v1425_v49, %v1421_v10  ;;  %v5241_v11 = vpop.permute.xlu2 %2055  ;;  %v1430_v62 = vsub.f32 1.0, %v1429_v29  ;;  %v1440_v49 = vor.u32 1.1754944e-38, %v1439_v8  ;;  %v1850_v7 = vsub.f32 1.0, %v1849_v38  ;;  %v5987_v29 = vld [vmem:[#allocation9_spill] sm:$0xff] }
 0x1d4   : > { %2474 = vst [vmem:[%s5094_s16 + $0x140] sm:$0xff] %v2353_v20  ;;  %2155 = vperm.xlu1 %2796, %v1426_v51   ;;  %v1631_v14 = vsel %vm5221_vm7, %v4569_v42, %v1627_v30  ;;  %v1640_v42 = vsub.f32 1.0, %v1639_v40  ;;  %v1857_v20 = vand.u32 2147483647, %v4544_v18  ;;  %v1650_v3 = vor.u32 1.1754944e-38, %v1649_v58 }
 0x1d5   : > { %2438 = vst [vmem:[%s5094_s16 + $0x20] sm:$0xff] %v2317_v13  ;;  %v1636_v44 = vsel %vm1633_vm8, %v1635_v52, %v1631_v14  ;;  %v1431_v47 = vmul.f32 %v5164_v55, %v1430_v62  ;;  %v5266_v22 = vpop.permute.xlu0 %2255  ;;  %v1859_v34 = vand.u32 2147483648, %v4544_v18  ;;  %vm1648_vm2 = vcmp.eq.f32.partialorder %v1647_v36, 8.507059e+37 }
 0x1d6   : > { %2436 = vst [vmem:[%s5094_s16 + $0x10] sm:$0xff] %v2315_v33  ;;  %v1641_v5 = vmul.f32 %v4663_v37, %v1640_v42  ;;  %v2383_v52 = vmul.f32 %v4698_v39, %v4816_v6  ;;  %3036 = vrcp.f32 %v5236_v45  ;;  %v1851_v13 = vmul.f32 %v4668_v19, %v1850_v7 }
 0x1d7   : > { %2494 = vst [vmem:[%s5094_s16 + $0x1e0] sm:$0xff] %v2373_v59  ;;  %2225 = vperm.xlu0 %2795, %v1636_v44   ;;  %v5278_v59 = vpop.eup %3034  ;;  %v2319_v51 = vmul.f32 %v4700_v60, %v4822_v25  ;;  %v2349_v25 = vmul.f32 %v5987_v29, %v4828_v48  ;;  %vm1858_vm4 = vcmp.eq.f32.partialorder %v1857_v20, 8.507059e+37  ;;  %vm1658_vm5 = vweird.f32 %v5124_v27  ;;  %v5990_v20 = vld [vmem:[#allocation28_spill] sm:$0xff] }
 0x1d8   : > { %2524 = vst [vmem:[%s5094_s16 + $0x2d0] sm:$0xff] %v2403_v50  ;;  %v1432_v50 = vadd.f32 %v5164_v55, %v1431_v47  ;;  %v1642_v9 = vadd.f32 %v4663_v37, %v1641_v5  ;;  %v1852_v28 = vadd.f32 %v4668_v19, %v1851_v13  ;;  %vm1659_vm6 = vweird.f32 %v5278_v59 }
 0x1d9   : > { %2504 = vst [vmem:[%s5094_s16 + $0x230] sm:$0xff] %v2383_v52  ;;  %v1664_v18 = vand.u32 2147483648, %v5124_v27  ;;  %v1662_v44 = vand.u32 2147483647, %v5124_v27  ;;  %v1864_v62 = vmul.f32 %v5148_v26, %v4648_v23  ;;  %vm1868_vm7 = vweird.f32 %v4648_v23  ;;  %vm5345_vm9 = vmor %vm1658_vm5, %vm1659_vm6 }
 0x1da   : > { %v1436_v21 = vsel %vm5270_vm14, %v5164_v55, %v1432_v50  ;;  %v1646_v33 = vsel %vm5285_vm1, %v4663_v37, %v1642_v9  ;;  %v1860_v55 = vor.u32 1.1754944e-38, %v1859_v34  ;;  %v1654_v37 = vmul.f32 %v5278_v59, %v5124_v27  ;;  %2440 = vst [vmem:[%s5094_s16 + $0x30] sm:$0xff] %v2319_v51 }
 0x1db   : > { %v5290_v10 = vpop.permute.xlu1 %2260  ;;  %v1441_v30 = vsel %vm5255_vm12, %v1440_v49, %v1436_v21  ;;  %v1651_v14 = vsel %vm1648_vm2, %v1650_v3, %v1646_v33  ;;  %v5321_v8 = vpop.permute.xlu2 %2130  ;;  %v1856_v48 = vsel %vm5311_vm3, %v4668_v19, %v1852_v28  ;;  %2470 = vst [vmem:[%s5094_s16 + $0x120] sm:$0xff] %v2349_v25  ;;  %vm1869_vm8 = vweird.f32 %v5148_v26  ;;  %v5996_v21 = vld [vmem:[#allocation32_spill] sm:$0xff] }
 0x1dc   : > { %2160 = vperm.xlu2 %2797, %v1441_v30   ;;  %2230 = vperm.xlu1 %2796, %v1651_v14   ;;  %v1655_v40 = vsub.f32 1.0, %v1654_v37  ;;  %v1861_v31 = vsel %vm1858_vm4, %v1860_v55, %v1856_v48  ;;  %v3037_v42 = vpop.eup %3036  ;;  %v1865_v47 = vsub.f32 1.0, %v1864_v62  ;;  %v1872_v49 = vand.u32 2147483647, %v4648_v23  ;;  %vm5363_vm12 = vmor %vm1868_vm7, %vm1869_vm8  ;;  %v5997_v14 = vld [vmem:[#allocation34_spill] sm:$0xff]  ;;  %v5998_v37 = vld [vmem:[#allocation36_spill] sm:$0xff] }
 0x1dd   : > { %v1874_v19 = vand.u32 2147483648, %v4648_v23  ;;  %v5339_v58 = vpop.permute.xlu0 %2045  ;;  %v1665_v5 = vor.u32 1.1754944e-38, %v1664_v18  ;;  %v2413_v50 = vmul.f32 %v5138_v4, %v5990_v20  ;;  %v2351_v3 = vmul.f32 %v5140_v53, %v5991_v32 }
 0x1de   : > { %v1656_v36 = vmul.f32 %v5278_v59, %v1655_v40  ;;  %vm1663_vm10 = vcmp.eq.f32.partialorder %v1662_v44, 8.507059e+37  ;;  %v1866_v34 = vmul.f32 %v5148_v26, %v1865_v47  ;;  %vm5355_vm11 = vcmp.eq.f32.partialorder %v1872_v49, 8.507059e+37  ;;  %v6002_v49 = vld [vmem:[#allocation42_spill] sm:$0xff] }
 0x1df   : > { %2300 = vperm.xlu0 %2795, %v1861_v31   ;;  %v1875_v52 = vor.u32 1.1754944e-38, %v1874_v19  ;;  %v2379_v13 = vmul.f32 %v5177_v57, %v5996_v21  ;;  %v1879_v51 = vmul.f32 %v3037_v42, %v5236_v45  ;;  %vm1883_vm13 = vweird.f32 %v5236_v45  ;;  %2472 = vst [vmem:[%s5094_s16 + $0x130] sm:$0xff] %v2351_v3  ;;  %v6001_v31 = vld [vmem:[#allocation40_spill] sm:$0xff] }
 0x1e0   : > { %v1657_v7 = vadd.f32 %v5278_v59, %v1656_v36  ;;  %v1867_v23 = vadd.f32 %v5148_v26, %v1866_v34  ;;  %vm1884_vm14 = vweird.f32 %v3037_v42  ;;  %v1887_v33 = vand.u32 2147483647, %v5236_v45  ;;  %2534 = vst [vmem:[%s5094_s16 + $0x320] sm:$0xff] %v2413_v50  ;;  %v6005_v50 = vld [vmem:[#allocation48_spill] sm:$0xff]  ;;  %v6006_v34 = vld [vmem:[#allocation26_spill] sm:$0xff] }
 0x1e1   : > { %v1880_v55 = vsub.f32 1.0, %v1879_v51  ;;  %v1889_v25 = vand.u32 2147483648, %v5236_v45  ;;  %v2329_v28 = vmul.f32 %v5241_v11, %v5997_v14  ;;  %2500 = vst [vmem:[%s5094_s16 + $0x210] sm:$0xff] %v2379_v13  ;;  %v2381_v18 = vmul.f32 %v5227_v1, %v5998_v37  ;;  %vm5395_vm15 = vmor %vm1883_vm13, %vm1884_vm14  ;;  %v6009_v51 = vld [vmem:[#allocation20_spill] sm:$0xff]  ;;  %v6014_v14 = vld [vmem:[#allocation10_spill] sm:$0xff] }
 0x1e2   : > { %v1661_v30 = vsel %vm5345_vm9, %v5278_v59, %v1657_v7  ;;  %v1871_v59 = vsel %vm5363_vm12, %v5148_v26, %v1867_v23  ;;  %v2359_v36 = vmul.f32 %v5321_v8, %v6001_v31  ;;  %vm1888_vm0 = vcmp.eq.f32.partialorder %v1887_v33, 8.507059e+37  ;;  %v6017_v37 = vld [vmem:[#allocation22_spill] sm:$0xff]  ;;  %v6019_v31 = vld [vmem:[#allocation55_spill] sm:$0xff] }
 0x1e3   : > { %v2051_v38 = vpop.permute.xlu1 %2050  ;;  %v1666_v6 = vsel %vm1663_vm10, %v1665_v5, %v1661_v30  ;;  %v5387_v48 = vpop.permute.xlu2 %2205  ;;  %v1876_v40 = vsel %vm5355_vm11, %v1875_v52, %v1871_v59  ;;  %v1881_v44 = vmul.f32 %v3037_v42, %v1880_v55  ;;  %2450 = vst [vmem:[%s5094_s16 + $0x80] sm:$0xff] %v2329_v28  ;;  %v1890_v26 = vor.u32 1.1754944e-38, %v1889_v25  ;;  %v6004_v5 = vld [vmem:[#allocation46_spill] sm:$0xff]  ;;  %v6008_v52 = vld [vmem:[#allocation8_spill] sm:$0xff]  ;;  %v6016_v59 = vld [vmem:[#allocation31_spill] sm:$0xff] }
 0x1e4   : > { %2235 = vperm.xlu2 %2797, %v1666_v6   ;;  %2305 = vperm.xlu1 %2796, %v1876_v40   ;;  %v2411_v19 = vmul.f32 %v5290_v10, %v6002_v49  ;;  %2502 = vst [vmem:[%s5094_s16 + $0x220] sm:$0xff] %v2381_v18  ;;  %v2318_v45 = vmul.f32 %v4617_v41, %v6003_v12  ;;  %v6007_v41 = vld [vmem:[#allocation17_spill] sm:$0xff]  ;;  %vm2434_vm1 = vcmask 556032   ;;  %v6012_v6 = vld [vmem:[#allocation14_spill] sm:$0xff]  ;;  %v6023_v12 = vld [vmem:[#allocation3_spill] sm:$0xff] }
 0x1e5   : > { %v1882_v47 = vadd.f32 %v3037_v42, %v1881_v44  ;;  %v2389_v20 = vmul.f32 %v5387_v48, %v6004_v5  ;;  %v2327_v32 = vmul.f32 %v2051_v38, %v6005_v50  ;;  %v5409_v3 = vpop.permute.xlu0 %2120  ;;  %2480 = vst [vmem:[%s5094_s16 + $0x170] sm:$0xff] %v2359_v36  ;;  %v2320_v9 = vmul.f32 %v4700_v60, %v6006_v34  ;;  %v6010_v60 = vld [vmem:[#allocation49_spill] sm:$0xff]  ;;  %v6013_v55 = vld [vmem:[#allocation6_spill] sm:$0xff] }
 0x1e6   : > { %2532 = vst [vmem:[%s5094_s16 + $0x310] sm:$0xff] %v2411_v19  ;;  %v2322_v21 = vmul.f32 %v6008_v52, %v6007_v41  ;;  %v2324_v30 = vmul.f32 %v4553_v63, %v6009_v51  ;;  %v2328_v23 = vmul.f32 %v2051_v38, %v6010_v60  ;;  %v2346_v25 = vmul.f32 %v6013_v55, %v6012_v6  ;;  %v6015_v28 = vld [vmem:[#allocation2_spill] sm:$0xff]  ;;  %v6022_v19 = vld [vmem:[#allocation11_spill] sm:$0xff]  ;;  %v6027_v34 = vld [vmem:[#allocation25_spill] sm:$0xff] }
 0x1e7   : > { %v1886_v27 = vsel %vm5395_vm15, %v3037_v42, %v1882_v47  ;;  %2448 = vst [vmem:[%s5094_s16 + $0x70] sm:$0xff] %v2327_v32  ;;  %v6011_v42 = vld [vmem:[#allocation35_spill] sm:$0xff]  ;;  %v2348_v38 = vmul.f32 %v6015_v28, %v6014_v14  ;;  %v2354_v18 = vmul.f32 %v4615_v2, %v6017_v37  ;;  %v6018_v40 = vld [vmem:[#allocation54_spill] sm:$0xff]  ;;  %v6021_v2 = vld [vmem:[#allocation16_spill] sm:$0xff] }
 0x1e8   : > { %v1891_v13 = vsel %vm1888_vm0, %v1890_v26, %v1886_v27  ;;  %2510 = vst [vmem:[%s5094_s16 + $0x260] sm:$0xff] %v2389_v20  ;;  %v2330_v33 = vmul.f32 %v5241_v11, %v6011_v42  ;;  %v2352_v11 = vmul.f32 %v5140_v53, %v6016_v59  ;;  %v6020_v53 = vld [vmem:[#allocation41_spill] sm:$0xff]  ;;  %v2376_v49 = vmul.f32 %v4457_v46, %v6021_v2  ;;  %v6025_v50 = vld [vmem:[#allocation58_spill] sm:$0xff]  ;;  %v6026_v46 = vld [vmem:[#allocation59_spill] sm:$0xff] }
 0x1e9   : > { %2439 = vst.msk [vmem:[%s5094_s16 + $0x28] sm:$0xff] %vm2434_vm1, %v2318_v45  ;;  %v2360_v47 = vmul.f32 %v5321_v8, %v6020_v53  ;;  %v2378_v45 = vmul.f32 %v6023_v12, %v6022_v19  ;;  %v6024_v8 = vld [vmem:[#allocation37_spill] sm:$0xff]  ;;  %v6028_v27 = vld [vmem:[#allocation60_spill] sm:$0xff]  ;;  %v6030_v51 = vld [vmem:[#allocation47_spill] sm:$0xff] }
 0x1ea   : > { %2441 = vst.msk [vmem:[%s5094_s16 + $0x38] sm:$0xff] %vm2434_vm1, %v2320_v9  ;;  %v2382_v20 = vmul.f32 %v5227_v1, %v6024_v8  ;;  %v2384_v9 = vmul.f32 %v4698_v39, %v6027_v34  ;;  %v6029_v52 = vld [vmem:[#allocation61_spill] sm:$0xff]  ;;  %v6031_v39 = vld [vmem:[#allocation19_spill] sm:$0xff]  ;;  %v6036_v14 = vld [vmem:[#allocation66_spill] sm:$0xff] }
 0x1eb   : > { %v2126_v7 = vpop.permute.xlu1 %2125  ;;  %v2281_v63 = vpop.permute.xlu2 %2280  ;;  %2443 = vst.msk [vmem:[%s5094_s16 + $0x48] sm:$0xff] %vm2434_vm1, %v2322_v21  ;;  %v2406_v60 = vmul.f32 %v4551_v61, %v6031_v39  ;;  %v6033_v42 = vld [vmem:[#allocation5_spill] sm:$0xff]  ;;  %v6034_v6 = vld [vmem:[#allocation43_spill] sm:$0xff]  ;;  %v6042_v53 = vld [vmem:[#allocation52_spill] sm:$0xff] }
 0x1ec   : > { %2310 = vperm.xlu2 %2797, %v1891_v13   ;;  %2445 = vst.msk [vmem:[%s5094_s16 + $0x58] sm:$0xff] %vm2434_vm1, %v2324_v30  ;;  %v2357_v44 = vmul.f32 %v2126_v7, %v6018_v40  ;;  %v2358_v36 = vmul.f32 %v2126_v7, %v6019_v31  ;;  %v2390_v30 = vmul.f32 %v5387_v48, %v6030_v51  ;;  %v6038_v59 = vld [vmem:[#allocation65_spill] sm:$0xff]  ;;  %v6044_v19 = vld [vmem:[#allocation12_spill] sm:$0xff]  ;;  %v6053_v51 = vld [vmem:[#allocation78_spill] sm:$0xff] }
 0x1ed   : > { %2449 = vst.msk [vmem:[%s5094_s16 + $0x78] sm:$0xff] %vm2434_vm1, %v2328_v23  ;;  %v5447_v62 = vpop.permute.xlu0 %2195  ;;  %v6032_v23 = vld [vmem:[#allocation13_spill] sm:$0xff]  ;;  %v2412_v55 = vmul.f32 %v5290_v10, %v6034_v6  ;;  %v6037_v10 = vld [vmem:[#allocation64_spill] sm:$0xff]  ;;  %v6054_v39 = vld [vmem:[#allocation79_spill] sm:$0xff] }
 0x1ee   : > { %2451 = vst.msk [vmem:[%s5094_s16 + $0x88] sm:$0xff] %vm2434_vm1, %v2330_v33  ;;  %v2408_v33 = vmul.f32 %v6033_v42, %v6032_v23  ;;  %v6041_v31 = vld [vmem:[#allocation73_spill] sm:$0xff]  ;;  %v6045_v12 = vld [vmem:[#allocation4_spill] sm:$0xff]  ;;  %v6055_v23 = vld [vmem:[#allocation15_spill] sm:$0xff] }
 0x1ef   : > { %2467 = vst.msk [vmem:[%s5094_s16 + $0x108] sm:$0xff] %vm2434_vm1, %v2346_v25  ;;  %v6035_v25 = vld [vmem:[#allocation29_spill] sm:$0xff]  ;;  %v6056_v42 = vld [vmem:[#allocation7_spill] sm:$0xff] }
 0x1f0   : > { %2469 = vst.msk [vmem:[%s5094_s16 + $0x118] sm:$0xff] %vm2434_vm1, %v2348_v38  ;;  %v2414_v48 = vmul.f32 %v5138_v4, %v6035_v25  ;;  %v6043_v2 = vld [vmem:[#allocation53_spill] sm:$0xff]  ;;  %v6057_v6 = vld [vmem:[#allocation27_spill] sm:$0xff]  ;;  %v6058_v25 = vld [vmem:[#allocation50_spill] sm:$0xff] }
 0x1f1   : > { %2473 = vst.msk [vmem:[%s5094_s16 + $0x138] sm:$0xff] %vm2434_vm1, %v2352_v11  ;;  %v6050_v34 = vld [vmem:[#allocation69_spill] sm:$0xff] }
 0x1f2   : > { %2475 = vst.msk [vmem:[%s5094_s16 + $0x148] sm:$0xff] %vm2434_vm1, %v2354_v18  ;;  %v6039_v18 = vld [vmem:[#allocation67_spill] sm:$0xff] }
 0x1f3   : > { %v2201_v26 = vpop.permute.xlu1 %2200  ;;  %2478 = vst [vmem:[%s5094_s16 + $0x160] sm:$0xff] %v2357_v44  ;;  %v2071_v5 = vpop.permute.xlu2 %2070  ;;  %v6040_v44 = vld [vmem:[#allocation72_spill] sm:$0xff] }
 0x1f4   : > { %2479 = vst.msk [vmem:[%s5094_s16 + $0x168] sm:$0xff] %vm2434_vm1, %v2358_v36  ;;  %v2335_v32 = vmul.f32 %v2071_v5, %v6025_v50  ;;  %v2336_v7 = vmul.f32 %v2071_v5, %v6026_v46  ;;  %v2387_v41 = vmul.f32 %v2201_v26, %v6028_v27  ;;  %v2388_v1 = vmul.f32 %v2201_v26, %v6029_v52  ;;  %v6046_v5 = vld [vmem:[#allocation24_spill] sm:$0xff] }
 0x1f5   : > { %2481 = vst.msk [vmem:[%s5094_s16 + $0x178] sm:$0xff] %vm2434_vm1, %v2360_v47  ;;  %v5482_v21 = vpop.permute.xlu0 %2270  ;;  %v2419_v47 = vmul.f32 %v2281_v63, %v6042_v53  ;;  %v2316_v8 = vmul.f32 %v4627_v43, %v6046_v5  ;;  %v6049_v46 = vld [vmem:[#allocation68_spill] sm:$0xff] }
 0x1f6   : > { %2497 = vst.msk [vmem:[%s5094_s16 + $0x1f8] sm:$0xff] %vm2434_vm1, %v2376_v49  ;;  %v2420_v49 = vmul.f32 %v2281_v63, %v6043_v2  ;;  %v6067_v53 = vld [vmem:[#allocation84_spill] sm:$0xff]  ;;  %v6068_v2 = vld [vmem:[#allocation85_spill] sm:$0xff] }
 0x1f7   : > { %2499 = vst.msk [vmem:[%s5094_s16 + $0x208] sm:$0xff] %vm2434_vm1, %v2378_v45  ;;  %v2314_v45 = vmul.f32 %v6045_v12, %v6044_v19  ;;  %v6069_v19 = vld [vmem:[#allocation57_spill] sm:$0xff] }
 0x1f8   : > { %2456 = vst [vmem:[%s5094_s16 + $0xb0] sm:$0xff] %v2335_v32  ;;  %v6048_v32 = vld [vmem:[#allocation45_spill] sm:$0xff]  ;;  %v2386_v12 = vmul.f32 %v5447_v62, %v6069_v19 }
 0x1f9   : > { %2457 = vst.msk [vmem:[%s5094_s16 + $0xb8] sm:$0xff] %vm2434_vm1, %v2336_v7  ;;  %v2326_v63 = vmul.f32 %v5339_v58, %v6048_v32 }
 0x1fa   : > { %2503 = vst.msk [vmem:[%s5094_s16 + $0x228] sm:$0xff] %vm2434_vm1, %v2382_v20  ;;  %v6047_v20 = vld [vmem:[#allocation44_spill] sm:$0xff] }
 0x1fb   : > { %v2276_v13 = vpop.permute.xlu1 %2275  ;;  %2505 = vst.msk [vmem:[%s5094_s16 + $0x238] sm:$0xff] %vm2434_vm1, %v2384_v9  ;;  %v2146_v28 = vpop.permute.xlu2 %2145  ;;  %v2325_v50 = vmul.f32 %v5339_v58, %v6047_v20  ;;  %v6051_v58 = vld [vmem:[#allocation70_spill] sm:$0xff] }
 0x1fc   : > { %2508 = vst [vmem:[%s5094_s16 + $0x250] sm:$0xff] %v2387_v41  ;;  %v2417_v61 = vmul.f32 %v2276_v13, %v6036_v14  ;;  %v2365_v38 = vmul.f32 %v2146_v28, %v6037_v10  ;;  %v2366_v11 = vmul.f32 %v2146_v28, %v6038_v59  ;;  %v2418_v40 = vmul.f32 %v2276_v13, %v6039_v18  ;;  %v6059_v14 = vld [vmem:[#allocation51_spill] sm:$0xff]  ;;  %v6060_v28 = vld [vmem:[#allocation74_spill] sm:$0xff] }
 0x1fd   : > { %2509 = vst.msk [vmem:[%s5094_s16 + $0x258] sm:$0xff] %vm2434_vm1, %v2388_v1  ;;  %v2061_v4 = vpop.permute.xlu0 %2060  ;;  %v6052_v1 = vld [vmem:[#allocation71_spill] sm:$0xff]  ;;  %v6062_v59 = vld [vmem:[#allocation18_spill] sm:$0xff] }
 0x1fe   : > { %2511 = vst.msk [vmem:[%s5094_s16 + $0x268] sm:$0xff] %vm2434_vm1, %v2390_v30  ;;  %v2331_v7 = vmul.f32 %v2061_v4, %v6049_v46  ;;  %v2332_v43 = vmul.f32 %v2061_v4, %v6050_v34  ;;  %v6073_v46 = vld [vmem:[#allocation38_spill] sm:$0xff] }
 0x1ff   : > { %2527 = vst.msk [vmem:[%s5094_s16 + $0x2e8] sm:$0xff] %vm2434_vm1, %v2406_v60 }
 0x200   : > { %2529 = vst.msk [vmem:[%s5094_s16 + $0x2f8] sm:$0xff] %vm2434_vm1, %v2408_v33  ;;  %v2344_v33 = vmul.f32 %v6056_v42, %v6055_v23  ;;  %v6081_v42 = vld [vmem:[#allocation86_spill] sm:$0xff] }
 0x201   : > { %2533 = vst.msk [vmem:[%s5094_s16 + $0x318] sm:$0xff] %vm2434_vm1, %v2412_v55  ;;  %v2350_v55 = vmul.f32 %v5987_v29, %v6057_v6  ;;  %v6082_v6 = vld [vmem:[#allocation92_spill] sm:$0xff] }
 0x202   : > { %2535 = vst.msk [vmem:[%s5094_s16 + $0x328] sm:$0xff] %vm2434_vm1, %v2414_v48  ;;  %v2355_v48 = vmul.f32 %v5409_v3, %v6058_v25  ;;  %v6083_v25 = vld [vmem:[#allocation93_spill] sm:$0xff] }
 0x203   : > { %v2066_v37 = vpop.permute.xlu1 %2065  ;;  %2538 = vst [vmem:[%s5094_s16 + $0x340] sm:$0xff] %v2417_v61  ;;  %v2221_v27 = vpop.permute.xlu2 %2220  ;;  %v2356_v61 = vmul.f32 %v5409_v3, %v6059_v14 }
 0x204   : > { %v2333_v26 = vmul.f32 %v2066_v37, %v6040_v44  ;;  %v2334_v36 = vmul.f32 %v2066_v37, %v6041_v31  ;;  %2486 = vst [vmem:[%s5094_s16 + $0x1a0] sm:$0xff] %v2365_v38  ;;  %v2395_v41 = vmul.f32 %v2221_v27, %v6051_v58  ;;  %v2396_v13 = vmul.f32 %v2221_v27, %v6052_v1  ;;  %v6061_v38 = vld [vmem:[#allocation75_spill] sm:$0xff]  ;;  %v6063_v37 = vld [vmem:[#allocation33_spill] sm:$0xff]  ;;  %v6076_v27 = vld [vmem:[#allocation82_spill] sm:$0xff] }
 0x205   : > { %2487 = vst.msk [vmem:[%s5094_s16 + $0x1a8] sm:$0xff] %vm2434_vm1, %v2366_v11  ;;  %v2136_v9 = vpop.permute.xlu0 %2135  ;;  %v2374_v11 = vmul.f32 %v4474_v56, %v6062_v59  ;;  %v2380_v3 = vmul.f32 %v5177_v57, %v6063_v37  ;;  %v6066_v57 = vld [vmem:[#allocation56_spill] sm:$0xff]  ;;  %v6078_v1 = vld [vmem:[#allocation63_spill] sm:$0xff]  ;;  %v6088_v37 = vld [vmem:[#allocation97_spill] sm:$0xff] }
 0x206   : > { %2454 = vst [vmem:[%s5094_s16 + $0xa0] sm:$0xff] %v2333_v26  ;;  %v2361_v10 = vmul.f32 %v2136_v9, %v6060_v28  ;;  %v2362_v29 = vmul.f32 %v2136_v9, %v6061_v38  ;;  %v6065_v26 = vld [vmem:[#allocation77_spill] sm:$0xff]  ;;  %v6085_v28 = vld [vmem:[#allocation88_spill] sm:$0xff] }
 0x207   : > { %2455 = vst.msk [vmem:[%s5094_s16 + $0xa8] sm:$0xff] %vm2434_vm1, %v2334_v36  ;;  %v2385_v36 = vmul.f32 %v5447_v62, %v6066_v57  ;;  %v2409_v62 = vmul.f32 %v5266_v22, %v6073_v46  ;;  %v6086_v38 = vld [vmem:[#allocation89_spill] sm:$0xff]  ;;  %v6091_v57 = vld [vmem:[#allocation94_spill] sm:$0xff] }
 0x208   : > { %2539 = vst.msk [vmem:[%s5094_s16 + $0x348] sm:$0xff] %vm2434_vm1, %v2418_v40  ;;  %v6064_v40 = vld [vmem:[#allocation76_spill] sm:$0xff]  ;;  %v6097_v46 = vld [vmem:[#allocation101_spill] sm:$0xff] }
 0x209   : > { %2540 = vst [vmem:[%s5094_s16 + $0x350] sm:$0xff] %v2419_v47 }
 0x20a   : > { %2541 = vst.msk [vmem:[%s5094_s16 + $0x358] sm:$0xff] %vm2434_vm1, %v2420_v49 }
 0x20b   : > { %2435 = vst.msk [vmem:[%s5094_s16 + $0x8] sm:$0xff] %vm2434_vm1, %v2314_v45  ;;  %v2141_v52 = vpop.permute.xlu1 %2140  ;;  %v6070_v45 = vld [vmem:[#allocation80_spill] sm:$0xff] }
 0x20c   : > { %2437 = vst.msk [vmem:[%s5094_s16 + $0x18] sm:$0xff] %vm2434_vm1, %v2316_v8  ;;  %v2363_v30 = vmul.f32 %v2141_v52, %v6053_v51  ;;  %v2364_v60 = vmul.f32 %v2141_v52, %v6054_v39  ;;  %v6071_v8 = vld [vmem:[#allocation81_spill] sm:$0xff]  ;;  %v6079_v51 = vld [vmem:[#allocation90_spill] sm:$0xff]  ;;  %v6080_v39 = vld [vmem:[#allocation91_spill] sm:$0xff] }
 0x20d   : > { %2446 = vst [vmem:[%s5094_s16 + $0x60] sm:$0xff] %v2325_v50  ;;  %v2211_v4 = vpop.permute.xlu0 %2210  ;;  %v6072_v50 = vld [vmem:[#allocation21_spill] sm:$0xff] }
 0x20e   : > { %2447 = vst.msk [vmem:[%s5094_s16 + $0x68] sm:$0xff] %vm2434_vm1, %v2326_v63  ;;  %v2391_v5 = vmul.f32 %v2211_v4, %v6070_v45  ;;  %v2392_v20 = vmul.f32 %v2211_v4, %v6071_v8  ;;  %v2404_v32 = vmul.f32 %v4557_v54, %v6072_v50 }
 0x20f   : > { %2452 = vst [vmem:[%s5094_s16 + $0x90] sm:$0xff] %v2331_v7  ;;  %v6074_v7 = vld [vmem:[#allocation39_spill] sm:$0xff] }
 0x210   : > { %2453 = vst.msk [vmem:[%s5094_s16 + $0x98] sm:$0xff] %vm2434_vm1, %v2332_v43  ;;  %v2410_v34 = vmul.f32 %v5266_v22, %v6074_v7  ;;  %v6075_v43 = vld [vmem:[#allocation62_spill] sm:$0xff]  ;;  %v6098_v7 = vld [vmem:[#allocation105_spill] sm:$0xff] }
 0x211   : > { %2516 = vst [vmem:[%s5094_s16 + $0x290] sm:$0xff] %v2395_v41  ;;  %v2415_v9 = vmul.f32 %v5482_v21, %v6075_v43  ;;  %v6077_v41 = vld [vmem:[#allocation83_spill] sm:$0xff] }
 0x212   : > { %2484 = vst [vmem:[%s5094_s16 + $0x190] sm:$0xff] %v2363_v30 }
 0x213   : > { %2485 = vst.msk [vmem:[%s5094_s16 + $0x198] sm:$0xff] %vm2434_vm1, %v2364_v60  ;;  %v2216_v56 = vpop.permute.xlu1 %2215 }
 0x214   : > { %2517 = vst.msk [vmem:[%s5094_s16 + $0x298] sm:$0xff] %vm2434_vm1, %v2396_v13  ;;  %v2393_v47 = vmul.f32 %v2216_v56, %v6067_v53  ;;  %v2394_v49 = vmul.f32 %v2216_v56, %v6068_v2  ;;  %v2416_v13 = vmul.f32 %v5482_v21, %v6078_v1  ;;  %v6084_v21 = vld [vmem:[#allocation87_spill] sm:$0xff] }
 0x215   : > { %2465 = vst.msk [vmem:[%s5094_s16 + $0xf8] sm:$0xff] %vm2434_vm1, %v2344_v33  ;;  %v2286_v63 = vpop.permute.xlu0 %2285  ;;  %v6092_v53 = vld [vmem:[#allocation95_spill] sm:$0xff] }
 0x216   : > { %2471 = vst.msk [vmem:[%s5094_s16 + $0x128] sm:$0xff] %vm2434_vm1, %v2350_v55  ;;  %v2421_v33 = vmul.f32 %v2286_v63, %v6081_v42  ;;  %v2422_v14 = vmul.f32 %v2286_v63, %v6084_v21 }
 0x217   : > { %2476 = vst [vmem:[%s5094_s16 + $0x150] sm:$0xff] %v2355_v48 }
 0x218   : > { %2477 = vst.msk [vmem:[%s5094_s16 + $0x158] sm:$0xff] %vm2434_vm1, %v2356_v61 }
 0x219   : > { %2482 = vst [vmem:[%s5094_s16 + $0x180] sm:$0xff] %v2361_v10 }
 0x21a   : > { %2483 = vst.msk [vmem:[%s5094_s16 + $0x188] sm:$0xff] %vm2434_vm1, %v2362_v29 }
 0x21b   : > { %2495 = vst.msk [vmem:[%s5094_s16 + $0x1e8] sm:$0xff] %vm2434_vm1, %v2374_v11  ;;  %v2291_v22 = vpop.permute.xlu1 %2290  ;;  %v6087_v11 = vld [vmem:[#allocation96_spill] sm:$0xff] }
 0x21c   : > { %2501 = vst.msk [vmem:[%s5094_s16 + $0x218] sm:$0xff] %vm2434_vm1, %v2380_v3  ;;  %v2423_v30 = vmul.f32 %v2291_v22, %v6079_v51  ;;  %v2424_v60 = vmul.f32 %v2291_v22, %v6080_v39 }
 0x21d   : > { %2514 = vst [vmem:[%s5094_s16 + $0x280] sm:$0xff] %v2393_v47  ;;  %v2076_v23 = vpop.permute.xlu0 %2075 }
 0x21e   : > { %2515 = vst.msk [vmem:[%s5094_s16 + $0x288] sm:$0xff] %vm2434_vm1, %v2394_v49  ;;  %v2337_v55 = vmul.f32 %v2076_v23, %v6082_v6  ;;  %v2338_v48 = vmul.f32 %v2076_v23, %v6083_v25  ;;  %v6093_v49 = vld [vmem:[#allocation102_spill] sm:$0xff] }
 0x21f   : > { %2506 = vst [vmem:[%s5094_s16 + $0x240] sm:$0xff] %v2385_v36 }
 0x220   : > { %v2296_v18 = vpop.permute.xlu2 %2295  ;;  %2507 = vst.msk [vmem:[%s5094_s16 + $0x248] sm:$0xff] %vm2434_vm1, %v2386_v12  ;;  %v6094_v12 = vld [vmem:[#allocation103_spill] sm:$0xff] }
 0x221   : > { %v2425_v44 = vmul.f32 %v2296_v18, %v6064_v40  ;;  %v2426_v31 = vmul.f32 %v2296_v18, %v6065_v26  ;;  %2512 = vst [vmem:[%s5094_s16 + $0x270] sm:$0xff] %v2391_v5  ;;  %v6089_v40 = vld [vmem:[#allocation98_spill] sm:$0xff]  ;;  %v6090_v26 = vld [vmem:[#allocation99_spill] sm:$0xff] }
 0x222   : > { %2513 = vst.msk [vmem:[%s5094_s16 + $0x278] sm:$0xff] %vm2434_vm1, %v2392_v20  ;;  %v6095_v20 = vld [vmem:[#allocation104_spill] sm:$0xff] }
 0x223   : > { %2546 = vst [vmem:[%s5094_s16 + $0x380] sm:$0xff] %v2425_v44 }
 0x224   : > { %2547 = vst.msk [vmem:[%s5094_s16 + $0x388] sm:$0xff] %vm2434_vm1, %v2426_v31 }
 0x225   : > { %2525 = vst.msk [vmem:[%s5094_s16 + $0x2d8] sm:$0xff] %vm2434_vm1, %v2404_v32  ;;  %v6096_v32 = vld [vmem:[#allocation100_spill] sm:$0xff] }
 0x226   : > { %2530 = vst [vmem:[%s5094_s16 + $0x300] sm:$0xff] %v2409_v62 }
 0x227   : > { %2531 = vst.msk [vmem:[%s5094_s16 + $0x308] sm:$0xff] %vm2434_vm1, %v2410_v34 }
 0x228   : > { %2536 = vst [vmem:[%s5094_s16 + $0x330] sm:$0xff] %v2415_v9 }
 0x229   : > { %v2086_v54 = vpop.permute.xlu2 %2085  ;;  %2544 = vst [vmem:[%s5094_s16 + $0x370] sm:$0xff] %v2423_v30 }
 0x22a   : > { %v2341_v58 = vmul.f32 %v2086_v54, %v6076_v27  ;;  %v2342_v52 = vmul.f32 %v2086_v54, %v6077_v41  ;;  %2545 = vst.msk [vmem:[%s5094_s16 + $0x378] sm:$0xff] %vm2434_vm1, %v2424_v60 }
 0x22b   : > { %2537 = vst.msk [vmem:[%s5094_s16 + $0x338] sm:$0xff] %vm2434_vm1, %v2416_v13 }
 0x22c   : > { %2462 = vst [vmem:[%s5094_s16 + $0xe0] sm:$0xff] %v2341_v58 }
 0x22d   : > { %2463 = vst.msk [vmem:[%s5094_s16 + $0xe8] sm:$0xff] %vm2434_vm1, %v2342_v52 }
 0x22e   : > { %2458 = vst [vmem:[%s5094_s16 + $0xc0] sm:$0xff] %v2337_v55 }
 0x22f   : > { %2459 = vst.msk [vmem:[%s5094_s16 + $0xc8] sm:$0xff] %vm2434_vm1, %v2338_v48 }
 0x230   : > { %2542 = vst [vmem:[%s5094_s16 + $0x360] sm:$0xff] %v2421_v33 }
 0x231   : > { %2543 = vst.msk [vmem:[%s5094_s16 + $0x368] sm:$0xff] %vm2434_vm1, %v2422_v14 }
 0x236   : > { %v2161_v61 = vpop.permute.xlu2 %2160 }
 0x237   : > { %v2371_v10 = vmul.f32 %v2161_v61, %v6085_v28  ;;  %v2372_v29 = vmul.f32 %v2161_v61, %v6086_v38 }
 0x239   : > { %2492 = vst [vmem:[%s5094_s16 + $0x1d0] sm:$0xff] %v2371_v10 }
 0x23a   : > { %2493 = vst.msk [vmem:[%s5094_s16 + $0x1d8] sm:$0xff] %vm2434_vm1, %v2372_v29 }
 0x23b   : > { %v2081_v59 = vpop.permute.xlu1 %2080 }
 0x23c   : > { %v2339_v4 = vmul.f32 %v2081_v59, %v6087_v11  ;;  %v2340_v3 = vmul.f32 %v2081_v59, %v6088_v37 }
 0x23e   : > { %2460 = vst [vmem:[%s5094_s16 + $0xd0] sm:$0xff] %v2339_v4  ;;  %v2236_v56 = vpop.permute.xlu2 %2235 }
 0x23f   : > { %2461 = vst.msk [vmem:[%s5094_s16 + $0xd8] sm:$0xff] %vm2434_vm1, %v2340_v3  ;;  %v2401_v36 = vmul.f32 %v2236_v56, %v6091_v57  ;;  %v2402_v47 = vmul.f32 %v2236_v56, %v6092_v53 }
 0x241   : > { %v2151_v18 = vpop.permute.xlu0 %2150  ;;  %2522 = vst [vmem:[%s5094_s16 + $0x2c0] sm:$0xff] %v2401_v36 }
 0x242   : > { %v2367_v44 = vmul.f32 %v2151_v18, %v6089_v40  ;;  %v2368_v31 = vmul.f32 %v2151_v18, %v6090_v26  ;;  %2523 = vst.msk [vmem:[%s5094_s16 + $0x2c8] sm:$0xff] %vm2434_vm1, %v2402_v47 }
 0x244   : > { %2488 = vst [vmem:[%s5094_s16 + $0x1b0] sm:$0xff] %v2367_v44 }
 0x245   : > { %2489 = vst.msk [vmem:[%s5094_s16 + $0x1b8] sm:$0xff] %vm2434_vm1, %v2368_v31 }
 0x246   : > { %v2156_v2 = vpop.permute.xlu1 %2155  ;;  %v2311_v8 = vpop.permute.xlu2 %2310 }
 0x247   : > { %v2369_v19 = vmul.f32 %v2156_v2, %v6093_v49  ;;  %v2370_v45 = vmul.f32 %v2156_v2, %v6094_v12  ;;  %v2431_v63 = vmul.f32 %v2311_v8, %v6096_v32  ;;  %v2432_v62 = vmul.f32 %v2311_v8, %v6097_v46 }
 0x249   : > { %v2226_v5 = vpop.permute.xlu0 %2225  ;;  %2490 = vst [vmem:[%s5094_s16 + $0x1c0] sm:$0xff] %v2369_v19 }
 0x24a   : > { %v2397_v50 = vmul.f32 %v2226_v5, %v6095_v20  ;;  %2491 = vst.msk [vmem:[%s5094_s16 + $0x1c8] sm:$0xff] %vm2434_vm1, %v2370_v45  ;;  %v2398_v34 = vmul.f32 %v2226_v5, %v6098_v7 }
 0x24b   : > { %2552 = vst [vmem:[%s5094_s16 + $0x3b0] sm:$0xff] %v2431_v63 }
 0x24c   : > { %2518 = vst [vmem:[%s5094_s16 + $0x2a0] sm:$0xff] %v2397_v50 }
 0x24d   : > { %2553 = vst.msk [vmem:[%s5094_s16 + $0x3b8] sm:$0xff] %vm2434_vm1, %v2432_v62 }
 0x24e   : > { %2519 = vst.msk [vmem:[%s5094_s16 + $0x2a8] sm:$0xff] %vm2434_vm1, %v2398_v34  ;;  %v2231_v43 = vpop.permute.xlu1 %2230 }
 0x24f   : > { %v2399_v9 = vmul.f32 %v2231_v43, %v5081_v35  ;;  %v2400_v54 = vmul.f32 %v2231_v43, %v5084_v0 }
 0x251   : > { %v2301_v27 = vpop.permute.xlu0 %2300  ;;  %2520 = vst [vmem:[%s5094_s16 + $0x2b0] sm:$0xff] %v2399_v9 }
 0x252   : > { %v2427_v58 = vmul.f32 %v2301_v27, %v5087_v17  ;;  %v2428_v41 = vmul.f32 %v2301_v27, %v5107_v24  ;;  %2521 = vst.msk [vmem:[%s5094_s16 + $0x2b8] sm:$0xff] %vm2434_vm1, %v2400_v54 }
 0x254   : > { %2548 = vst [vmem:[%s5094_s16 + $0x390] sm:$0xff] %v2427_v58 }
 0x255   : > { %2549 = vst.msk [vmem:[%s5094_s16 + $0x398] sm:$0xff] %vm2434_vm1, %v2428_v41 }
 0x256   : > { %v2306_v52 = vpop.permute.xlu1 %2305 }
 0x257   : > { %v2429_v22 = vmul.f32 %v2306_v52, %v5110_v16  ;;  %v2430_v1 = vmul.f32 %v2306_v52, %v5113_v15 }
 0x259   : > { %2550 = vst [vmem:[%s5094_s16 + $0x3a0] sm:$0xff] %v2429_v22 }
 0x25a   : > { %2551 = vst.msk [vmem:[%s5094_s16 + $0x3a8] sm:$0xff] %vm2434_vm1, %v2430_v1 }
 0x25b PF: > { %s14_s15 = sadd.s32 1, %s3044_s15  }
 0x25c   : > { %p11_p4 = scmp.ge.s32.totalorder %s14_s15, 4  }
 0x25e   :  { %13 = sbr.rel (!%p11_p4) target bundleno = 1 (0x1), region = 72 }

</bundles_post_ra>
